<compile_context>
chip_gen: v5e
topology: v5e:2x2
jax: 0.10.0
libtpu: 0.0.40
codegen_flags: <defaults>
</compile_context>

<pallas_src>
import jax
import jax.numpy as jnp
from jax import lax
from jax.experimental import pallas as pl
from jax.experimental.pallas import tpu as pltpu

LANE = 128
_WL = 8          # sublane-aligned left pad of the h1 staging scratch


def _round_up(x, m):
    return (x + m - 1) // m * m


def _pick_row_tile(hout, target=8):
    th = min(target, hout)
    while hout % th:
        th -= 1
    return th


def _vmem_limit_bytes():
    """Generation-aware scoped-VMEM limit (headroom below physical VMEM)."""
    cap = 128 * 1024 * 1024
    try:
        cap = pltpu.get_tpu_info().vmem_capacity_bytes
    except Exception:                      # query unavailable -> assume 128 MiB
        pass
    return int(min(96 * 1024 * 1024, cap * 3 // 4))   # ~48 MiB on 64 MiB v7x


# ------------------------------ fused kernel -------------------------------- #

def _make_basic_block_kernel(*, stride, hout, wout, th, cout_p, downsample,
                             pair_taps=True):
    s = stride
    nt = hout // th
    m1 = (th + 2) * wout            # conv1 rows per tile (incl. conv2 row halo)
    m2 = th * wout                  # conv2 / output rows per tile
    wrows = th + 2 + 2 // s         # phase-window rows consumed per tile

    def _accum_taps(taps, w_ref, m):
        """Per-tap matmuls accumulated in f32.  Consecutive taps are paired
        (K = 2*128) so each MXU pass fills the 256-deep array on v6e/v7x."""
        offs = [0]
        for tp in taps:
            offs.append(offs[-1] + tp.shape[-1])
        acc = None
        i = 0
        while i < len(taps):
            j = min(i + (2 if pair_taps else 1), len(taps))
            if j - i == 1:
                lhs = taps[i].reshape(m, -1)
            else:
                lhs = jnp.concatenate([tp.reshape(m, -1) for tp in taps[i:j]],
                                      axis=-1)
            part = jnp.dot(lhs, w_ref[offs[i]:offs[j], :],
                           preferred_element_type=jnp.float32)
            acc = part if acc is None else acc + part
            i = j
        return acc

    def kernel(x_ref, w1_ref, b1_ref, w2_ref, b2_ref, out_ref, h1p_ref):
        t = pl.program_id(1)
        r0 = pl.multiple_of(t * th, th)

        # Row window of every polyphase component of the padded input for this
        # tile (stride 1 has a single phase == the padded input itself).
        wins = [x_ref[p, pl.ds(r0, wrows), :, :] for p in range(s * s)]

        def tap_x(rr, cc, nrows):
            # Input pixels at window rows rr, rr+s, ... / cols cc, cc+s, ...
            # as a *contiguous* slice of one polyphase component.
            w = wins[(rr % s) * s + (cc % s)]
            return w[rr // s:rr // s + nrows, cc // s:cc // s + wout, :]

        # ---- conv1 + folded bn1 + relu (also computes conv2's row halo) ---- #
        taps1 = [tap_x(dy, dx, th + 2) for dy in range(3) for dx in range(3)]
        h1 = jnp.maximum(_accum_taps(taps1, w1_ref, m1) + b1_ref[...], 0.0)

        # ---- stage h1 in VMEM (bf16); interior store is sublane-aligned ---- #
        h1p_ref[:, _WL:_WL + wout, :] = h1.reshape(th + 2, wout, cout_p).astype(
            h1p_ref.dtype)
        zcol = jnp.zeros((th + 2, 1, cout_p), h1p_ref.dtype)
        h1p_ref[:, _WL - 1:_WL, :] = zcol                  # left  W halo
        h1p_ref[:, _WL + wout:_WL + wout + 1, :] = zcol    # right W halo
        zrow = jnp.zeros((1, _WL + wout + 1, cout_p), h1p_ref.dtype)

        @pl.when(t == 0)                                   # top image boundary
        def _():
            h1p_ref[0:1, :, :] = zrow

        @pl.when(t == nt - 1)                              # bottom image boundary
        def _():
            h1p_ref[th + 1:th + 2, :, :] = zrow

        # ---- conv2 + folded bn2 (+ fused 1x1 downsample), residual, relu --- #
        taps2 = [h1p_ref[dy:dy + th, _WL - 1 + dx:_WL - 1 + dx + wout, :]
                 for dy in range(3) for dx in range(3)]
        sc_in = tap_x(s + 1, 1, th)                        # shortcut input pixels
        if downsample:
            taps2.append(sc_in)                            # 1x1 conv stacked in K
        out = _accum_taps(taps2, w2_ref, m2) + b2_ref[...]
        if not downsample:
            out = out + sc_in.reshape(m2, -1).astype(jnp.float32)
        out = jnp.maximum(out, 0.0)
        out_ref[...] = out.reshape(th, wout, cout_p).astype(out_ref.dtype)

    return kernel


# --------------------------- one-time param prep ----------------------------- #

def prepare_block_params(params, *, stride):
    """Fold inference BN into conv weights / biases, lane-pad to 128 and cast
    matmul operands to bf16.  Weights are static, so this runs once."""
    w1, w2 = params["w1"], params["w2"]                    # HWIO
    cin, cout = w1.shape[2], w1.shape[3]
    cin_p, cout_p = _round_up(cin, LANE), _round_up(cout, LANE)
    downsample = (stride != 1) or (cin != cout)

    def pad_io(w, ci_p, co_p):
        return jnp.pad(w, [(0, 0)] * (w.ndim - 2)
                       + [(0, ci_p - w.shape[-2]), (0, co_p - w.shape[-1])])

    w1f = pad_io(w1 * params["bn1_scale"], cin_p, cout_p)
    w1f = w1f.reshape(9 * cin_p, cout_p).astype(jnp.bfloat16)
    b1f = jnp.pad(params["bn1_bias"], (0, cout_p - cout))
    b1f = b1f.reshape(1, cout_p).astype(jnp.float32)

    w2f = pad_io(w2 * params["bn2_scale"], cout_p, cout_p)
    w2f = w2f.reshape(9 * cout_p, cout_p).astype(jnp.bfloat16)
    b2 = params["bn2_bias"]
    if downsample:
        wsf = pad_io(params["ws"] * params["bn_sc_scale"][None, :], cin_p, cout_p)
        w2f = jnp.concatenate([w2f, wsf.astype(jnp.bfloat16)], axis=0)
        b2 = b2 + params["bn_sc_bias"]
    b2f = jnp.pad(b2, (0, cout_p - cout)).reshape(1, cout_p).astype(jnp.float32)

    return dict(w1f=w1f, b1f=b1f, w2f=w2f, b2f=b2f,
                cin=cin, cout=cout, cin_p=cin_p, cout_p=cout_p,
                downsample=downsample)


# --------------------------------- wrapper ----------------------------------- #

def basic_block_apply(x_nhwc_p, prep, *, stride, row_tile=None, pair_taps=True):
    """Fused BasicBlock on a lane-padded bf16 NHWC activation.
    x_nhwc_p: (N, H, W, Cin_p) bf16.  Returns (N, Hout, Wout, Cout_p) bf16."""
    n, h, w, cin_p = x_nhwc_p.shape
    assert cin_p == prep["cin_p"], (cin_p, prep["cin_p"])
    s = stride
    cout_p = prep["cout_p"]
    hout = (h - 1) // s + 1
    wout = (w - 1) // s + 1
    th = _pick_row_tile(hout) if row_tile is None else row_tile
    assert hout % th == 0, (hout, th)        # TODO(synk): support ragged tiles
    nt = hout // th

    # conv pad 1 plus an extra `s` rows top/bottom so every row tile reads a
    # uniform, in-bounds window; then split into s*s polyphase components so
    # all in-kernel tap slices are contiguous (no strided gathers).
    xp = jnp.pad(x_nhwc_p, ((0, 0), (1 + s, 1 + s), (1, 1), (0, 0)))
    hp, wp = h + 2 + 2 * s, w + 2
    hph, wph = -(-hp // s), -(-wp // s)
    phases = []
    for a in range(s):
        for b in range(s):
            ph = xp[:, a::s, b::s, :]
            ph = jnp.pad(ph, ((0, 0), (0, hph - ph.shape[1]),
                              (0, wph - ph.shape[2]), (0, 0)))
            phases.append(ph)
    xph = jnp.stack(phases, axis=1)                  # (N, s*s, Hph, Wph, Cin_p)

    kernel = _make_basic_block_kernel(
        stride=s, hout=hout, wout=wout, th=th, cout_p=cout_p,
        downsample=prep["downsample"], pair_taps=pair_taps)

    # Weights / biases: whole-array VMEM residents (single-buffered; constant
    # index, so pipelined double-buffering would only waste VMEM).
    wspec = pl.BlockSpec(memory_space=pltpu.MemorySpace.VMEM)

    return pl.pallas_call(
        kernel,
        out_shape=jax.ShapeDtypeStruct((n, hout, wout, cout_p), jnp.bfloat16),
        grid=(n, nt),
        in_specs=[
            pl.BlockSpec((None, s * s, hph, wph, cin_p),
                         lambda b, t: (b, 0, 0, 0, 0)),
            wspec, wspec, wspec, wspec,
        ],
        out_specs=pl.BlockSpec((None, th, wout, cout_p),
                               lambda b, t: (b, t, 0, 0)),
        scratch_shapes=[pltpu.VMEM((th + 2, _WL + wout + 1, cout_p),
                                   jnp.bfloat16)],
        compiler_params=pltpu.CompilerParams(
            dimension_semantics=("parallel", "parallel"),
            vmem_limit_bytes=_vmem_limit_bytes()),
    )(xph, prep["w1f"], prep["b1f"], prep["w2f"], prep["b2f"])


def basic_block_forward(x_nchw, prep, *, stride, row_tile=None):
    """Demo wrapper with PyTorch-style NCHW f32 I/O.  In a full network keep
    activations as lane-padded bf16 NHWC between blocks (basic_block_apply's
    native I/O) and do these layout conversions once at the network boundary."""
    x = jnp.transpose(x_nchw, (0, 2, 3, 1)).astype(jnp.bfloat16)
    x = jnp.pad(x, ((0, 0), (0, 0), (0, 0), (0, prep["cin_p"] - x.shape[-1])))
    y = basic_block_apply(x, prep, stride=stride, row_tile=row_tile)
    y = y[..., :prep["cout"]].astype(jnp.float32)
    return jnp.transpose(y, (0, 3, 1, 2))


# ----------------------------- pure-JAX reference ---------------------------- #

def ref_forward(x_nchw, params, stride, mirror_bf16=False):
    """BasicBlock reference via lax.conv.  mirror_bf16=True reproduces the
    kernel's bf16 rounding (folded-BN bf16 operands, bf16 h1 / output)."""
    cast = ((lambda a: a.astype(jnp.bfloat16).astype(jnp.float32))
            if mirror_bf16 else (lambda a: a))
    x = jnp.transpose(x_nchw, (0, 2, 3, 1)).astype(jnp.float32)
    cin, cout = x.shape[-1], params["w1"].shape[-1]
    dn = ("NHWC", "HWIO", "NHWC")
    prec = lax.Precision.HIGHEST
    xc = cast(x)

    w1 = cast(params["w1"] * params["bn1_scale"])
    h = lax.conv_general_dilated(xc, w1, (stride, stride), [(1, 1), (1, 1)],
                                 dimension_numbers=dn, precision=prec)
    h = cast(jnp.maximum(h + params["bn1_bias"], 0.0))

    w2 = cast(params["w2"] * params["bn2_scale"])
    out = lax.conv_general_dilated(h, w2, (1, 1), [(1, 1), (1, 1)],
                                   dimension_numbers=dn, precision=prec)
    out = out + params["bn2_bias"]
    if stride != 1 or cin != cout:
        ws = cast(params["ws"] * params["bn_sc_scale"][None, :])
        ws = ws.reshape(1, 1, cin, cout)
        sc = lax.conv_general_dilated(xc, ws, (stride, stride), "VALID",
                                      dimension_numbers=dn, precision=prec)
        sc = sc + params["bn_sc_bias"]
    else:
        sc = xc
    out = cast(jnp.maximum(out + sc, 0.0))
    return jnp.transpose(out, (0, 3, 1, 2))


# ------------------------------------ main ----------------------------------- #

if __name__ == "__main__":
    key = jax.random.PRNGKey(0)
    eps = 1e-5

    def make_bn(k, c):
        kg, kb, km, kv = jax.random.split(k, 4)
        g = 1.0 + 0.1 * jax.random.normal(kg, (c,), jnp.float32)
        b = 0.1 * jax.random.normal(kb, (c,), jnp.float32)
        m = 0.1 * jax.random.normal(km, (c,), jnp.float32)
        v = 0.5 + jnp.abs(jax.random.normal(kv, (c,), jnp.float32))
        sc = g / jnp.sqrt(v + eps)
        return sc, b - m * sc              # folded inference-BN scale / bias

    def make_params(k, cin, cout):
        ks = jax.random.split(k, 6)
        w1 = 0.1 * jax.random.normal(ks[0], (3, 3, cin, cout), jnp.float32)
        w2 = 0.1 * jax.random.normal(ks[1], (3, 3, cout, cout), jnp.float32)
        ws = 0.1 * jax.random.normal(ks[2], (cin, cout), jnp.float32)
        s1, b1 = make_bn(ks[3], cout)
        s2, b2 = make_bn(ks[4], cout)
        ssc, bsc = make_bn(ks[5], cout)
        return dict(w1=w1, w2=w2, ws=ws,
                    bn1_scale=s1, bn1_bias=b1, bn2_scale=s2, bn2_bias=b2,
                    bn_sc_scale=ssc, bn_sc_bias=bsc)

    #         cin cout stride  N   H   W  row_tile
    cases = [
        (4,    8,    1,     2, 16, 16, None),   # projection shortcut (Cin != Cout)
        (8,    8,    1,     2, 16, 16, 8),      # identity shortcut
        (8,   16,    2,     2, 16, 16, 4),      # strided downsample block
    ]
    for i, (cin, cout, stride, n, h, w, rt) in enumerate(cases):
        key, kp, kx = jax.random.split(key, 3)
        params = make_params(kp, cin, cout)
        x = jax.random.normal(kx, (n, cin, h, w), jnp.float32)   # NCHW

        prep = prepare_block_params(params, stride=stride)       # one-time prep
        out = jax.block_until_ready(
            basic_block_forward(x, prep, stride=stride, row_tile=rt))

        hout, wout = (h - 1) // stride + 1, (w - 1) // stride + 1
        assert out.shape == (n, cout, hout, wout), (i, out.shape)

        # Tight check vs a reference mirroring the kernel's bf16 rounding.
        ref_bf = ref_forward(x, params, stride, mirror_bf16=True)
        err_bf = float(jnp.max(jnp.abs(out - ref_bf)))
        assert jnp.allclose(out, ref_bf, atol=3e-2, rtol=3e-2), (i, err_bf)
        # Loose semantic check vs the pure-f32 ground truth.
        ref32 = ref_forward(x, params, stride, mirror_bf16=False)
        err32 = float(jnp.max(jnp.abs(out - ref32)))
        assert jnp.allclose(out, ref32, atol=1.5e-1, rtol=1.5e-1), (i, err32)

    print("KERNEL_OK")
</pallas_src>

<mosaic_0001>
module attributes {stable_mosaic.version = 11 : i64} {
  func.func @kernel(%arg0: i32, %arg1: i32, %arg2: memref<1x1x20x18x128xbf16, #tpu.memory_space<vmem>>, %arg3: memref<1152x128xbf16, #tpu.memory_space<vmem>>, %arg4: memref<1x128xf32, #tpu.memory_space<vmem>>, %arg5: memref<1280x128xbf16, #tpu.memory_space<vmem>>, %arg6: memref<1x128xf32, #tpu.memory_space<vmem>>, %arg7: memref<1x8x16x128xbf16, #tpu.memory_space<vmem>>, %arg8: memref<10x25x128xbf16, #tpu.memory_space<vmem>>) attributes {dimension_semantics = [#tpu.dimension_semantics<parallel>, #tpu.dimension_semantics<parallel>], iteration_bounds = array<i64: 2, 2>, scalar_prefetch = 0 : i64, scratch_operands = 1 : i64, tpu.core_type = #tpu.core_type<tc>, window_params = [{transform_indices = @transform_0, window_bounds = array<i64: 1, 1, 20, 18, 128>}, {pipeline_mode = #tpu.pipeline_mode<synchronous>, transform_indices = @transform_1, window_bounds = array<i64: 1152, 128>}, {pipeline_mode = #tpu.pipeline_mode<synchronous>, transform_indices = @transform_2, window_bounds = array<i64: 1, 128>}, {pipeline_mode = #tpu.pipeline_mode<synchronous>, transform_indices = @transform_3, window_bounds = array<i64: 1280, 128>}, {pipeline_mode = #tpu.pipeline_mode<synchronous>, transform_indices = @transform_4, window_bounds = array<i64: 1, 128>}, {transform_indices = @transform_5, window_bounds = array<i64: 1, 8, 16, 128>}]} {
    %c8_i32 = arith.constant 8 : i32
    %0 = arith.muli %arg1, %c8_i32 : i32
    %1 = tpu.assume_multiple %0, 8 : i32
    %c0 = arith.constant 0 : index
    %c0_0 = arith.constant 0 : index
    %2 = arith.index_cast %1 : i32 to index
    %c0_1 = arith.constant 0 : index
    %c0_2 = arith.constant 0 : index
    %3 = vector.load %arg2[%c0, %c0_0, %2, %c0_1, %c0_2] : memref<1x1x20x18x128xbf16, #tpu.memory_space<vmem>>, vector<1x1x12x18x128xbf16>
    %4 = vector.shape_cast %3 : vector<1x1x12x18x128xbf16> to vector<12x18x128xbf16>
    %5 = vector.extract_strided_slice %4 {offsets = [0, 0, 0], sizes = [10, 16, 128], strides = [1, 1, 1]} : vector<12x18x128xbf16> to vector<10x16x128xbf16>
    %6 = vector.extract_strided_slice %4 {offsets = [0, 1, 0], sizes = [10, 16, 128], strides = [1, 1, 1]} : vector<12x18x128xbf16> to vector<10x16x128xbf16>
    %7 = vector.extract_strided_slice %4 {offsets = [0, 2, 0], sizes = [10, 16, 128], strides = [1, 1, 1]} : vector<12x18x128xbf16> to vector<10x16x128xbf16>
    %8 = vector.extract_strided_slice %4 {offsets = [1, 0, 0], sizes = [10, 16, 128], strides = [1, 1, 1]} : vector<12x18x128xbf16> to vector<10x16x128xbf16>
    %9 = vector.extract_strided_slice %4 {offsets = [1, 1, 0], sizes = [10, 16, 128], strides = [1, 1, 1]} : vector<12x18x128xbf16> to vector<10x16x128xbf16>
    %10 = vector.extract_strided_slice %4 {offsets = [1, 2, 0], sizes = [10, 16, 128], strides = [1, 1, 1]} : vector<12x18x128xbf16> to vector<10x16x128xbf16>
    %11 = vector.extract_strided_slice %4 {offsets = [2, 0, 0], sizes = [10, 16, 128], strides = [1, 1, 1]} : vector<12x18x128xbf16> to vector<10x16x128xbf16>
    %12 = vector.extract_strided_slice %4 {offsets = [2, 1, 0], sizes = [10, 16, 128], strides = [1, 1, 1]} : vector<12x18x128xbf16> to vector<10x16x128xbf16>
    %13 = vector.extract_strided_slice %4 {offsets = [2, 2, 0], sizes = [10, 16, 128], strides = [1, 1, 1]} : vector<12x18x128xbf16> to vector<10x16x128xbf16>
    %14 = vector.shape_cast %5 : vector<10x16x128xbf16> to vector<160x128xbf16>
    %15 = vector.shape_cast %6 : vector<10x16x128xbf16> to vector<160x128xbf16>
    %16 = tpu.concatenate %14, %15 in 1 : vector<160x128xbf16>, vector<160x128xbf16> -> vector<160x256xbf16>
    %c0_3 = arith.constant 0 : index
    %c0_4 = arith.constant 0 : index
    %17 = vector.load %arg3[%c0_3, %c0_4] : memref<1152x128xbf16, #tpu.memory_space<vmem>>, vector<256x128xbf16>
    %cst = arith.constant dense<0.000000e+00> : vector<160x128xf32>
    %18 = tpu.matmul %16, %17, %cst {dimension_numbers = #tpu.dot_dimension_numbers<[1], [0], [0], [1], [0, 0, 1, 1], [], []>} : vector<160x256xbf16>, vector<256x128xbf16>, vector<160x128xf32> -> vector<160x128xf32>
    %19 = vector.shape_cast %7 : vector<10x16x128xbf16> to vector<160x128xbf16>
    %20 = vector.shape_cast %8 : vector<10x16x128xbf16> to vector<160x128xbf16>
    %21 = tpu.concatenate %19, %20 in 1 : vector<160x128xbf16>, vector<160x128xbf16> -> vector<160x256xbf16>
    %c256 = arith.constant 256 : index
    %c0_5 = arith.constant 0 : index
    %22 = vector.load %arg3[%c256, %c0_5] : memref<1152x128xbf16, #tpu.memory_space<vmem>>, vector<256x128xbf16>
    %cst_6 = arith.constant dense<0.000000e+00> : vector<160x128xf32>
    %23 = tpu.matmul %21, %22, %cst_6 {dimension_numbers = #tpu.dot_dimension_numbers<[1], [0], [0], [1], [0, 0, 1, 1], [], []>} : vector<160x256xbf16>, vector<256x128xbf16>, vector<160x128xf32> -> vector<160x128xf32>
    %24 = arith.addf %18, %23 : vector<160x128xf32>
    %25 = vector.shape_cast %9 : vector<10x16x128xbf16> to vector<160x128xbf16>
    %26 = vector.shape_cast %10 : vector<10x16x128xbf16> to vector<160x128xbf16>
    %27 = tpu.concatenate %25, %26 in 1 : vector<160x128xbf16>, vector<160x128xbf16> -> vector<160x256xbf16>
    %c512 = arith.constant 512 : index
    %c0_7 = arith.constant 0 : index
    %28 = vector.load %arg3[%c512, %c0_7] : memref<1152x128xbf16, #tpu.memory_space<vmem>>, vector<256x128xbf16>
    %cst_8 = arith.constant dense<0.000000e+00> : vector<160x128xf32>
    %29 = tpu.matmul %27, %28, %cst_8 {dimension_numbers = #tpu.dot_dimension_numbers<[1], [0], [0], [1], [0, 0, 1, 1], [], []>} : vector<160x256xbf16>, vector<256x128xbf16>, vector<160x128xf32> -> vector<160x128xf32>
    %30 = arith.addf %24, %29 : vector<160x128xf32>
    %31 = vector.shape_cast %11 : vector<10x16x128xbf16> to vector<160x128xbf16>
    %32 = vector.shape_cast %12 : vector<10x16x128xbf16> to vector<160x128xbf16>
    %33 = tpu.concatenate %31, %32 in 1 : vector<160x128xbf16>, vector<160x128xbf16> -> vector<160x256xbf16>
    %c768 = arith.constant 768 : index
    %c0_9 = arith.constant 0 : index
    %34 = vector.load %arg3[%c768, %c0_9] : memref<1152x128xbf16, #tpu.memory_space<vmem>>, vector<256x128xbf16>
    %cst_10 = arith.constant dense<0.000000e+00> : vector<160x128xf32>
    %35 = tpu.matmul %33, %34, %cst_10 {dimension_numbers = #tpu.dot_dimension_numbers<[1], [0], [0], [1], [0, 0, 1, 1], [], []>} : vector<160x256xbf16>, vector<256x128xbf16>, vector<160x128xf32> -> vector<160x128xf32>
    %36 = arith.addf %30, %35 : vector<160x128xf32>
    %37 = vector.shape_cast %13 : vector<10x16x128xbf16> to vector<160x128xbf16>
    %c1024 = arith.constant 1024 : index
    %c0_11 = arith.constant 0 : index
    %38 = vector.load %arg3[%c1024, %c0_11] : memref<1152x128xbf16, #tpu.memory_space<vmem>>, vector<128x128xbf16>
    %cst_12 = arith.constant dense<0.000000e+00> : vector<160x128xf32>
    %39 = tpu.matmul %37, %38, %cst_12 {dimension_numbers = #tpu.dot_dimension_numbers<[1], [0], [0], [1], [0, 0, 1, 1], [], []>} : vector<160x128xbf16>, vector<128x128xbf16>, vector<160x128xf32> -> vector<160x128xf32>
    %40 = arith.addf %36, %39 : vector<160x128xf32>
    %c0_13 = arith.constant 0 : index
    %c0_14 = arith.constant 0 : index
    %41 = vector.load %arg4[%c0_13, %c0_14] : memref<1x128xf32, #tpu.memory_space<vmem>>, vector<1x128xf32>
    %42 = vector.broadcast %41 : vector<1x128xf32> to vector<160x128xf32>
    %43 = arith.addf %40, %42 : vector<160x128xf32>
    %cst_15 = arith.constant 0.000000e+00 : f32
    %44 = vector.broadcast %cst_15 : f32 to vector<160x128xf32>
    %45 = arith.maximumf %43, %44 : vector<160x128xf32>
    %46 = vector.shape_cast %45 : vector<160x128xf32> to vector<10x16x128xf32>
    %47 = arith.truncf %46 : vector<10x16x128xf32> to vector<10x16x128xbf16>
    %c0_16 = arith.constant 0 : index
    %c8 = arith.constant 8 : index
    %c0_17 = arith.constant 0 : index
    %48 = vector.load %arg8[%c0_16, %c8, %c0_17] : memref<10x25x128xbf16, #tpu.memory_space<vmem>>, vector<10x16x128xbf16>
    tpu.vector_store %arg8[%c0_16, %c8, %c0_17], %47 {strides = array<i32>} : memref<10x25x128xbf16, #tpu.memory_space<vmem>>, vector<10x16x128xbf16>,
    %cst_18 = arith.constant 0.000000e+00 : bf16
    %49 = vector.broadcast %cst_18 : bf16 to vector<10x1x128xbf16>
    %c0_19 = arith.constant 0 : index
    %c7 = arith.constant 7 : index
    %c0_20 = arith.constant 0 : index
    %50 = vector.load %arg8[%c0_19, %c7, %c0_20] : memref<10x25x128xbf16, #tpu.memory_space<vmem>>, vector<10x1x128xbf16>
    tpu.vector_store %arg8[%c0_19, %c7, %c0_20], %49 {strides = array<i32>} : memref<10x25x128xbf16, #tpu.memory_space<vmem>>, vector<10x1x128xbf16>,
    %c0_21 = arith.constant 0 : index
    %c24 = arith.constant 24 : index
    %c0_22 = arith.constant 0 : index
    %51 = vector.load %arg8[%c0_21, %c24, %c0_22] : memref<10x25x128xbf16, #tpu.memory_space<vmem>>, vector<10x1x128xbf16>
    tpu.vector_store %arg8[%c0_21, %c24, %c0_22], %49 {strides = array<i32>} : memref<10x25x128xbf16, #tpu.memory_space<vmem>>, vector<10x1x128xbf16>,
    %cst_23 = arith.constant 0.000000e+00 : bf16
    %52 = vector.broadcast %cst_23 : bf16 to vector<1x25x128xbf16>
    %c0_i32 = arith.constant 0 : i32
    %53 = arith.cmpi eq, %arg1, %c0_i32 : i32
    %54 = arith.extui %53 : i1 to i32
    %c0_i32_24 = arith.constant 0 : i32
    %55 = arith.cmpi ne, %54, %c0_i32_24 : i32
    scf.if %55 {
      %c0_72 = arith.constant 0 : index
      %c0_73 = arith.constant 0 : index
      %c0_74 = arith.constant 0 : index
      %108 = vector.load %arg8[%c0_72, %c0_73, %c0_74] : memref<10x25x128xbf16, #tpu.memory_space<vmem>>, vector<1x25x128xbf16>
      tpu.vector_store %arg8[%c0_72, %c0_73, %c0_74], %52 {strides = array<i32>} : memref<10x25x128xbf16, #tpu.memory_space<vmem>>, vector<1x25x128xbf16>,
    } else {
    }
    %c1_i32 = arith.constant 1 : i32
    %56 = arith.cmpi eq, %arg1, %c1_i32 : i32
    %57 = arith.extui %56 : i1 to i32
    %c0_i32_25 = arith.constant 0 : i32
    %58 = arith.cmpi ne, %57, %c0_i32_25 : i32
    scf.if %58 {
      %c9_72 = arith.constant 9 : index
      %c0_73 = arith.constant 0 : index
      %c0_74 = arith.constant 0 : index
      %108 = vector.load %arg8[%c9_72, %c0_73, %c0_74] : memref<10x25x128xbf16, #tpu.memory_space<vmem>>, vector<1x25x128xbf16>
      tpu.vector_store %arg8[%c9_72, %c0_73, %c0_74], %52 {strides = array<i32>} : memref<10x25x128xbf16, #tpu.memory_space<vmem>>, vector<1x25x128xbf16>,
    } else {
    }
    %c0_26 = arith.constant 0 : index
    %c7_27 = arith.constant 7 : index
    %c0_28 = arith.constant 0 : index
    %59 = vector.load %arg8[%c0_26, %c7_27, %c0_28] : memref<10x25x128xbf16, #tpu.memory_space<vmem>>, vector<8x16x128xbf16>
    %c0_29 = arith.constant 0 : index
    %c8_30 = arith.constant 8 : index
    %c0_31 = arith.constant 0 : index
    %60 = vector.load %arg8[%c0_29, %c8_30, %c0_31] : memref<10x25x128xbf16, #tpu.memory_space<vmem>>, vector<8x16x128xbf16>
    %c0_32 = arith.constant 0 : index
    %c9 = arith.constant 9 : index
    %c0_33 = arith.constant 0 : index
    %61 = vector.load %arg8[%c0_32, %c9, %c0_33] : memref<10x25x128xbf16, #tpu.memory_space<vmem>>, vector<8x16x128xbf16>
    %c1 = arith.constant 1 : index
    %c7_34 = arith.constant 7 : index
    %c0_35 = arith.constant 0 : index
    %62 = vector.load %arg8[%c1, %c7_34, %c0_35] : memref<10x25x128xbf16, #tpu.memory_space<vmem>>, vector<8x16x128xbf16>
    %c1_36 = arith.constant 1 : index
    %c8_37 = arith.constant 8 : index
    %c0_38 = arith.constant 0 : index
    %63 = vector.load %arg8[%c1_36, %c8_37, %c0_38] : memref<10x25x128xbf16, #tpu.memory_space<vmem>>, vector<8x16x128xbf16>
    %c1_39 = arith.constant 1 : index
    %c9_40 = arith.constant 9 : index
    %c0_41 = arith.constant 0 : index
    %64 = vector.load %arg8[%c1_39, %c9_40, %c0_41] : memref<10x25x128xbf16, #tpu.memory_space<vmem>>, vector<8x16x128xbf16>
    %c2 = arith.constant 2 : index
    %c7_42 = arith.constant 7 : index
    %c0_43 = arith.constant 0 : index
    %65 = vector.load %arg8[%c2, %c7_42, %c0_43] : memref<10x25x128xbf16, #tpu.memory_space<vmem>>, vector<8x16x128xbf16>
    %c2_44 = arith.constant 2 : index
    %c8_45 = arith.constant 8 : index
    %c0_46 = arith.constant 0 : index
    %66 = vector.load %arg8[%c2_44, %c8_45, %c0_46] : memref<10x25x128xbf16, #tpu.memory_space<vmem>>, vector<8x16x128xbf16>
    %c2_47 = arith.constant 2 : index
    %c9_48 = arith.constant 9 : index
    %c0_49 = arith.constant 0 : index
    %67 = vector.load %arg8[%c2_47, %c9_48, %c0_49] : memref<10x25x128xbf16, #tpu.memory_space<vmem>>, vector<8x16x128xbf16>
    %68 = vector.extract_strided_slice %4 {offsets = [2, 1, 0], sizes = [8, 16, 128], strides = [1, 1, 1]} : vector<12x18x128xbf16> to vector<8x16x128xbf16>
    %69 = vector.shape_cast %59 : vector<8x16x128xbf16> to vector<128x128xbf16>
    %70 = vector.shape_cast %60 : vector<8x16x128xbf16> to vector<128x128xbf16>
    %71 = tpu.concatenate %69, %70 in 1 : vector<128x128xbf16>, vector<128x128xbf16> -> vector<128x256xbf16>
    %c0_50 = arith.constant 0 : index
    %c0_51 = arith.constant 0 : index
    %72 = vector.load %arg5[%c0_50, %c0_51] : memref<1280x128xbf16, #tpu.memory_space<vmem>>, vector<256x128xbf16>
    %cst_52 = arith.constant dense<0.000000e+00> : vector<128x128xf32>
    %73 = tpu.matmul %71, %72, %cst_52 {dimension_numbers = #tpu.dot_dimension_numbers<[1], [0], [0], [1], [0, 0, 1, 1], [], []>} : vector<128x256xbf16>, vector<256x128xbf16>, vector<128x128xf32> -> vector<128x128xf32>
    %74 = vector.shape_cast %61 : vector<8x16x128xbf16> to vector<128x128xbf16>
    %75 = vector.shape_cast %62 : vector<8x16x128xbf16> to vector<128x128xbf16>
    %76 = tpu.concatenate %74, %75 in 1 : vector<128x128xbf16>, vector<128x128xbf16> -> vector<128x256xbf16>
    %c256_53 = arith.constant 256 : index
    %c0_54 = arith.constant 0 : index
    %77 = vector.load %arg5[%c256_53, %c0_54] : memref<1280x128xbf16, #tpu.memory_space<vmem>>, vector<256x128xbf16>
    %cst_55 = arith.constant dense<0.000000e+00> : vector<128x128xf32>
    %78 = tpu.matmul %76, %77, %cst_55 {dimension_numbers = #tpu.dot_dimension_numbers<[1], [0], [0], [1], [0, 0, 1, 1], [], []>} : vector<128x256xbf16>, vector<256x128xbf16>, vector<128x128xf32> -> vector<128x128xf32>
    %79 = arith.addf %73, %78 : vector<128x128xf32>
    %80 = vector.shape_cast %63 : vector<8x16x128xbf16> to vector<128x128xbf16>
    %81 = vector.shape_cast %64 : vector<8x16x128xbf16> to vector<128x128xbf16>
    %82 = tpu.concatenate %80, %81 in 1 : vector<128x128xbf16>, vector<128x128xbf16> -> vector<128x256xbf16>
    %c512_56 = arith.constant 512 : index
    %c0_57 = arith.constant 0 : index
    %83 = vector.load %arg5[%c512_56, %c0_57] : memref<1280x128xbf16, #tpu.memory_space<vmem>>, vector<256x128xbf16>
    %cst_58 = arith.constant dense<0.000000e+00> : vector<128x128xf32>
    %84 = tpu.matmul %82, %83, %cst_58 {dimension_numbers = #tpu.dot_dimension_numbers<[1], [0], [0], [1], [0, 0, 1, 1], [], []>} : vector<128x256xbf16>, vector<256x128xbf16>, vector<128x128xf32> -> vector<128x128xf32>
    %85 = arith.addf %79, %84 : vector<128x128xf32>
    %86 = vector.shape_cast %65 : vector<8x16x128xbf16> to vector<128x128xbf16>
    %87 = vector.shape_cast %66 : vector<8x16x128xbf16> to vector<128x128xbf16>
    %88 = tpu.concatenate %86, %87 in 1 : vector<128x128xbf16>, vector<128x128xbf16> -> vector<128x256xbf16>
    %c768_59 = arith.constant 768 : index
    %c0_60 = arith.constant 0 : index
    %89 = vector.load %arg5[%c768_59, %c0_60] : memref<1280x128xbf16, #tpu.memory_space<vmem>>, vector<256x128xbf16>
    %cst_61 = arith.constant dense<0.000000e+00> : vector<128x128xf32>
    %90 = tpu.matmul %88, %89, %cst_61 {dimension_numbers = #tpu.dot_dimension_numbers<[1], [0], [0], [1], [0, 0, 1, 1], [], []>} : vector<128x256xbf16>, vector<256x128xbf16>, vector<128x128xf32> -> vector<128x128xf32>
    %91 = arith.addf %85, %90 : vector<128x128xf32>
    %92 = vector.shape_cast %67 : vector<8x16x128xbf16> to vector<128x128xbf16>
    %93 = vector.shape_cast %68 : vector<8x16x128xbf16> to vector<128x128xbf16>
    %94 = tpu.concatenate %92, %93 in 1 : vector<128x128xbf16>, vector<128x128xbf16> -> vector<128x256xbf16>
    %c1024_62 = arith.constant 1024 : index
    %c0_63 = arith.constant 0 : index
    %95 = vector.load %arg5[%c1024_62, %c0_63] : memref<1280x128xbf16, #tpu.memory_space<vmem>>, vector<256x128xbf16>
    %cst_64 = arith.constant dense<0.000000e+00> : vector<128x128xf32>
    %96 = tpu.matmul %94, %95, %cst_64 {dimension_numbers = #tpu.dot_dimension_numbers<[1], [0], [0], [1], [0, 0, 1, 1], [], []>} : vector<128x256xbf16>, vector<256x128xbf16>, vector<128x128xf32> -> vector<128x128xf32>
    %97 = arith.addf %91, %96 : vector<128x128xf32>
    %c0_65 = arith.constant 0 : index
    %c0_66 = arith.constant 0 : index
    %98 = vector.load %arg6[%c0_65, %c0_66] : memref<1x128xf32, #tpu.memory_space<vmem>>, vector<1x128xf32>
    %99 = vector.broadcast %98 : vector<1x128xf32> to vector<128x128xf32>
    %100 = arith.addf %97, %99 : vector<128x128xf32>
    %cst_67 = arith.constant 0.000000e+00 : f32
    %101 = vector.broadcast %cst_67 : f32 to vector<128x128xf32>
    %102 = arith.maximumf %100, %101 : vector<128x128xf32>
    %103 = vector.shape_cast %102 : vector<128x128xf32> to vector<8x16x128xf32>
    %104 = arith.truncf %103 : vector<8x16x128xf32> to vector<8x16x128xbf16>
    %c0_68 = arith.constant 0 : index
    %c0_69 = arith.constant 0 : index
    %c0_70 = arith.constant 0 : index
    %c0_71 = arith.constant 0 : index
    %105 = vector.load %arg7[%c0_68, %c0_69, %c0_70, %c0_71] : memref<1x8x16x128xbf16, #tpu.memory_space<vmem>>, vector<1x8x16x128xbf16>
    %106 = vector.shape_cast %105 : vector<1x8x16x128xbf16> to vector<8x16x128xbf16>
    %107 = vector.shape_cast %104 : vector<8x16x128xbf16> to vector<1x8x16x128xbf16>
    tpu.vector_store %arg7[%c0_68, %c0_69, %c0_70, %c0_71], %107 {strides = array<i32>} : memref<1x8x16x128xbf16, #tpu.memory_space<vmem>>, vector<1x8x16x128xbf16>,
    return
  }
  func.func @transform_0(%arg0: i32, %arg1: i32) -> (i32, i32, i32, i32, i32) {
    %c0_i32 = arith.constant 0 : i32
    %c0_i32_0 = arith.constant 0 : i32
    %c0_i32_1 = arith.constant 0 : i32
    %c0_i32_2 = arith.constant 0 : i32
    %c0_i32_3 = arith.constant 0 : i32
    return %arg0, %c0_i32, %c0_i32_0, %c0_i32_1, %c0_i32_2 : i32, i32, i32, i32, i32
  }
  func.func @transform_1(%arg0: i32, %arg1: i32) -> (i32, i32) {
    %c0_i32 = arith.constant 0 : i32
    %c0_i32_0 = arith.constant 0 : i32
    %c0_i32_1 = arith.constant 0 : i32
    return %c0_i32, %c0_i32_0 : i32, i32
  }
  func.func @transform_2(%arg0: i32, %arg1: i32) -> (i32, i32) {
    %c0_i32 = arith.constant 0 : i32
    %c0_i32_0 = arith.constant 0 : i32
    %c0_i32_1 = arith.constant 0 : i32
    return %c0_i32, %c0_i32_0 : i32, i32
  }
  func.func @transform_3(%arg0: i32, %arg1: i32) -> (i32, i32) {
    %c0_i32 = arith.constant 0 : i32
    %c0_i32_0 = arith.constant 0 : i32
    %c0_i32_1 = arith.constant 0 : i32
    return %c0_i32, %c0_i32_0 : i32, i32
  }
  func.func @transform_4(%arg0: i32, %arg1: i32) -> (i32, i32) {
    %c0_i32 = arith.constant 0 : i32
    %c0_i32_0 = arith.constant 0 : i32
    %c0_i32_1 = arith.constant 0 : i32
    return %c0_i32, %c0_i32_0 : i32, i32
  }
  func.func @transform_5(%arg0: i32, %arg1: i32) -> (i32, i32, i32, i32) {
    %c0_i32 = arith.constant 0 : i32
    %c0_i32_0 = arith.constant 0 : i32
    %c0_i32_1 = arith.constant 0 : i32
    return %arg0, %arg1, %c0_i32, %c0_i32_0 : i32, i32, i32, i32
  }
}

</mosaic_0001>

<bundles_post_ra>
// kernel: tpu_custom_call.1
= control target key start
LH: loop header
LB: loop body
LE: loop exit
PB: predicated region body
PF: predicated region fallthrough
CT: control target
= control target key end

     0   :  { %10 = vsyncpa [#allocation4], 0  ;;  %s8096_s0 = inlined_call_operand.vmem [shape: bf16[2,1,20,18,128], index: 0, kind: input, shape index: {}]   ;;  %s8097_s1 = inlined_call_operand.hbm [shape: bf16[1152,128], index: 1, kind: input, shape index: {}]   ;;  %s8098_s2 = inlined_call_operand.vmem [shape: f32[1,128], index: 2, kind: input, shape index: {}]   ;;  %s8099_s3 = inlined_call_operand.vmem [shape: bf16[1280,128], index: 3, kind: input, shape index: {}]   ;;  %s8100_s4 = inlined_call_operand.vmem [shape: f32[1,128], index: 4, kind: input, shape index: {}]   ;;  %s8101_s5 = inlined_call_operand.hbm [shape: bf16[2,16,16,128], index: 5, kind: output, shape index: {}]  }
   0x1   :  { %11 = vsyncpa [#allocation5], 0 }
   0x2   :  { %13 = vsyncpa [#allocation5 + $0x1], 0  ;;  %s6175_s18 = smov 0   ;;  %s6177_s19 = smov 0  }
   0x3   :  { %s6179_s20 = smov 0   ;;  %s6181_s21 = smov 0  }
   0x4   :  { %s6183_s22 = smov 0   ;;  %s6185_s23 = smov 0  }
   0x5   :  { %s6187_s24 = smov 0   ;;  %s6189_s25 = smov 0  }
   0x6 LB: > { %s4847_s26 = sadd.s32 4294967295, %s6136_s25   ;;  %s4848_s27 = sadd.s32 4294967294, %s6136_s25   ;;  %s6136_s25 = sphi %s6189_s25, %s19_s25   ;;  %s6132_s24 = sphi %s6187_s24, %s8309_s24   ;;  %s6128_s23 = sphi %s6185_s23, %s8308_s23   ;;  %s6124_s22 = sphi %s6183_s22, %s8307_s22   ;;  %s6120_s21 = sphi %s6181_s21, %s8306_s21   ;;  %s6116_s20 = sphi %s6179_s20, %s8305_s20   ;;  %s6112_s19 = sphi %s6177_s19, %s8304_s19   ;;  %s6108_s18 = sphi %s6175_s18, %s8303_s18  }
   0x7   : > { %s28_s28 = sadd.s32 1, %s6128_s23  ;;  %s31_s29 = sadd.s32 1, %s6132_s24 }
   0x8   : > { %p29_p0 = scmp.ge.s32.totalorder %s28_s28, 2  ;;  %s150_s30 = sadd.s32 1, %s6116_s20 }
   0x9   : > { %p160_p1 = scmp.ne.s32.totalorder %s6116_s20, %s6112_s19  ;;  %p161_p2 = scmp.eq.s32.totalorder %s4847_s26, 3 }
   0xa   : > { %s8311_s28 = smov (%p29_p0, %s28_s28), 0  ;;  %s8313_s29 = smov (!%p29_p0, %s31_s29), %s6132_s24 }
   0xb   : > { %s146_s6 = ssub.s32 %s6128_s23, %s8311_s28  ;;  %p6227_p3 = por %p161_p2, %p160_p1 }
   0xc   : > { %p33_p4 = scmp.ge.s32.totalorder %s8313_s29, 2  ;;  %p166_p5 = scmp.ne.s32.totalorder %s6112_s19, %s6108_s18 }
   0xd   : > { %p167_p6 = scmp.eq.s32.totalorder %s4848_s27, 3  ;;  %p4849_p7 = scmp.ge.s32.totalorder %s6136_s25, 1 }
   0xe   : > { %s8315_s29 = smov (%p33_p4, %s8313_s29), 0  ;;  %p174_p9 = scmp.lt.s32.totalorder %s6136_s25, 5 }
   0xf   : > { %p6236_p8 = por %p167_p6, %p166_p5  ;;  %s145_s9 = ssub.s32 %s6132_s24, %s8315_s29 }
  0x10   : > { %s147_s10 = sor.u32 %s146_s6, %s145_s9  ;;  %p6243_p10 = pnand %p4849_p7, %p174_p9 }
  0x11   : > { %p148_p11 = scmp.eq.s32.totalorder %s147_s10, 0  ;;  %p6247_p12 = scmp.eq.s32.totalorder %s4847_s26, 0 }
  0x12   : > { %p5924_p13 = pneg %p6243_p10  ;;  %s185_s15 = sshll.u32 %s8097_s1, 4  ;;  %s186_s15 = int_to_ptr.hbm [resolvable:$true] %s185_s15 }
  0x13   : > { %s6257_s16 = scalar_select %p148_p11, %s6116_s20, %s150_s30  }
  0x14   : > { %s6138_s17 = smov [#allocation3]   ;;  %p5925_p0 = pnand %p6247_p12, %p5924_p13 }
  0x15   : > { %s187_s27 = sshll.u32 %s6138_s17, 4  ;;  %s6139_s6 = smov 64   ;;  %s188_s27 = int_to_ptr.vmem [resolvable:$true] %s187_s27 }
  0x16   : > { %s6140_s26 = smov 4   ;;  %220 = sbr.rel (%p6243_p10) target bundleno = 1228 (0x4cc), region = 40 }
  0x17   : > { %5927 = dma.hbm_to_vmem [thread:$0]  (!%p5925_p0), %s186_s15, 9216, %s188_s27, [#allocation4], %s6139_s6, %s6139_s6, %s6140_s26  }
  0x1b   : > { %6099 = dma.done.wait (%p6247_p12), [#allocation4], 9216  }
  0x1c   : > { %6101 = vsyncadd (%p6247_p12), [#allocation4], 4294958080  ;;  %s246_s30 = sand.u32 1, %s6112_s19   ;;  %p249_p1 = scmp.lt.s32.totalorder %s6124_s22, 1  ;;  %vm2105_vm0 = vcmask 1043459   ;;  %vm2138_vm3 = vcmask 1040384  }
  0x1d   : > { %vm2106_vm1 = vsmask.f32 7950  ;;  %s6271_s9 = sshll.u32 %s246_s30, 6  ;;  %s5656_s11 = smul.u32 96, %s6120_s21  ;;  %vm2139_vm4 = vsmask.f32 256 }
  0x1e   : > { %s6274_s10 = scalar_select %p249_p1, %s6124_s22, 1  ;;  %vm6276_vm2 = vmand %vm2105_vm0, %vm2106_vm1  ;;  %v2108_v1 = vld [vmem:[#allocation2] sm:$0x8]  ;;  %v2111_v2 = vld [vmem:[#allocation2 + $0x10] sm:$0x8]  ;;  %vm681_vm6 = vcmask 1042432  }
  0x1f   : > { %v2114_v3 = vld [vmem:[#allocation2 + $0x20] sm:$0x8]  ;;  %v2109_v4 = vsel %vm6276_vm2, 0, %v2108_v1  ;;  %v2112_v5 = vsel %vm6276_vm2, 0, %v2111_v2  ;;  %v2117_v7 = vld [vmem:[#allocation2 + $0x30] sm:$0x8]  ;;  %vm6300_vm5 = vmand %vm2138_vm3, %vm2139_vm4 }
  0x20   : > { %s5917_s12 = smul.u32 240, %s6274_s10  ;;  %v2115_v6 = vsel %vm6276_vm2, 0, %v2114_v3  ;;  %v5692_v8 = vld [vmem:[#allocation3 + $0xb8] sm:$0xff]  ;;  %2110 = vst [vmem:[#allocation2] sm:$0x8] %v2109_v4  ;;  %v2118_v9 = vsel %vm6276_vm2, 0, %v2117_v7 }
  0x21   : > { %v2120_v10 = vld [vmem:[#allocation2 + $0x40] sm:$0x8]  ;;  %v5700_v11 = vld [vmem:[#allocation3 + $0xf8] sm:$0xff]  ;;  %2113 = vst [vmem:[#allocation2 + $0x10] sm:$0x8] %v2112_v5  ;;  %928 = vmatpush.bf16.msra.mxu0 %v5692_v8  ;;  %v5691_v20 = vld [vmem:[#allocation3 + $0xb0] sm:$0xff] }
  0x22   : > { %v2121_v12 = vsel %vm6276_vm2, 0, %v2120_v10  ;;  %v2123_v13 = vld [vmem:[#allocation2 + $0x50] sm:$0x8]  ;;  %v5676_v14 = vld [vmem:[#allocation3 + $0x38] sm:$0xff]  ;;  %2116 = vst [vmem:[#allocation2 + $0x20] sm:$0x8] %v2115_v6  ;;  %987 = vmatpush.bf16.msra.mxu1 %v5700_v11  ;;  %s253_s15 = scalar_lea.vmem %s8096_s0, %s5917_s12 }
  0x23   : > { %v2124_v15 = vsel %vm6276_vm2, 0, %v2123_v13  ;;  %v2126_v16 = vld [vmem:[#allocation2 + $0x60] sm:$0x8]  ;;  %v5684_v17 = vld [vmem:[#allocation3 + $0x78] sm:$0xff]  ;;  %2119 = vst [vmem:[#allocation2 + $0x30] sm:$0x8] %v2118_v9  ;;  %1142 = vmatpush.bf16.msra.mxu2 %v5676_v14  ;;  %s6335_s17 = scalar_lea.vmem %s253_s15, %s5656_s11 }
  0x24   : > { %v2127_v18 = vsel %vm6276_vm2, 0, %v2126_v16  ;;  %v2129_v19 = vld [vmem:[#allocation2 + $0x70] sm:$0x8]  ;;  %2122 = vst [vmem:[#allocation2 + $0x40] sm:$0x8] %v2121_v12  ;;  %1201 = vmatpush.bf16.msra.mxu3 %v5684_v17  ;;  %v5690_v33 = vld [vmem:[#allocation3 + $0xa8] sm:$0xff] }
  0x25   : > { %v2130_v21 = vsel %vm6276_vm2, 0, %v2129_v19  ;;  %v2132_v22 = vld [vmem:[#allocation2 + $0x80] sm:$0x8]  ;;  %v5699_v24 = vld [vmem:[#allocation3 + $0xf0] sm:$0xff]  ;;  %2125 = vst [vmem:[#allocation2 + $0x50] sm:$0x8] %v2124_v15  ;;  %929 = vmatpush.bf16.msra.mxu0 %v5691_v20 }
  0x26   : > { %v2133_v25 = vsel %vm6276_vm2, 0, %v2132_v22  ;;  %v2135_v26 = vld [vmem:[#allocation2 + $0x90] sm:$0x8]  ;;  %2128 = vst [vmem:[#allocation2 + $0x60] sm:$0x8] %v2127_v18  ;;  %988 = vmatpush.bf16.msra.mxu1 %v5699_v24  ;;  %v5698_v36 = vld [vmem:[#allocation3 + $0xe8] sm:$0xff] }
  0x27   : > { %v5675_v27 = vld [vmem:[#allocation3 + $0x30] sm:$0xff]  ;;  %v2136_v28 = vsel %vm6276_vm2, 0, %v2135_v26  ;;  %v2141_v29 = vld [vmem:[#allocation2 + $0xc] sm:$0x1]  ;;  %2131 = vst [vmem:[#allocation2 + $0x70] sm:$0x8] %v2130_v21 }
  0x28   : > { %v5683_v30 = vld [vmem:[#allocation3 + $0x70] sm:$0xff]  ;;  %v2142_v31 = vsel %vm6300_vm5, 0, %v2141_v29  ;;  %v2144_v32 = vld [vmem:[#allocation2 + $0x1c] sm:$0x1]  ;;  %1143 = vmatpush.bf16.msra.mxu2 %v5675_v27  ;;  %2134 = vst [vmem:[#allocation2 + $0x80] sm:$0x8] %v2133_v25 }
  0x29   : > { %v2145_v34 = vsel %vm6300_vm5, 0, %v2144_v32  ;;  %v2147_v35 = vld [vmem:[#allocation2 + $0x2c] sm:$0x1]  ;;  %1202 = vmatpush.bf16.msra.mxu3 %v5683_v30  ;;  %2137 = vst [vmem:[#allocation2 + $0x90] sm:$0x8] %v2136_v28  ;;  %930 = vmatpush.bf16.msra.mxu0 %v5690_v33  ;;  %v5689_v45 = vld [vmem:[#allocation3 + $0xa0] sm:$0xff] }
  0x2a   : > { %v2148_v37 = vsel %vm6300_vm5, 0, %v2147_v35  ;;  %v2150_v38 = vld [vmem:[#allocation2 + $0x3c] sm:$0x1]  ;;  %v5674_v39 = vld [vmem:[#allocation3 + $0x28] sm:$0xff]  ;;  %2143 = vst [vmem:[#allocation2 + $0xc] sm:$0x1] %v2142_v31  ;;  %989 = vmatpush.bf16.msra.mxu1 %v5698_v36 }
  0x2b   : > { %v2151_v40 = vsel %vm6300_vm5, 0, %v2150_v38  ;;  %v2153_v41 = vld [vmem:[#allocation2 + $0x4c] sm:$0x1]  ;;  %2146 = vst [vmem:[#allocation2 + $0x1c] sm:$0x1] %v2145_v34  ;;  %v5697_v48 = vld [vmem:[#allocation3 + $0xe0] sm:$0xff] }
  0x2c   : > { %v5682_v42 = vld [vmem:[#allocation3 + $0x68] sm:$0xff]  ;;  %v2154_v43 = vsel %vm6300_vm5, 0, %v2153_v41  ;;  %v2156_v44 = vld [vmem:[#allocation2 + $0x5c] sm:$0x1]  ;;  %1144 = vmatpush.bf16.msra.mxu2 %v5674_v39  ;;  %2149 = vst [vmem:[#allocation2 + $0x2c] sm:$0x1] %v2148_v37 }
  0x2d   : > { %v2157_v46 = vsel %vm6300_vm5, 0, %v2156_v44  ;;  %v2159_v47 = vld [vmem:[#allocation2 + $0x6c] sm:$0x1]  ;;  %1203 = vmatpush.bf16.msra.mxu3 %v5682_v42  ;;  %2152 = vst [vmem:[#allocation2 + $0x3c] sm:$0x1] %v2151_v40  ;;  %931 = vmatpush.bf16.msra.mxu0 %v5689_v45  ;;  %v5673_v51 = vld [vmem:[#allocation3 + $0x20] sm:$0xff] }
  0x2e   : > { %v2160_v49 = vsel %vm6300_vm5, 0, %v2159_v47  ;;  %v2162_v50 = vld [vmem:[#allocation2 + $0x7c] sm:$0x1]  ;;  %2155 = vst [vmem:[#allocation2 + $0x4c] sm:$0x1] %v2154_v43  ;;  %990 = vmatpush.bf16.msra.mxu1 %v5697_v48  ;;  %v5681_v54 = vld [vmem:[#allocation3 + $0x60] sm:$0xff] }
  0x2f   : > { %v2163_v52 = vsel %vm6300_vm5, 0, %v2162_v50  ;;  %v2165_v53 = vld [vmem:[#allocation2 + $0x8c] sm:$0x1]  ;;  %2158 = vst [vmem:[#allocation2 + $0x5c] sm:$0x1] %v2157_v46  ;;  %v5688_v57 = vld [vmem:[#allocation3 + $0x98] sm:$0xff] }
  0x30   : > { %v2166_v55 = vsel %vm6300_vm5, 0, %v2165_v53  ;;  %v2168_v56 = vld [vmem:[#allocation2 + $0x9c] sm:$0x1]  ;;  %1145 = vmatpush.bf16.msra.mxu2 %v5673_v51  ;;  %2161 = vst [vmem:[#allocation2 + $0x6c] sm:$0x1] %v2160_v49  ;;  %v5687_v62 = vld [vmem:[#allocation3 + $0x90] sm:$0xff] }
  0x31   : > { %v2169_v58 = vsel %vm6300_vm5, 0, %v2168_v56  ;;  %1204 = vmatpush.bf16.msra.mxu3 %v5681_v54  ;;  %v5696_v59 = vld [vmem:[#allocation3 + $0xd8] sm:$0xff]  ;;  %2164 = vst [vmem:[#allocation2 + $0x7c] sm:$0x1] %v2163_v52  ;;  %932 = vmatpush.bf16.msra.mxu0 %v5688_v57  ;;  %vm682_vm7 = vcmask 1046532   ;;  %v5695_v63 = vld [vmem:[#allocation3 + $0xd0] sm:$0xff] }
  0x32   : > { %v5672_v60 = vld [vmem:[#allocation3 + $0x18] sm:$0xff]  ;;  %2167 = vst [vmem:[#allocation2 + $0x8c] sm:$0x1] %v2166_v55  ;;  %991 = vmatpush.bf16.msra.mxu1 %v5696_v59  ;;  %v5671_v0 = vld [vmem:[#allocation3 + $0x10] sm:$0xff]  ;;  %v5686_v2 = vld [vmem:[#allocation3 + $0x88] sm:$0xff]  ;;  %s6810_s26 = scalar_lea.vmem [#allocation6], %s6271_s9 }
  0x33   : > { %v5680_v61 = vld [vmem:[#allocation3 + $0x58] sm:$0xff]  ;;  %2170 = vst [vmem:[#allocation2 + $0x9c] sm:$0x1] %v2169_v58  ;;  %v5679_v1 = vld [vmem:[#allocation3 + $0x50] sm:$0xff]  ;;  %vm6337_vm8 = vmor %vm681_vm6, %vm682_vm7  ;;  %vm296_vm9 = vsmask.f32 3328 }
  0x34   : > { %1146 = vmatpush.bf16.msra.mxu2 %v5672_v60  ;;  %v260_v4 = vld [vmem:[%s6335_s17] sm:$0xf]  ;;  %v261_v5 = vld [vmem:[%s6335_s17 + $0x4] sm:$0xf]  ;;  %v262_v6 = vld [vmem:[%s6335_s17 + $0x8] sm:$0x1] }
  0x35   : > { %1205 = vmatpush.bf16.msra.mxu3 %v5680_v61  ;;  %933 = vmatpush.bf16.msra.mxu0 %v5687_v62  ;;  %v5694_v7 = vld [vmem:[#allocation3 + $0xc8] sm:$0xff]  ;;  %v4899_v8 = vrot.slane %v260_v4, 9  ;;  %v686_v9 = vrot.slane %v261_v5, 5  ;;  %v689_v10 = vrot.slane %v262_v6, 5  ;;  %v300_v11 = vshrl.u32 %v260_v4, 16  ;;  %v5685_v21 = vld [vmem:[#allocation3 + $0x80] sm:$0xff] }
  0x36   : > { %992 = vmatpush.bf16.msra.mxu1 %v5695_v63  ;;  %v5670_v12 = vld [vmem:[#allocation3 + $0x8] sm:$0xff]  ;;  %v303_v13 = vshll.u32 %v260_v4, 16  ;;  %v309_v14 = vshll.u32 %v261_v5, 16  ;;  %v313_v15 = vshrl.u32 %v261_v5, 16  ;;  %v319_v16 = vshll.u32 %v262_v6, 16  ;;  %v5693_v28 = vld [vmem:[#allocation3 + $0xc0] sm:$0xff] }
  0x37   : > { %v5678_v17 = vld [vmem:[#allocation3 + $0x48] sm:$0xff]  ;;  %v687_v18 = vsel %vm6337_vm8, %v4899_v8, %v686_v9  ;;  %v688_v19 = vrot.slane %v686_v9, 4  ;;  %vm297_vm10 = vsmask.f32 7440  ;;  %v302_v20 = vrot.slane %v300_v11, 4  ;;  %v5708_v30 = vld [vmem:[#allocation3 + $0x138] sm:$0xff] }
  0x38   : > { %1147 = vmatpush.bf16.msra.mxu2 %v5671_v0  ;;  %v754_v22 = vunpack.c.l.b16 %v687_v18  ;;  %v305_v24 = vrot.slane %v303_v13, 5  ;;  %v311_v25 = vrot.slane %v309_v14, 5  ;;  %v315_v26 = vrot.slane %v313_v15, 4  ;;  %v263_v27 = vld [vmem:[%s6335_s17 + $0xc] sm:$0xf]  ;;  %v5669_v31 = vld [vmem:[#allocation3] sm:$0xff]  ;;  %vm6352_vm11 = vmor %vm296_vm9, %vm297_vm10 }
  0x39   : > { %1206 = vmatpush.bf16.msra.mxu3 %v5679_v1  ;;  %934 = vmatpush.bf16.msra.mxu0 %v5686_v2  ;;  %v690_v29 = vsel %vm6337_vm8, %v688_v19, %v689_v10  ;;  %v321_v35 = vrot.slane %v319_v16, 5  ;;  %v264_v36 = vld [vmem:[%s6335_s17 + $0x10] sm:$0xf]  ;;  %v5677_v37 = vld [vmem:[#allocation3 + $0x40] sm:$0xff]  ;;  %v324_v40 = vshrl.u32 %v263_v27, 16  ;;  %v327_v41 = vshll.u32 %v263_v27, 16 }
  0x3a   : > { %993 = vmatpush.bf16.msra.mxu1 %v5694_v7  ;;  %v755_v32 = vunpack.c.l.b16 %v690_v29  ;;  %v306_v33 = vor.u32 %v305_v24, %v302_v20  ;;  %v316_v34 = vor.u32 %v315_v26, %v311_v25  ;;  %v693_v39 = vrot.slane %v264_v36, 5  ;;  %v6357_v43 = vld [vmem:[%s6335_s17 + $0xc] sm:$0xff]  ;;  %v265_v46 = vld [vmem:[%s6335_s17 + $0x14] sm:$0x1]  ;;  %v5657_v47 = vld [vmem:[%s6335_s17] sm:$0xff]  ;;  %p5207_p2 = scmp.ne.s32.totalorder %s6120_s21, 0 }
  0x3b   : > { %v4900_v48 = vrot.slane %v263_v27, 9  ;;  %v326_v49 = vrot.slane %v324_v40, 4  ;;  %v329_v50 = vrot.slane %v327_v41, 5  ;;  %v333_v51 = vshll.u32 %v264_v36, 16  ;;  %v5707_v52 = vld [vmem:[#allocation3 + $0x130] sm:$0xff]  ;;  %v5706_v5 = vld [vmem:[#allocation3 + $0x128] sm:$0xff] }
  0x3c   : > { %1148 = vmatpush.bf16.msra.mxu2 %v5670_v12  ;;  %v774_v42 = vpack.c.b16 %v755_v32, %v754_v22  ;;  %v307_v44 = vrot.slane %v306_v33, 4  ;;  %v317_v45 = vrot.slane %v316_v34, 4  ;;  %v696_v55 = vrot.slane %v265_v46, 5  ;;  %v266_v9 = vld [vmem:[%s6335_s17 + $0x18] sm:$0xf] }
  0x3d   : > { %1207 = vmatpush.bf16.msra.mxu3 %v5678_v17  ;;  %935 = vmatpush.bf16.msra.mxu0 %v5685_v21  ;;  %v337_v56 = vshrl.u32 %v264_v36, 16  ;;  %v695_v59 = vrot.slane %v693_v39, 4  ;;  %v335_v60 = vrot.slane %v333_v51, 5  ;;  %v330_v61 = vor.u32 %v329_v50, %v326_v49  ;;  %v267_v10 = vld [vmem:[%s6335_s17 + $0x1c] sm:$0xf] }
  0x3e   : > { %994 = vmatpush.bf16.msra.mxu1 %v5693_v28  ;;  %v312_v53 = vsel %vm6352_vm11, %v307_v44, %v311_v25  ;;  %v322_v54 = vsel %vm6352_vm11, %v317_v45, %v321_v35  ;;  %v343_v63 = vshll.u32 %v265_v46, 16  ;;  %v694_v2 = vsel %vm6337_vm8, %v4900_v48, %v693_v39  ;;  %v6379_v26 = vld [vmem:[%s6335_s17 + $0x18] sm:$0xff]  ;;  %v268_v29 = vld [vmem:[%s6335_s17 + $0x20] sm:$0x1]  ;;  %v269_v41 = vld [vmem:[%s6335_s17 + $0x24] sm:$0xf] }
  0x3f   : > { %v599_v57 = vunpack.c.l.b16 %v312_v53  ;;  %v600_v58 = vunpack.c.l.b16 %v322_v54  ;;  %v339_v62 = vrot.slane %v337_v56, 4  ;;  %v697_v4 = vsel %vm6337_vm8, %v695_v59, %v696_v55  ;;  %v270_v46 = vld [vmem:[%s6335_s17 + $0x28] sm:$0xf] }
  0x40   : > { %1149 = vmatpush.bf16.msra.mxu2 %v5669_v31  ;;  %936 = vmatmul.bf16.vlgmr.msra.gmra.mxu0 %v774_v42  ;;  %v331_v6 = vrot.slane %v330_v61, 4  ;;  %v345_v8 = vrot.slane %v343_v63, 5  ;;  %v756_v11 = vunpack.c.l.b16 %v694_v2  ;;  %v757_v12 = vunpack.c.l.b16 %v697_v4  ;;  %v5705_v42 = vld [vmem:[#allocation3 + $0x120] sm:$0xff] }
  0x41   : > { %1428 = vmatpush.bf16.msrb.mxu0 %v5708_v30  ;;  %1208 = vmatpush.bf16.msra.mxu3 %v5677_v37  ;;  %v619_v0 = vpack.c.b16 %v600_v58, %v599_v57  ;;  %v340_v1 = vor.u32 %v339_v62, %v335_v60  ;;  %v348_v13 = vshrl.u32 %v266_v9, 16  ;;  %v351_v14 = vshll.u32 %v266_v9, 16  ;;  %v6401_v61 = vld [vmem:[%s6335_s17 + $0x24] sm:$0xff]  ;;  %v271_v62 = vld [vmem:[%s6335_s17 + $0x2c] sm:$0x1] }
  0x42   : > { %995 = vmatmul.bf16.vlgmr.msra.gmra.mxu1 %v6357_v43  ;;  %v336_v15 = vsel %vm6352_vm11, %v331_v6, %v335_v60  ;;  %v357_v17 = vshll.u32 %v267_v10, 16  ;;  %v361_v18 = vshrl.u32 %v267_v10, 16  ;;  %v6376_v19 = vpack.c.b16 %v757_v12, %v756_v11 }
  0x43   : > { %1150 = vmatmul.bf16.vlgmr.msra.gmra.mxu2 %v5657_v47  ;;  %v341_v7 = vrot.slane %v340_v1, 4  ;;  %v700_v20 = vrot.slane %v267_v10, 5  ;;  %v601_v21 = vunpack.c.l.b16 %v336_v15  ;;  %v350_v24 = vrot.slane %v348_v13, 4  ;;  %v272_v13 = vld [vmem:[%s6335_s17 + $0x30] sm:$0xf] }
  0x44   : > { %1209 = vmatmul.bf16.vlgmr.msra.gmra.mxu3 %v619_v0  ;;  %v353_v25 = vrot.slane %v351_v14, 5  ;;  %v359_v27 = vrot.slane %v357_v17, 5  ;;  %v363_v28 = vrot.slane %v361_v18, 4  ;;  %v4901_v30 = vrot.slane %v266_v9, 9  ;;  %v273_v14 = vld [vmem:[%s6335_s17 + $0x34] sm:$0xf] }
  0x45   : > { %1429 = vmatpush.bf16.msrb.mxu0 %v5707_v52  ;;  %v346_v16 = vsel %vm6352_vm11, %v341_v7, %v345_v8  ;;  %v702_v32 = vrot.slane %v700_v20, 4  ;;  %v703_v33 = vrot.slane %v268_v29, 5  ;;  %v367_v36 = vshll.u32 %v268_v29, 16 }
  0x46   : > { %v602_v22 = vunpack.c.l.b16 %v346_v16  ;;  %v354_v34 = vor.u32 %v353_v25, %v350_v24  ;;  %v364_v35 = vor.u32 %v363_v28, %v359_v27  ;;  %v701_v37 = vsel %vm6337_vm8, %v4901_v30, %v700_v20  ;;  %v6423_v30 = vld [vmem:[%s6335_s17 + $0x30] sm:$0xff] }
  0x47   : > { %v704_v39 = vsel %vm6337_vm8, %v702_v32, %v703_v33  ;;  %v369_v45 = vrot.slane %v367_v36, 5  ;;  %v758_v47 = vunpack.c.l.b16 %v701_v37  ;;  %v375_v50 = vshll.u32 %v269_v41, 16  ;;  %v274_v36 = vld [vmem:[%s6335_s17 + $0x38] sm:$0x1] }
  0x48   : > { %v6383_v31 = vpack.c.b16 %v602_v22, %v601_v21  ;;  %v355_v40 = vrot.slane %v354_v34, 4  ;;  %v365_v44 = vrot.slane %v364_v35, 4  ;;  %v759_v48 = vunpack.c.l.b16 %v704_v39 }
  0x49   : > { %1430 = vmatpush.bf16.msrb.mxu0 %v5706_v5  ;;  %v381_v51 = vshll.u32 %v270_v46, 16  ;;  %v385_v52 = vshrl.u32 %v270_v46, 16  ;;  %v377_v58 = vrot.slane %v375_v50, 5  ;;  %v707_v63 = vrot.slane %v270_v46, 5 }
  0x4a   : > { %v360_v49 = vsel %vm6352_vm11, %v355_v40, %v359_v27  ;;  %v370_v53 = vsel %vm6352_vm11, %v365_v44, %v369_v45  ;;  %v6398_v54 = vpack.c.b16 %v759_v48, %v758_v47  ;;  %v391_v4 = vshll.u32 %v271_v62, 16  ;;  %v275_v47 = vld [vmem:[%s6335_s17 + $0x3c] sm:$0xf]  ;;  %v276_v48 = vld [vmem:[%s6335_s17 + $0x40] sm:$0xf] }
  0x4b   : > { %v603_v55 = vunpack.c.l.b16 %v360_v49  ;;  %v604_v57 = vunpack.c.l.b16 %v370_v53  ;;  %v383_v59 = vrot.slane %v381_v51, 5  ;;  %v387_v60 = vrot.slane %v385_v52, 4 }
  0x4c   : > { %v4902_v5 = vrot.slane %v269_v41, 9  ;;  %v709_v6 = vrot.slane %v707_v63, 4  ;;  %v710_v7 = vrot.slane %v271_v62, 5  ;;  %v393_v10 = vrot.slane %v391_v4, 5 }
  0x4d   : > { %1431 = vmatpush.bf16.msrb.mxu0 %v5705_v42  ;;  %v6405_v0 = vpack.c.b16 %v604_v57, %v603_v55  ;;  %v388_v2 = vor.u32 %v387_v60, %v383_v59  ;;  %v396_v20 = vshrl.u32 %v272_v13, 16  ;;  %v399_v21 = vshll.u32 %v272_v13, 16 }
  0x4e   : > { %v708_v11 = vsel %vm6337_vm8, %v4902_v5, %v707_v63  ;;  %v711_v12 = vsel %vm6337_vm8, %v709_v6, %v710_v7  ;;  %v405_v22 = vshll.u32 %v273_v14, 16  ;;  %v409_v24 = vshrl.u32 %v273_v14, 16 }
  0x4f   : > { %v389_v9 = vrot.slane %v388_v2, 4  ;;  %v760_v15 = vunpack.c.l.b16 %v708_v11  ;;  %v761_v16 = vunpack.c.l.b16 %v711_v12  ;;  %v714_v29 = vrot.slane %v273_v14, 5 }
  0x50   : > { %941 = vmatmul.bf16.gmra.mxu0 %v6376_v19  ;;  %v398_v32 = vrot.slane %v396_v20, 4  ;;  %v401_v33 = vrot.slane %v399_v21, 5  ;;  %v407_v34 = vrot.slane %v405_v22, 5  ;;  %v411_v35 = vrot.slane %v409_v24, 4 }
  0x51   : > { %v394_v18 = vsel %vm6352_vm11, %v389_v9, %v393_v10  ;;  %v6420_v25 = vpack.c.b16 %v761_v16, %v760_v15  ;;  %v4903_v39 = vrot.slane %v272_v13, 9  ;;  %v717_v40 = vrot.slane %v274_v36, 5  ;;  %v6446_v10 = vld [vmem:[%s6335_s17 + $0x3c] sm:$0xff] }
  0x52   : > { %1000 = vmatmul.bf16.gmra.mxu1 %v6379_v26  ;;  %v606_v28 = vunpack.c.l.b16 %v394_v18  ;;  %v402_v42 = vor.u32 %v401_v33, %v398_v32  ;;  %v412_v44 = vor.u32 %v411_v35, %v407_v34  ;;  %v415_v45 = vshll.u32 %v274_v36, 16 }
  0x53   : > { %1155 = vmatmul.bf16.gmra.mxu2 %v6357_v43  ;;  %v372_v43 = vshrl.u32 %v269_v41, 16  ;;  %v716_v41 = vrot.slane %v714_v29, 4  ;;  %v715_v46 = vsel %vm6337_vm8, %v4903_v39, %v714_v29  ;;  %v420_v53 = vshrl.u32 %v275_v47, 16  ;;  %v279_v29 = vld [vmem:[%s6335_s17 + $0x4c] sm:$0xf] }
  0x54   : > { %1214 = vmatmul.bf16.gmra.mxu3 %v6383_v31  ;;  %v403_v50 = vrot.slane %v402_v42, 4  ;;  %v413_v51 = vrot.slane %v412_v44, 4  ;;  %v417_v52 = vrot.slane %v415_v45, 5  ;;  %v423_v55 = vshll.u32 %v275_v47, 16 }
  0x55   : > { %v374_v56 = vrot.slane %v372_v43, 4  ;;  %v5704_v43 = vld [vmem:[#allocation3 + $0x118] sm:$0xff]  ;;  %v718_v49 = vsel %vm6337_vm8, %v716_v41, %v717_v40  ;;  %v433_v57 = vshrl.u32 %v276_v48, 16  ;;  %v422_v63 = vrot.slane %v420_v53, 4 }
  0x56   : > { %1432 = vmatpush.bf16.msrb.mxu0 %v5704_v43  ;;  %v408_v60 = vsel %vm6352_vm11, %v403_v50, %v407_v34  ;;  %v418_v62 = vsel %vm6352_vm11, %v413_v51, %v417_v52  ;;  %v721_v9 = vrot.slane %v276_v48, 5  ;;  %v4904_v15 = vrot.slane %v275_v47, 9  ;;  %v280_v50 = vld [vmem:[%s6335_s17 + $0x50] sm:$0x1] }
  0x57   : > { %v378_v1 = vor.u32 %v377_v58, %v374_v56  ;;  %v429_v56 = vshll.u32 %v276_v48, 16  ;;  %v762_v58 = vunpack.c.l.b16 %v715_v46  ;;  %v435_v4 = vrot.slane %v433_v57, 4 }
  0x58   : > { %v607_v6 = vunpack.c.l.b16 %v408_v60  ;;  %v608_v7 = vunpack.c.l.b16 %v418_v62  ;;  %v723_v16 = vrot.slane %v721_v9, 4  ;;  %v722_v22 = vsel %vm6337_vm8, %v4904_v15, %v721_v9 }
  0x59   : > { %v379_v8 = vrot.slane %v378_v1, 4  ;;  %v425_v1 = vrot.slane %v423_v55, 5  ;;  %v431_v2 = vrot.slane %v429_v56, 5  ;;  %v764_v32 = vunpack.c.l.b16 %v722_v22 }
  0x5a   : > { %v6449_v14 = vpack.c.b16 %v608_v7, %v607_v6  ;;  %v453_v40 = vshll.u32 %v279_v29, 16  ;;  %v457_v41 = vshrl.u32 %v279_v29, 16  ;;  %v728_v51 = vrot.slane %v279_v29, 5  ;;  %v281_v6 = vld [vmem:[%s6335_s17 + $0x54] sm:$0xf] }
  0x5b   : > { %v384_v17 = vsel %vm6352_vm11, %v379_v8, %v383_v59  ;;  %v763_v59 = vunpack.c.l.b16 %v718_v49  ;;  %v277_v8 = vld [vmem:[%s6335_s17 + $0x44] sm:$0x1]  ;;  %v426_v11 = vor.u32 %v425_v1, %v422_v63  ;;  %v436_v12 = vor.u32 %v435_v4, %v431_v2  ;;  %v6467_v49 = vld [vmem:[%s6335_s17 + $0x48] sm:$0xff]  ;;  %v282_v7 = vld [vmem:[%s6335_s17 + $0x58] sm:$0xf] }
  0x5c   : > { %v605_v27 = vunpack.c.l.b16 %v384_v17  ;;  %v439_v13 = vshll.u32 %v277_v8, 16  ;;  %8200 = vst [vmem:[#allocation10_spill] sm:$0xff] %v6449_v14  ;;  %v724_v17 = vrot.slane %v277_v8, 5  ;;  %v455_v48 = vrot.slane %v453_v40, 5  ;;  %v5702_v1 = vld [vmem:[#allocation3 + $0x108] sm:$0xff] }
  0x5d   : > { %v6442_v5 = vpack.c.b16 %v763_v59, %v762_v58  ;;  %v427_v18 = vrot.slane %v426_v11, 4  ;;  %v437_v20 = vrot.slane %v436_v12, 4  ;;  %v459_v43 = vrot.slane %v457_v41, 4 }
  0x5e   : > { %v6427_v37 = vpack.c.b16 %v606_v28, %v605_v27  ;;  %v441_v21 = vrot.slane %v439_v13, 5  ;;  %v725_v24 = vsel %vm6337_vm8, %v723_v16, %v724_v17  ;;  %v5703_v27 = vld [vmem:[#allocation3 + $0x110] sm:$0xff]  ;;  %v278_v28 = vld [vmem:[%s6335_s17 + $0x48] sm:$0xf]  ;;  %v463_v56 = vshll.u32 %v280_v50, 16 }
  0x5f   : > { %1433 = vmatpush.bf16.msrb.mxu0 %v5703_v27  ;;  %v765_v33 = vunpack.c.l.b16 %v725_v24  ;;  %v432_v34 = vsel %vm6352_vm11, %v427_v18, %v431_v2  ;;  %v444_v36 = vshrl.u32 %v278_v28, 16  ;;  %v447_v39 = vshll.u32 %v278_v28, 16  ;;  %v6489_v24 = vld [vmem:[%s6335_s17 + $0x54] sm:$0xff] }
  0x60   : > { %946 = vmatmul.bf16.gmra.mxu0 %v6398_v54  ;;  %8199 = vst [vmem:[#allocation9_spill] sm:$0xff] %v6427_v37  ;;  %v442_v35 = vsel %vm6352_vm11, %v437_v20, %v441_v21  ;;  %v609_v44 = vunpack.c.l.b16 %v432_v34  ;;  %v460_v55 = vor.u32 %v459_v43, %v455_v48  ;;  %v4905_v57 = vrot.slane %v278_v28, 9 }
  0x61   : > { %v6464_v42 = vpack.c.b16 %v765_v33, %v764_v32  ;;  %v610_v45 = vunpack.c.l.b16 %v442_v35  ;;  %v446_v46 = vrot.slane %v444_v36, 4  ;;  %v449_v47 = vrot.slane %v447_v39, 5  ;;  %v283_v33 = vld [vmem:[%s6335_s17 + $0x5c] sm:$0x1] }
  0x62   : > { %1005 = vmatmul.bf16.gmra.mxu1 %v6401_v61  ;;  %v730_v58 = vrot.slane %v728_v51, 4  ;;  %v731_v59 = vrot.slane %v280_v50, 5  ;;  %v461_v62 = vrot.slane %v460_v55, 4  ;;  %v465_v63 = vrot.slane %v463_v56, 5  ;;  %v6503_v50 = vld [vmem:[%s6335_s17 + $0x60] sm:$0xf] }
  0x63   : > { %1160 = vmatmul.bf16.gmra.mxu2 %v6379_v26  ;;  %v6471_v52 = vpack.c.b16 %v610_v45, %v609_v44  ;;  %v450_v53 = vor.u32 %v449_v47, %v446_v46  ;;  %v729_v2 = vsel %vm6337_vm8, %v4905_v57, %v728_v51  ;;  %1434 = vmatpush.bf16.msrb.mxu0 %v5702_v1  ;;  %v468_v13 = vshrl.u32 %v281_v6, 16  ;;  %v5716_v45 = vld [vmem:[#allocation3 + $0x178] sm:$0xff]  ;;  %v285_v56 = vld [vmem:[%s6335_s17 + $0x64] sm:$0xf]  ;;  %v5731_v1 = vld [vmem:[#allocation3 + $0x1f0] sm:$0xff] }
  0x64   : > { %1219 = vmatmul.bf16.gmra.mxu3 %v6405_v0  ;;  %v732_v4 = vsel %vm6337_vm8, %v730_v58, %v731_v59  ;;  %v766_v8 = vunpack.c.l.b16 %v729_v2  ;;  %v466_v12 = vsel %vm6352_vm11, %v461_v62, %v465_v63  ;;  %v471_v15 = vshll.u32 %v281_v6, 16  ;;  %v5724_v46 = vld [vmem:[#allocation3 + $0x1b8] sm:$0xff]  ;;  %1487 = vmatpush.bf16.msrb.mxu1 %v5716_v45  ;;  %v5715_v62 = vld [vmem:[#allocation3 + $0x170] sm:$0xff] }
  0x65   : > { %8201 = vst [vmem:[#allocation11_spill] sm:$0xff] %v6471_v52  ;;  %v451_v60 = vrot.slane %v450_v53, 4  ;;  %v767_v9 = vunpack.c.l.b16 %v732_v4  ;;  %v477_v16 = vshll.u32 %v282_v7, 16  ;;  %v481_v17 = vshrl.u32 %v282_v7, 16  ;;  %v5732_v47 = vld [vmem:[#allocation3 + $0x1f8] sm:$0xff]  ;;  %1728 = vmatpush.bf16.msrb.mxu2 %v5724_v46  ;;  %v5723_v63 = vld [vmem:[#allocation3 + $0x1b0] sm:$0xff] }
  0x66   : > { %v612_v21 = vunpack.c.l.b16 %v466_v12  ;;  %v735_v22 = vrot.slane %v282_v7, 5  ;;  %v470_v27 = vrot.slane %v468_v13, 4  ;;  %v473_v28 = vrot.slane %v471_v15, 5  ;;  %1787 = vmatpush.bf16.msrb.mxu3 %v5732_v47 }
  0x67   : > { %v456_v11 = vsel %vm6352_vm11, %v451_v60, %v455_v48  ;;  %v6486_v18 = vpack.c.b16 %v767_v9, %v766_v8  ;;  %v479_v29 = vrot.slane %v477_v16, 5  ;;  %v483_v32 = vrot.slane %v481_v17, 4  ;;  %v5714_v8 = vld [vmem:[#allocation3 + $0x168] sm:$0xff] }
  0x68   : > { %v611_v20 = vunpack.c.l.b16 %v456_v11  ;;  %v4906_v35 = vrot.slane %v281_v6, 9  ;;  %v737_v36 = vrot.slane %v735_v22, 4  ;;  %v738_v39 = vrot.slane %v283_v33, 5  ;;  %1488 = vmatpush.bf16.msrb.mxu1 %v5715_v62  ;;  %v5722_v9 = vld [vmem:[#allocation3 + $0x1a8] sm:$0xff]  ;;  %v5719_v62 = vld [vmem:[#allocation3 + $0x190] sm:$0xff] }
  0x69   : > { %v474_v40 = vor.u32 %v473_v28, %v470_v27  ;;  %v484_v41 = vor.u32 %v483_v32, %v479_v29  ;;  %v487_v44 = vshll.u32 %v283_v33, 16  ;;  %v492_v59 = vshrl.u32 %v6503_v50, 16  ;;  %1729 = vmatpush.bf16.msrb.mxu2 %v5723_v63  ;;  %v5730_v11 = vld [vmem:[#allocation3 + $0x1e8] sm:$0xff]  ;;  %v5713_v32 = vld [vmem:[#allocation3 + $0x160] sm:$0xff]  ;;  %v5727_v63 = vld [vmem:[#allocation3 + $0x1d0] sm:$0xff] }
  0x6a   : > { %v6493_v34 = vpack.c.b16 %v612_v21, %v611_v20  ;;  %v736_v48 = vsel %vm6337_vm8, %v4906_v35, %v735_v22  ;;  %v739_v43 = vsel %vm6337_vm8, %v737_v36, %v738_v39  ;;  %v495_v60 = vshll.u32 %v6503_v50, 16  ;;  %1788 = vmatpush.bf16.msrb.mxu3 %v5731_v1  ;;  %v6515_v22 = vld [vmem:[%s6335_s17 + $0x60] sm:$0xff]  ;;  %v286_v28 = vld [vmem:[%s6335_s17 + $0x68] sm:$0x1] }
  0x6b   : > { %v475_v51 = vrot.slane %v474_v40, 4  ;;  %v485_v53 = vrot.slane %v484_v41, 4  ;;  %v489_v55 = vrot.slane %v487_v44, 5  ;;  %v768_v57 = vunpack.c.l.b16 %v736_v48  ;;  %v5721_v33 = vld [vmem:[#allocation3 + $0x1a0] sm:$0xff]  ;;  %v5712_v48 = vld [vmem:[#allocation3 + $0x158] sm:$0xff] }
  0x6c   : > { %8202 = vst [vmem:[#allocation12_spill] sm:$0xff] %v6493_v34  ;;  %v769_v58 = vunpack.c.l.b16 %v739_v43  ;;  %v501_v2 = vshll.u32 %v285_v56, 16  ;;  %v505_v4 = vshrl.u32 %v285_v56, 16  ;;  %v494_v13 = vrot.slane %v492_v59, 4  ;;  %1489 = vmatpush.bf16.msrb.mxu1 %v5714_v8  ;;  %v5729_v35 = vld [vmem:[#allocation3 + $0x1e0] sm:$0xff]  ;;  %v5720_v43 = vld [vmem:[#allocation3 + $0x198] sm:$0xff] }
  0x6d   : > { %v480_v6 = vsel %vm6352_vm11, %v475_v51, %v479_v29  ;;  %v490_v7 = vsel %vm6352_vm11, %v485_v53, %v489_v55  ;;  %v497_v15 = vrot.slane %v495_v60, 5  ;;  %v742_v27 = vrot.slane %v285_v56, 5  ;;  %1730 = vmatpush.bf16.msrb.mxu2 %v5722_v9  ;;  %v5701_v40 = vld [vmem:[#allocation3 + $0x100] sm:$0xff]  ;;  %v5728_v51 = vld [vmem:[#allocation3 + $0x1d8] sm:$0xff]  ;;  %v5711_v60 = vld [vmem:[#allocation3 + $0x150] sm:$0xff] }
  0x6e   : > { %v6512_v12 = vpack.c.b16 %v769_v58, %v768_v57  ;;  %v613_v16 = vunpack.c.l.b16 %v480_v6  ;;  %v614_v17 = vunpack.c.l.b16 %v490_v7  ;;  %v503_v20 = vrot.slane %v501_v2, 5  ;;  %1789 = vmatpush.bf16.msrb.mxu3 %v5730_v11  ;;  %1435 = vmatpush.bf16.msrb.mxu0 %v5701_v40  ;;  %v287_v57 = vld [vmem:[%s6335_s17 + $0x6c] sm:$0xf]  ;;  %v288_v58 = vld [vmem:[%s6335_s17 + $0x70] sm:$0xf] }
  0x6f   : > { %v507_v21 = vrot.slane %v505_v4, 4  ;;  %v498_v29 = vor.u32 %v497_v15, %v494_v13  ;;  %v4907_v41 = vrot.slane %v6503_v50, 9  ;;  %v744_v44 = vrot.slane %v742_v27, 4  ;;  %v5718_v11 = vld [vmem:[#allocation3 + $0x188] sm:$0xff] }
  0x70   : > { %951 = vmatmul.bf16.gmra.mxu0 %v6420_v25  ;;  %v6519_v36 = vpack.c.b16 %v614_v17, %v613_v16  ;;  %v745_v45 = vrot.slane %v286_v28, 5  ;;  %v511_v46 = vshll.u32 %v286_v28, 16  ;;  %1490 = vmatpush.bf16.msrb.mxu1 %v5713_v32  ;;  %v516_v4 = vshrl.u32 %v287_v57, 16  ;;  %v5710_v15 = vld [vmem:[#allocation3 + $0x148] sm:$0xff]  ;;  %v289_v32 = vld [vmem:[%s6335_s17 + $0x74] sm:$0x1] }
  0x71   : > { %v508_v39 = vor.u32 %v507_v21, %v503_v20  ;;  %1731 = vmatpush.bf16.msrb.mxu2 %v5721_v33  ;;  %v499_v47 = vrot.slane %v498_v29, 4  ;;  %v743_v50 = vsel %vm6337_vm8, %v4907_v41, %v742_v27  ;;  %v519_v6 = vshll.u32 %v287_v57, 16  ;;  %v5726_v16 = vld [vmem:[#allocation3 + $0x1c8] sm:$0xff] }
  0x72   : > { %1010 = vmatmul.bf16.gmra.mxu1 %v6423_v30  ;;  %8203 = vst [vmem:[#allocation13_spill] sm:$0xff] %v6519_v36  ;;  %1790 = vmatpush.bf16.msrb.mxu3 %v5729_v35  ;;  %v746_v53 = vsel %vm6337_vm8, %v744_v44, %v745_v45  ;;  %v513_v56 = vrot.slane %v511_v46, 5  ;;  %v770_v1 = vunpack.c.l.b16 %v743_v50  ;;  %v525_v8 = vshll.u32 %v288_v58, 16  ;;  %v6538_v29 = vld [vmem:[%s6335_s17 + $0x6c] sm:$0xff]  ;;  %v5709_v44 = vld [vmem:[#allocation3 + $0x140] sm:$0xff] }
  0x73   : > { %1165 = vmatmul.bf16.gmra.mxu2 %v6401_v61  ;;  %v509_v55 = vrot.slane %v508_v39, 4  ;;  %v504_v59 = vsel %vm6352_vm11, %v499_v47, %v503_v20  ;;  %v771_v2 = vunpack.c.l.b16 %v746_v53  ;;  %v529_v9 = vshrl.u32 %v288_v58, 16  ;;  %v5717_v45 = vld [vmem:[#allocation3 + $0x180] sm:$0xff] }
  0x74   : > { %1224 = vmatmul.bf16.gmra.mxu3 %v6427_v37  ;;  %1491 = vmatpush.bf16.msrb.mxu1 %v5712_v48  ;;  %v615_v13 = vunpack.c.l.b16 %v504_v59  ;;  %v518_v21 = vrot.slane %v516_v4, 4  ;;  %v521_v27 = vrot.slane %v519_v6, 5  ;;  %v749_v33 = vrot.slane %v288_v58, 5  ;;  %v5725_v46 = vld [vmem:[#allocation3 + $0x1c0] sm:$0xff]  ;;  %v5740_v58 = vld [vmem:[#allocation3 + $0x238] sm:$0xff] }
  0x75   : > { %1732 = vmatpush.bf16.msrb.mxu2 %v5720_v43  ;;  %v514_v7 = vsel %vm6352_vm11, %v509_v55, %v513_v56  ;;  %v6535_v17 = vpack.c.b16 %v771_v2, %v770_v1  ;;  %v527_v35 = vrot.slane %v525_v8, 5  ;;  %v531_v39 = vrot.slane %v529_v9, 4  ;;  %1942 = vmatpush.bf16.msra.mxu0 %v5740_v58 }
  0x76   : > { %1791 = vmatpush.bf16.msrb.mxu3 %v5728_v51  ;;  %v616_v20 = vunpack.c.l.b16 %v514_v7  ;;  %v522_v48 = vor.u32 %v521_v27, %v518_v21  ;;  %v535_v43 = vshll.u32 %v289_v32, 16  ;;  %v4908_v51 = vrot.slane %v287_v57, 9 }
  0x77   : > { %v751_v50 = vrot.slane %v749_v33, 4  ;;  %v752_v53 = vrot.slane %v289_v32, 5  ;;  %v532_v55 = vor.u32 %v531_v39, %v527_v35  ;;  %v6560_v32 = vld [vmem:[%s6335_s17 + $0x78] sm:$0xff] }
  0x78   : > { %1492 = vmatpush.bf16.msrb.mxu1 %v5711_v60  ;;  %v6542_v47 = vpack.c.b16 %v616_v20, %v615_v13  ;;  %v523_v56 = vrot.slane %v522_v48, 4  ;;  %v537_v1 = vrot.slane %v535_v43, 5 }
  0x79   : > { %1733 = vmatpush.bf16.msrb.mxu2 %v5719_v62  ;;  %v750_v62 = vsel %vm6337_vm8, %v4908_v51, %v749_v33  ;;  %v753_v57 = vsel %vm6337_vm8, %v751_v50, %v752_v53 }
  0x7a   : > { %1792 = vmatpush.bf16.msrb.mxu3 %v5727_v63  ;;  %8204 = vst [vmem:[#allocation14_spill] sm:$0xff] %v6542_v47  ;;  %v533_v63 = vrot.slane %v532_v55, 4  ;;  %v772_v9 = vunpack.c.l.b16 %v750_v62  ;;  %v528_v13 = vsel %vm6352_vm11, %v523_v56, %v527_v35  ;;  %v5739_v55 = vld [vmem:[#allocation3 + $0x230] sm:$0xff] }
  0x7b   : > { %v617_v20 = vunpack.c.l.b16 %v528_v13  ;;  %1943 = vmatpush.bf16.msra.mxu0 %v5739_v55  ;;  %v5738_v13 = vld [vmem:[#allocation3 + $0x228] sm:$0xff] }
  0x7c   : > { %1493 = vmatpush.bf16.msrb.mxu1 %v5710_v15  ;;  %v538_v15 = vsel %vm6352_vm11, %v533_v63, %v537_v1 }
  0x7d   : > { %1734 = vmatpush.bf16.msrb.mxu2 %v5718_v11  ;;  %v773_v11 = vunpack.c.l.b16 %v753_v57  ;;  %v618_v21 = vunpack.c.l.b16 %v538_v15 }
  0x7e   : > { %1793 = vmatpush.bf16.msrb.mxu3 %v5726_v16 }
  0x7f   : > { %v6557_v16 = vpack.c.b16 %v773_v11, %v772_v9  ;;  %v6565_v35 = vpack.c.b16 %v618_v21, %v617_v20  ;;  %1944 = vmatpush.bf16.msra.mxu0 %v5738_v13 }
  0x80   : > { %956 = vmatmul.bf16.gmra.mxu0 %v6442_v5  ;;  %1494 = vmatpush.bf16.msrb.mxu1 %v5709_v44 }
  0x81   : > { %1735 = vmatpush.bf16.msrb.mxu2 %v5717_v45  ;;  %8205 = vst [vmem:[#allocation15_spill] sm:$0xff] %v6565_v35 }
  0x82   : > { %1015 = vmatmul.bf16.gmra.mxu1 %v6446_v10  ;;  %1794 = vmatpush.bf16.msrb.mxu3 %v5725_v46 }
  0x83   : > { %1170 = vmatmul.bf16.gmra.mxu2 %v6423_v30 }
  0x84   : > { %1229 = vmatmul.bf16.gmra.mxu3 %v6449_v14 }
  0x90   : > { %961 = vmatmul.bf16.gmra.mxu0 %v6464_v42 }
  0x92   : > { %1020 = vmatmul.bf16.gmra.mxu1 %v6467_v49 }
  0x93   : > { %1175 = vmatmul.bf16.gmra.mxu2 %v6446_v10 }
  0x94   : > { %1234 = vmatmul.bf16.gmra.mxu3 %v6471_v52 }
  0xa0   : > { %966 = vmatmul.bf16.gmra.mxu0 %v6486_v18 }
  0xa2   : > { %1025 = vmatmul.bf16.gmra.mxu1 %v6489_v24 }
  0xa3   : > { %1180 = vmatmul.bf16.gmra.mxu2 %v6467_v49 }
  0xa4   : > { %1239 = vmatmul.bf16.gmra.mxu3 %v6493_v34 }
  0xb0   : > { %971 = vmatmul.bf16.gmra.mxu0 %v6512_v12 }
  0xb2   : > { %1030 = vmatmul.bf16.gmra.mxu1 %v6515_v22 }
  0xb3   : > { %1185 = vmatmul.bf16.gmra.mxu2 %v6489_v24 }
  0xb4   : > { %1244 = vmatmul.bf16.gmra.mxu3 %v6519_v36 }
  0xbd   : > { %v937_v28 = vpop.f32.mrf.mxu0 }
  0xbf   : > { %v996_v40 = vpop.f32.mrf.mxu1 }
  0xc0   : > { %v997_v41 = vadd.f32 %v996_v40, %v937_v28  ;;  %976 = vmatmul.bf16.gmra.mxu0 %v6535_v17 }
  0xc2   : > { %1035 = vmatmul.bf16.gmra.mxu1 %v6538_v29 }
  0xc3   : > { %1190 = vmatmul.bf16.gmra.mxu2 %v6515_v22 }
  0xc4   : > { %1249 = vmatmul.bf16.gmra.mxu3 %v6542_v47 }
  0xc5   : > { %v939_v60 = vpop.f32.mrf.mxu0 }
  0xc6   : > { %v1151_v59 = vpop.f32.mrf.mxu2 }
  0xc7   : > { %v1152_v2 = vadd.f32 %v1151_v59, %v997_v41  ;;  %v998_v4 = vpop.f32.mrf.mxu1  ;;  %v1210_v6 = vpop.f32.mrf.mxu3 }
  0xc8   : > { %v999_v7 = vadd.f32 %v998_v4, %v939_v60 }
  0xc9   : > { %v6551_v8 = vadd.f32 %v1210_v6, %v1152_v2 }
  0xcd   : > { %v942_v28 = vpop.f32.mrf.mxu0 }
  0xce   : > { %v1153_v27 = vpop.f32.mrf.mxu2 }
  0xcf   : > { %v1154_v33 = vadd.f32 %v1153_v27, %v999_v7  ;;  %v1001_v39 = vpop.f32.mrf.mxu1  ;;  %v1212_v40 = vpop.f32.mrf.mxu3 }
  0xd0   : > { %v1002_v41 = vadd.f32 %v1001_v39, %v942_v28  ;;  %981 = vmatmul.bf16.gmra.mxu0 %v6557_v16 }
  0xd1   : > { %v6562_v44 = vadd.f32 %v1212_v40, %v1154_v33 }
  0xd2   : > { %1040 = vmatmul.bf16.gmra.mxu1 %v6560_v32 }
  0xd3   : > { %1195 = vmatmul.bf16.gmra.mxu2 %v6538_v29 }
  0xd4   : > { %1254 = vmatmul.bf16.gmra.mxu3 %v6565_v35 }
  0xd5   : > { %v944_v46 = vpop.f32.mrf.mxu0 }
  0xd6   : > { %v1156_v45 = vpop.f32.mrf.mxu2 }
  0xd7   : > { %v1157_v48 = vadd.f32 %v1156_v45, %v1002_v41  ;;  %v1003_v43 = vpop.f32.mrf.mxu1  ;;  %v1215_v51 = vpop.f32.mrf.mxu3 }
  0xd8   : > { %v1004_v50 = vadd.f32 %v1003_v43, %v944_v46 }
  0xd9   : > { %v6570_v53 = vadd.f32 %v1215_v51, %v1157_v48 }
  0xdd   : > { %v947_v58 = vpop.f32.mrf.mxu0 }
  0xde   : > { %v1158_v56 = vpop.f32.mrf.mxu2 }
  0xdf   : > { %v1159_v59 = vadd.f32 %v1158_v56, %v1004_v50  ;;  %v1006_v60 = vpop.f32.mrf.mxu1  ;;  %v1217_v62 = vpop.f32.mrf.mxu3 }
  0xe0   : > { %v1007_v57 = vadd.f32 %v1006_v60, %v947_v58  ;;  %1436 = vmatmul.bf16.vlgmr.msrb.gmra.mxu0 %v6383_v31 }
  0xe1   : > { %v6572_v63 = vadd.f32 %v1217_v62, %v1159_v59 }
  0xe2   : > { %1495 = vmatmul.bf16.vlgmr.msrb.gmra.mxu1 %v6376_v19 }
  0xe3   : > { %1736 = vmatmul.bf16.vlgmr.msrb.gmra.mxu2 %v6379_v26 }
  0xe4   : > { %1795 = vmatmul.bf16.vlgmr.msrb.gmra.mxu3 %v6405_v0 }
  0xe5   : > { %v949_v2 = vpop.f32.mrf.mxu0 }
  0xe6   : > { %v1161_v1 = vpop.f32.mrf.mxu2 }
  0xe7   : > { %v1162_v4 = vadd.f32 %v1161_v1, %v1007_v57  ;;  %v1008_v6 = vpop.f32.mrf.mxu1  ;;  %v1220_v7 = vpop.f32.mrf.mxu3 }
  0xe8   : > { %v1009_v9 = vadd.f32 %v1008_v6, %v949_v2 }
  0xe9   : > { %v6578_v11 = vadd.f32 %v1220_v7, %v1162_v4 }
  0xed   : > { %v952_v20 = vpop.f32.mrf.mxu0 }
  0xee   : > { %v1163_v15 = vpop.f32.mrf.mxu2 }
  0xef   : > { %v1164_v21 = vadd.f32 %v1163_v15, %v1009_v9  ;;  %v1011_v31 = vpop.f32.mrf.mxu1  ;;  %v1222_v27 = vpop.f32.mrf.mxu3 }
  0xf0   : > { %v1012_v19 = vadd.f32 %v1011_v31, %v952_v20  ;;  %1441 = vmatmul.bf16.gmra.mxu0 %v6405_v0 }
  0xf1   : > { %v6580_v28 = vadd.f32 %v1222_v27, %v1164_v21 }
  0xf2   : > { %1500 = vmatmul.bf16.gmra.mxu1 %v6398_v54 }
  0xf3   : > { %1741 = vmatmul.bf16.gmra.mxu2 %v6401_v61  ;;  %v5737_v61 = vld [vmem:[#allocation3 + $0x220] sm:$0xff] }
  0xf4   : > { %1800 = vmatmul.bf16.gmra.mxu3 %v6427_v37  ;;  %1945 = vmatpush.bf16.msra.mxu0 %v5737_v61 }
  0xf5   : > { %v954_v33 = vpop.f32.mrf.mxu0 }
  0xf6   : > { %v1166_v26 = vpop.f32.mrf.mxu2 }
  0xf7   : > { %v1167_v39 = vadd.f32 %v1166_v26, %v1012_v19  ;;  %v1013_v40 = vpop.f32.mrf.mxu1  ;;  %v1225_v41 = vpop.f32.mrf.mxu3 }
  0xf8   : > { %v1014_v45 = vadd.f32 %v1013_v40, %v954_v33 }
  0xf9   : > { %v6586_v46 = vadd.f32 %v1225_v41, %v1167_v39 }
  0xfd   : > { %v957_v43 = vpop.f32.mrf.mxu0 }
  0xfe   : > { %v1168_v48 = vpop.f32.mrf.mxu2 }
  0xff   : > { %v1169_v51 = vadd.f32 %v1168_v48, %v1014_v45  ;;  %v1016_v50 = vpop.f32.mrf.mxu1  ;;  %v1227_v55 = vpop.f32.mrf.mxu3 }
 0x100   : > { %v1017_v56 = vadd.f32 %v1016_v50, %v957_v43  ;;  %1446 = vmatmul.bf16.gmra.mxu0 %v6427_v37 }
 0x101   : > { %v6588_v58 = vadd.f32 %v1227_v55, %v1169_v51 }
 0x102   : > { %1505 = vmatmul.bf16.gmra.mxu1 %v6420_v25 }
 0x103   : > { %1746 = vmatmul.bf16.gmra.mxu2 %v6423_v30  ;;  %v5736_v30 = vld [vmem:[#allocation3 + $0x218] sm:$0xff] }
 0x104   : > { %1805 = vmatmul.bf16.gmra.mxu3 %v6449_v14  ;;  %1946 = vmatpush.bf16.msra.mxu0 %v5736_v30 }
 0x105   : > { %v959_v60 = vpop.f32.mrf.mxu0 }
 0x106   : > { %v1171_v59 = vpop.f32.mrf.mxu2 }
 0x107   : > { %v1172_v62 = vadd.f32 %v1171_v59, %v1017_v56  ;;  %v1018_v57 = vpop.f32.mrf.mxu1  ;;  %v1230_v1 = vpop.f32.mrf.mxu3 }
 0x108   : > { %v1019_v2 = vadd.f32 %v1018_v57, %v959_v60 }
 0x109   : > { %v6594_v4 = vadd.f32 %v1230_v1, %v1172_v62  ;;  %v5735_v1 = vld [vmem:[#allocation3 + $0x210] sm:$0xff] }
 0x10a   : > { %1947 = vmatpush.bf16.msra.mxu0 %v5735_v1 }
 0x10d   : > { %v962_v7 = vpop.f32.mrf.mxu0 }
 0x10e   : > { %v1173_v6 = vpop.f32.mrf.mxu2 }
 0x10f   : > { %v1174_v9 = vadd.f32 %v1173_v6, %v1019_v2  ;;  %v1021_v13 = vpop.f32.mrf.mxu1  ;;  %v1232_v15 = vpop.f32.mrf.mxu3 }
 0x110   : > { %v1022_v20 = vadd.f32 %v1021_v13, %v962_v7  ;;  %1451 = vmatmul.bf16.gmra.mxu0 %v6449_v14 }
 0x111   : > { %v6596_v21 = vadd.f32 %v1232_v15, %v1174_v9 }
 0x112   : > { %1510 = vmatmul.bf16.gmra.mxu1 %v6442_v5 }
 0x113   : > { %1751 = vmatmul.bf16.gmra.mxu2 %v6446_v10 }
 0x114   : > { %1810 = vmatmul.bf16.gmra.mxu3 %v6471_v52 }
 0x115   : > { %v964_v27 = vpop.f32.mrf.mxu0 }
 0x116   : > { %v1176_v31 = vpop.f32.mrf.mxu2 }
 0x117   : > { %v1177_v19 = vadd.f32 %v1176_v31, %v1022_v20  ;;  %v1023_v26 = vpop.f32.mrf.mxu1  ;;  %v1235_v33 = vpop.f32.mrf.mxu3 }
 0x118   : > { %v1024_v39 = vadd.f32 %v1023_v26, %v964_v27 }
 0x119   : > { %v6602_v40 = vadd.f32 %v1235_v33, %v1177_v19 }
 0x11d   : > { %v967_v45 = vpop.f32.mrf.mxu0 }
 0x11e   : > { %v1178_v41 = vpop.f32.mrf.mxu2 }
 0x11f   : > { %v1179_v48 = vadd.f32 %v1178_v41, %v1024_v39  ;;  %v1026_v43 = vpop.f32.mrf.mxu1  ;;  %v1237_v51 = vpop.f32.mrf.mxu3  ;;  %v5734_v39 = vld [vmem:[#allocation3 + $0x208] sm:$0xff] }
 0x120   : > { %v1027_v50 = vadd.f32 %v1026_v43, %v967_v45  ;;  %1456 = vmatmul.bf16.gmra.mxu0 %v6471_v52 }
 0x121   : > { %v6604_v55 = vadd.f32 %v1237_v51, %v1179_v48  ;;  %1948 = vmatpush.bf16.msra.mxu0 %v5734_v39 }
 0x122   : > { %1515 = vmatmul.bf16.gmra.mxu1 %v6464_v42 }
 0x123   : > { %1756 = vmatmul.bf16.gmra.mxu2 %v6467_v49 }
 0x124   : > { %1815 = vmatmul.bf16.gmra.mxu3 %v6493_v34 }
 0x125   : > { %v969_v56 = vpop.f32.mrf.mxu0 }
 0x126   : > { %v1181_v10 = vpop.f32.mrf.mxu2 }
 0x127   : > { %v1182_v61 = vadd.f32 %v1181_v10, %v1027_v50  ;;  %v1028_v59 = vpop.f32.mrf.mxu1  ;;  %v1240_v60 = vpop.f32.mrf.mxu3 }
 0x128   : > { %v1029_v62 = vadd.f32 %v1028_v59, %v969_v56 }
 0x129   : > { %v6610_v57 = vadd.f32 %v1240_v60, %v1182_v61  ;;  %v6627_v60 = vld [vmem:[%s6335_s17 + $0x78] sm:$0xf] }
 0x12d   : > { %v972_v6 = vpop.f32.mrf.mxu0 }
 0x12e   : > { %v1183_v2 = vpop.f32.mrf.mxu2 }
 0x12f   : > { %v1184_v7 = vadd.f32 %v1183_v2, %v1029_v62  ;;  %v1031_v9 = vpop.f32.mrf.mxu1  ;;  %v1242_v13 = vpop.f32.mrf.mxu3  ;;  %v6630_v62 = vld [vmem:[%s6335_s17 + $0x7c] sm:$0xf] }
 0x130   : > { %v1032_v15 = vadd.f32 %v1031_v9, %v972_v6  ;;  %1461 = vmatmul.bf16.gmra.mxu0 %v6493_v34  ;;  %v1264_v9 = vshll.u32 %v6627_v60, 16 }
 0x131   : > { %v6612_v20 = vadd.f32 %v1242_v13, %v1184_v7  ;;  %v1261_v7 = vshrl.u32 %v6627_v60, 16  ;;  %v1274_v13 = vshrl.u32 %v6630_v62, 16 }
 0x132   : > { %1520 = vmatmul.bf16.gmra.mxu1 %v6486_v18 }
 0x133   : > { %1761 = vmatmul.bf16.gmra.mxu2 %v6489_v24 }
 0x134   : > { %1820 = vmatmul.bf16.gmra.mxu3 %v6519_v36 }
 0x135   : > { %v974_v30 = vpop.f32.mrf.mxu0 }
 0x136   : > { %v1186_v49 = vpop.f32.mrf.mxu2 }
 0x137   : > { %v1187_v31 = vadd.f32 %v1186_v49, %v1032_v15  ;;  %v1033_v27 = vpop.f32.mrf.mxu1  ;;  %v1245_v19 = vpop.f32.mrf.mxu3 }
 0x138   : > { %v1034_v26 = vadd.f32 %v1033_v27, %v974_v30  ;;  %v1263_v30 = vrot.slane %v1261_v7, 4 }
 0x139   : > { %v6618_v33 = vadd.f32 %v1245_v19, %v1187_v31  ;;  %v1266_v31 = vrot.slane %v1264_v9, 5  ;;  %v1276_v19 = vrot.slane %v1274_v13, 4  ;;  %v6649_v9 = vld [vmem:[%s6335_s17 + $0x84] sm:$0xf] }
 0x13d   : > { %v977_v45 = vpop.f32.mrf.mxu0 }
 0x13e   : > { %v1188_v41 = vpop.f32.mrf.mxu2 }
 0x13f   : > { %v1189_v48 = vadd.f32 %v1188_v41, %v1034_v26  ;;  %v1036_v43 = vpop.f32.mrf.mxu1  ;;  %v1247_v51 = vpop.f32.mrf.mxu3  ;;  %v6639_v41 = vld [vmem:[%s6335_s17 + $0x80] sm:$0x1] }
 0x140   : > { %v1037_v24 = vadd.f32 %v1036_v43, %v977_v45  ;;  %1466 = vmatmul.bf16.gmra.mxu0 %v6519_v36  ;;  %v1287_v36 = vrot.slane %v6630_v62, 5 }
 0x141   : > { %v6620_v50 = vadd.f32 %v1247_v51, %v1189_v48  ;;  %v5733_v51 = vld [vmem:[#allocation3 + $0x200] sm:$0xff] }
 0x142   : > { %1525 = vmatmul.bf16.gmra.mxu1 %v6512_v12  ;;  %1949 = vmatpush.bf16.msra.mxu0 %v5733_v51 }
 0x143   : > { %1766 = vmatmul.bf16.gmra.mxu2 %v6515_v22  ;;  %v1270_v22 = vshll.u32 %v6630_v62, 16  ;;  %v5041_v62 = vrot.slane %v6627_v60, 9 }
 0x144   : > { %1825 = vmatmul.bf16.gmra.mxu3 %v6542_v47 }
 0x145   : > { %v979_v56 = vpop.f32.mrf.mxu0  ;;  %v1272_v27 = vrot.slane %v1270_v22, 5 }
 0x146   : > { %v1191_v10 = vpop.f32.mrf.mxu2 }
 0x147   : > { %v1192_v61 = vadd.f32 %v1191_v10, %v1037_v24  ;;  %v1038_v59 = vpop.f32.mrf.mxu1  ;;  %v1250_v1 = vpop.f32.mrf.mxu3  ;;  %v1267_v24 = vor.u32 %v1266_v31, %v1263_v30  ;;  %v1277_v10 = vor.u32 %v1276_v19, %v1272_v27  ;;  %v1570_v19 = vshll.u32 %v6649_v9, 16 }
 0x148   : > { %v1039_v2 = vadd.f32 %v1038_v59, %v979_v56  ;;  %v1280_v56 = vshll.u32 %v6639_v41, 16 }
 0x149   : > { %v6632_v6 = vadd.f32 %v1250_v1, %v1192_v61  ;;  %v1268_v1 = vrot.slane %v1267_v24, 4 }
 0x14a   : > { %v1282_v7 = vrot.slane %v1280_v56, 5  ;;  %v1572_v56 = vrot.slane %v1570_v19, 5 }
 0x14d   : > { %v982_v49 = vpop.f32.mrf.mxu0 }
 0x14e   : > { %v1193_v15 = vpop.f32.mrf.mxu2 }
 0x14f   : > { %v1194_v26 = vadd.f32 %v1193_v15, %v1039_v2  ;;  %v1041_v39 = vpop.f32.mrf.mxu1  ;;  %v1252_v45 = vpop.f32.mrf.mxu3  ;;  %v1278_v2 = vrot.slane %v1277_v10, 4  ;;  %v6652_v15 = vld [vmem:[%s6335_s17 + $0x88] sm:$0xf] }
 0x150   : > { %v1042_v48 = vadd.f32 %v1041_v39, %v982_v49  ;;  %1471 = vmatmul.bf16.gmra.mxu0 %v6542_v47 }
 0x151   : > { %v6641_v43 = vadd.f32 %v1252_v45, %v1194_v26  ;;  %v1273_v26 = vsel %vm6352_vm11, %v1268_v1, %v1272_v27  ;;  %v1283_v39 = vsel %vm6352_vm11, %v1278_v2, %v1282_v7  ;;  %v1576_v45 = vshll.u32 %v6652_v15, 16  ;;  %v6666_v27 = vld [vmem:[%s6335_s17 + $0x8c] sm:$0x1] }
 0x152   : > { %1530 = vmatmul.bf16.gmra.mxu1 %v6535_v17  ;;  %v1292_v51 = vunpack.c.l.b16 %v1273_v26  ;;  %v1293_v24 = vunpack.c.l.b16 %v1283_v39 }
 0x153   : > { %1771 = vmatmul.bf16.gmra.mxu2 %v6538_v29  ;;  %v1567_v29 = vshrl.u32 %v6649_v9, 16 }
 0x154   : > { %1830 = vmatmul.bf16.gmra.mxu3 %v6565_v35  ;;  %v1294_v26 = vpack.c.b16 %v1293_v24, %v1292_v51 }
 0x155   : > { %v984_v59 = vpop.f32.mrf.mxu0  ;;  %v1569_v10 = vrot.slane %v1567_v29, 4 }
 0x156   : > { %v1196_v61 = vpop.f32.mrf.mxu2 }
 0x157   : > { %v1197_v22 = vadd.f32 %v1196_v61, %v1042_v48  ;;  %v1043_v13 = vpop.f32.mrf.mxu1  ;;  %v1255_v49 = vpop.f32.mrf.mxu3  ;;  %v1580_v48 = vshrl.u32 %v6652_v15, 16  ;;  %v1573_v39 = vor.u32 %v1572_v56, %v1569_v10  ;;  %v1288_v10 = vsel %vm6337_vm8, %v5041_v62, %v1287_v36 }
 0x158   : > { %v1044_v30 = vadd.f32 %v1043_v13, %v984_v59 }
 0x159   : > { %v6654_v31 = vadd.f32 %v1255_v49, %v1197_v22  ;;  %v1578_v22 = vrot.slane %v1576_v45, 5  ;;  %v1582_v13 = vrot.slane %v1580_v48, 4  ;;  %v1289_v45 = vrot.slane %v1287_v36, 4 }
 0x15a   : > { %v1574_v48 = vrot.slane %v1573_v39, 4 }
 0x15b   : > { %v1583_v19 = vor.u32 %v1582_v13, %v1578_v22 }
 0x15d   : > { %v1437_v59 = vpop.f32.mrf.mxu0  ;;  %v1584_v51 = vrot.slane %v1583_v19, 4 }
 0x15e   : > { %v1198_v61 = vpop.f32.mrf.mxu2 }
 0x15f   : > { %v1199_v49 = vadd.f32 %v1198_v61, %v1044_v30  ;;  %v1496_v47 = vpop.f32.mrf.mxu1  ;;  %v1257_v1 = vpop.f32.mrf.mxu3  ;;  %v1586_v30 = vshll.u32 %v6666_v27, 16 }
 0x160   : > { %v1497_v2 = vadd.f32 %v1496_v47, %v1437_v59  ;;  %1476 = vmatmul.bf16.gmra.mxu0 %v6565_v35  ;;  %v1290_v47 = vrot.slane %v6639_v41, 5  ;;  %v1296_v41 = vunpack.c.l.b16 %v1288_v10 }
 0x161   : > { %v6668_v7 = vadd.f32 %v1257_v1, %v1199_v49  ;;  %v1588_v24 = vrot.slane %v1586_v30, 5  ;;  %v5668_v30 = vld [vmem:[%s6335_s17 + $0x84] sm:$0xff] }
 0x162   : > { %v6672_v29 = vadd.f32 %v1497_v2, %v6551_v8  ;;  %1535 = vmatmul.bf16.gmra.mxu1 %v6557_v16  ;;  %v1291_v56 = vsel %vm6337_vm8, %v1289_v45, %v1290_v47 }
 0x163   : > { %1776 = vmatmul.bf16.gmra.mxu2 %v6560_v32  ;;  %v1579_v32 = vsel %vm6352_vm11, %v1574_v48, %v1578_v22  ;;  %v1297_v13 = vunpack.c.l.b16 %v1291_v56  ;;  %v1589_v49 = vsel %vm6352_vm11, %v1584_v51, %v1588_v24 }
 0x164   : > { %1835 = vmatmul.bf16.gmra.mxu3 %v1294_v26  ;;  %v1596_v1 = vunpack.c.l.b16 %v1579_v32  ;;  %v1597_v2 = vunpack.c.l.b16 %v1589_v49 }
 0x165   : > { %v1439_v61 = vpop.f32.mrf.mxu0  ;;  %v6690_v19 = vpack.c.b16 %v1297_v13, %v1296_v41 }
 0x166   : > { %v1598_v45 = vpack.c.b16 %v1597_v2, %v1596_v1 }
 0x167   : > { %v1498_v8 = vpop.f32.mrf.mxu1 }
 0x168   : > { %v1499_v59 = vadd.f32 %v1498_v8, %v1439_v61 }
 0x16a   : > { %v6686_v60 = vadd.f32 %v1499_v59, %v6562_v44 }
 0x16d   : > { %v1442_v39 = vpop.f32.mrf.mxu0 }
 0x16f   : > { %v1501_v36 = vpop.f32.mrf.mxu1 }
 0x170   : > { %v1502_v62 = vadd.f32 %v1501_v36, %v1442_v39  ;;  %1481 = vmatmul.bf16.gmra.mxu0 %v1294_v26 }
 0x172   : > { %v6694_v22 = vadd.f32 %v1502_v62, %v6570_v53  ;;  %1540 = vmatmul.bf16.gmra.mxu1 %v6690_v19 }
 0x173   : > { %1781 = vmatmul.bf16.gmra.mxu2 %v5668_v30 }
 0x174   : > { %1840 = vmatmul.bf16.gmra.mxu3 %v1598_v45 }
 0x175   : > { %v1444_v44 = vpop.f32.mrf.mxu0 }
 0x177   : > { %v1503_v47 = vpop.f32.mrf.mxu1 }
 0x178   : > { %v1504_v48 = vadd.f32 %v1503_v47, %v1444_v44 }
 0x17a   : > { %v6698_v61 = vadd.f32 %v1504_v48, %v6572_v63 }
 0x17d   : > { %v1447_v51 = vpop.f32.mrf.mxu0 }
 0x17f   : > { %v1506_v24 = vpop.f32.mrf.mxu1 }
 0x180   : > { %v1507_v8 = vadd.f32 %v1506_v24, %v1447_v51  ;;  %1950 = vmatmul.bf16.vlgmr.msra.gmra.mxu0 %v6398_v54 }
 0x182   : > { %v6702_v26 = vadd.f32 %v1507_v8, %v6578_v11 }
 0x185   : > { %v1449_v53 = vpop.f32.mrf.mxu0 }
 0x187   : > { %v1508_v10 = vpop.f32.mrf.mxu1 }
 0x188   : > { %v1509_v56 = vadd.f32 %v1508_v10, %v1449_v53 }
 0x18a   : > { %v6705_v59 = vadd.f32 %v1509_v56, %v6580_v28 }
 0x18d   : > { %v1452_v32 = vpop.f32.mrf.mxu0 }
 0x18f   : > { %v1511_v41 = vpop.f32.mrf.mxu1 }
 0x190   : > { %v1512_v13 = vadd.f32 %v1511_v41, %v1452_v32  ;;  %1955 = vmatmul.bf16.gmra.mxu0 %v6420_v25  ;;  %v1737_v41 = vpop.f32.mrf.mxu2 }
 0x192   : > { %v6709_v63 = vadd.f32 %v1512_v13, %v6586_v46 }
 0x195   : > { %v1454_v49 = vpop.f32.mrf.mxu0 }
 0x197   : > { %v1513_v1 = vpop.f32.mrf.mxu1 }
 0x198   : > { %v1514_v54 = vadd.f32 %v1513_v1, %v1454_v49  ;;  %v1796_v49 = vpop.f32.mrf.mxu3 }
 0x19a   : > { %v6712_v11 = vadd.f32 %v1514_v54, %v6588_v58 }
 0x19d   : > { %v1457_v2 = vpop.f32.mrf.mxu0 }
 0x19f   : > { %v1516_v39 = vpop.f32.mrf.mxu1 }
 0x1a0   : > { %v1517_v36 = vadd.f32 %v1516_v39, %v1457_v2  ;;  %1960 = vmatmul.bf16.gmra.mxu0 %v6442_v5  ;;  %v1739_v2 = vpop.f32.mrf.mxu2  ;;  %v1798_v39 = vpop.f32.mrf.mxu3 }
 0x1a2   : > { %v6716_v28 = vadd.f32 %v1517_v36, %v6594_v4 }
 0x1a5   : > { %v1459_v30 = vpop.f32.mrf.mxu0 }
 0x1a7   : > { %v1518_v62 = vpop.f32.mrf.mxu1 }
 0x1a8   : > { %v1519_v25 = vadd.f32 %v1518_v62, %v1459_v30 }
 0x1aa   : > { %v6719_v46 = vadd.f32 %v1519_v25, %v6596_v21 }
 0x1ad   : > { %v1462_v45 = vpop.f32.mrf.mxu0 }
 0x1af   : > { %v1521_v44 = vpop.f32.mrf.mxu1 }
 0x1b0   : > { %v1522_v47 = vadd.f32 %v1521_v44, %v1462_v45  ;;  %1965 = vmatmul.bf16.gmra.mxu0 %v6464_v42  ;;  %v1801_v45 = vpop.f32.mrf.mxu3 }
 0x1b2   : > { %v6723_v58 = vadd.f32 %v1522_v47, %v6602_v40 }
 0x1b5   : > { %v1464_v48 = vpop.f32.mrf.mxu0 }
 0x1b7   : > { %v1523_v51 = vpop.f32.mrf.mxu1 }
 0x1b8   : > { %v1524_v5 = vadd.f32 %v1523_v51, %v1464_v48 }
 0x1ba   : > { %v6726_v4 = vadd.f32 %v1524_v5, %v6604_v55  ;;  %v1803_v5 = vpop.f32.mrf.mxu3 }
 0x1bd   : > { %v1467_v24 = vpop.f32.mrf.mxu0 }
 0x1bf   : > { %v1526_v8 = vpop.f32.mrf.mxu1 }
 0x1c0   : > { %v1527_v53 = vadd.f32 %v1526_v8, %v1467_v24  ;;  %1970 = vmatmul.bf16.gmra.mxu0 %v6486_v18 }
 0x1c2   : > { %v6730_v21 = vadd.f32 %v1527_v53, %v6610_v57 }
 0x1c5   : > { %v1469_v10 = vpop.f32.mrf.mxu0 }
 0x1c7   : > { %v1528_v56 = vpop.f32.mrf.mxu1 }
 0x1c8   : > { %v1529_v42 = vadd.f32 %v1528_v56, %v1469_v10  ;;  %v1806_v56 = vpop.f32.mrf.mxu3 }
 0x1ca   : > { %v6733_v40 = vadd.f32 %v1529_v42, %v6612_v20 }
 0x1cd   : > { %v1472_v32 = vpop.f32.mrf.mxu0 }
 0x1cf   : > { %v1531_v13 = vpop.f32.mrf.mxu1 }
 0x1d0   : > { %v1532_v55 = vadd.f32 %v1531_v13, %v1472_v32  ;;  %1975 = vmatmul.bf16.gmra.mxu0 %v6512_v12  ;;  %v1742_v12 = vpop.f32.mrf.mxu2  ;;  %v1797_v32 = vadd.f32 %v1796_v49, %v1737_v41  ;;  %v1808_v41 = vpop.f32.mrf.mxu3 }
 0x1d2   : > { %v6737_v1 = vadd.f32 %v1532_v55, %v6618_v33  ;;  %v6760_v55 = vld [vmem:[%s8098_s2] ss:$0 sm:$0xff] }
 0x1d5   : > { %v1474_v18 = vpop.f32.mrf.mxu0 }
 0x1d7   : > { %v1533_v54 = vpop.f32.mrf.mxu1 }
 0x1d8   : > { %v1534_v57 = vadd.f32 %v1533_v54, %v1474_v18  ;;  %v1744_v51 = vpop.f32.mrf.mxu2  ;;  %v1799_v54 = vadd.f32 %v1798_v39, %v1739_v2 }
 0x1da   : > { %v6740_v36 = vadd.f32 %v1534_v57, %v6620_v50 }
 0x1dd   : > { %v1477_v20 = vpop.f32.mrf.mxu0 }
 0x1df   : > { %v1536_v30 = vpop.f32.mrf.mxu1 }
 0x1e0   : > { %v1537_v62 = vadd.f32 %v1536_v30, %v1477_v20  ;;  %1980 = vmatmul.bf16.gmra.mxu0 %v6535_v17  ;;  %v1747_v53 = vpop.f32.mrf.mxu2 }
 0x1e2   : > { %v6744_v25 = vadd.f32 %v1537_v62, %v6632_v6 }
 0x1e5   : > { %v1479_v33 = vpop.f32.mrf.mxu0 }
 0x1e7   : > { %v1538_v44 = vpop.f32.mrf.mxu1 }
 0x1e8   : > { %v1539_v47 = vadd.f32 %v1538_v44, %v1479_v33  ;;  %v1749_v57 = vpop.f32.mrf.mxu2  ;;  %v1847_v33 = vadd.f32 %v1799_v54, %v6686_v60 }
 0x1ea   : > { %v6747_v48 = vadd.f32 %v1539_v47, %v6641_v43  ;;  %v1846_v43 = vadd.f32 %v1797_v32, %v6672_v29  ;;  %v1872_v29 = vrot.slane %v6666_v27, 5 }
 0x1ed   : > { %v1482_v50 = vpop.f32.mrf.mxu0 }
 0x1ef   : > { %v1541_v24 = vpop.f32.mrf.mxu1 }
 0x1f0   : > { %v1542_v8 = vadd.f32 %v1541_v24, %v1482_v50  ;;  %1985 = vmatmul.bf16.gmra.mxu0 %v6557_v16  ;;  %v1752_v24 = vpop.f32.mrf.mxu2 }
 0x1f2   : > { %v6751_v17 = vadd.f32 %v1542_v8, %v6654_v31  ;;  %v1869_v31 = vrot.slane %v6652_v15, 5  ;;  %v1811_v8 = vpop.f32.mrf.mxu3 }
 0x1f4   : > { %v1871_v49 = vrot.slane %v1869_v31, 4 }
 0x1f5   : > { %v1484_v6 = vpop.f32.mrf.mxu0 }
 0x1f6   : > { %v1873_v2 = vsel %vm6337_vm8, %v1871_v49, %v1872_v29 }
 0x1f7   : > { %v1543_v10 = vpop.f32.mrf.mxu1  ;;  %v1891_v50 = vunpack.c.l.b16 %v1873_v2 }
 0x1f8   : > { %v1544_v42 = vadd.f32 %v1543_v10, %v1484_v6 }
 0x1fa   : > { %v6754_v13 = vadd.f32 %v1544_v42, %v6668_v7  ;;  %v5174_v7 = vrot.slane %v6649_v9, 9 }
 0x1fc   : > { %v1870_v15 = vsel %vm6337_vm8, %v5174_v7, %v1869_v31  ;;  %v1807_v7 = vadd.f32 %v1806_v56, %v1747_v53  ;;  %v1812_v56 = vadd.f32 %v1811_v8, %v1752_v24 }
 0x1fd   : > { %v1951_v16 = vpop.f32.mrf.mxu0  ;;  %v1890_v9 = vunpack.c.l.b16 %v1870_v15 }
 0x1fe   : > { %v2001_v18 = vadd.f32 %v1951_v16, %v1846_v43  ;;  %v1804_v43 = vadd.f32 %v1803_v5, %v1744_v51 }
 0x1ff   : > { %v1892_v10 = vpack.c.b16 %v1891_v50, %v1890_v9 }
 0x200   : > { %v2025_v20 = vadd.f32 %v6760_v55, %v2001_v18  ;;  %1990 = vmatmul.bf16.gmra.mxu0 %v6690_v19  ;;  %v1802_v19 = vadd.f32 %v1801_v45, %v1742_v12  ;;  %v1754_v12 = vpop.f32.mrf.mxu2  ;;  %v1849_v31 = vadd.f32 %v1804_v43, %v6698_v61  ;;  %v1813_v18 = vpop.f32.mrf.mxu3 }
 0x202   : > { %v2045_v30 = vmax.f32 %v2025_v20, 0.0  ;;  %v1848_v60 = vadd.f32 %v1802_v19, %v6694_v22 }
 0x204   : > { %v2065_v62 = vpack.c.bf16 %v2045_v30, %v2045_v30  ;;  %v1850_v30 = vadd.f32 %v1807_v7, %v6702_v26 }
 0x205   : > { %v1953_v44 = vpop.f32.mrf.mxu0 }
 0x206   : > { %2085 = vst [vmem:[#allocation2 + $0x4] sm:$0xf] %v2065_v62  ;;  %v2002_v39 = vadd.f32 %v1953_v44, %v1847_v33  ;;  %v1809_v44 = vadd.f32 %v1808_v41, %v1749_v57  ;;  %v1814_v41 = vadd.f32 %v1813_v18, %v1754_v12 }
 0x208   : > { %v2026_v47 = vadd.f32 %v6760_v55, %v2002_v39  ;;  %v1757_v5 = vpop.f32.mrf.mxu2  ;;  %v1816_v33 = vpop.f32.mrf.mxu3  ;;  %v1851_v39 = vadd.f32 %v1809_v44, %v6705_v59  ;;  %v1853_v24 = vadd.f32 %v1814_v41, %v6712_v11 }
 0x20a   : > { %v2046_v27 = vmax.f32 %v2026_v47, 0.0 }
 0x20c   : > { %v2066_v6 = vpack.c.bf16 %v2046_v27, %v2046_v27 }
 0x20d   : > { %v1956_v42 = vpop.f32.mrf.mxu0 }
 0x20e   : > { %2086 = vst [vmem:[#allocation2 + $0x8] sm:$0xf] %v2066_v6  ;;  %v2003_v32 = vadd.f32 %v1956_v42, %v1848_v60  ;;  %v1852_v6 = vadd.f32 %v1812_v56, %v6709_v63 }
 0x210   : > { %v2027_v3 = vadd.f32 %v6760_v55, %v2003_v32  ;;  %1995 = vmatmul.bf16.gmra.mxu0 %v1892_v10  ;;  %v1759_v47 = vpop.f32.mrf.mxu2  ;;  %v1818_v26 = vpop.f32.mrf.mxu3 }
 0x212   : > { %v2047_v16 = vmax.f32 %v2027_v3, 0.0 }
 0x214   : > { %v2067_v45 = vpack.c.bf16 %v2047_v16, %v2047_v16  ;;  %v1817_v16 = vadd.f32 %v1816_v33, %v1757_v5 }
 0x215   : > { %v1958_v54 = vpop.f32.mrf.mxu0 }
 0x216   : > { %2087 = vst [vmem:[#allocation2 + $0x14] sm:$0xf] %v2067_v45  ;;  %v2004_v20 = vadd.f32 %v1958_v54, %v1849_v31 }
 0x218   : > { %v2028_v22 = vadd.f32 %v6760_v55, %v2004_v20  ;;  %v1762_v42 = vpop.f32.mrf.mxu2  ;;  %v1821_v32 = vpop.f32.mrf.mxu3  ;;  %v1854_v20 = vadd.f32 %v1817_v16, %v6716_v28 }
 0x219   : > { %v1822_v44 = vadd.f32 %v1821_v32, %v1762_v42 }
 0x21a   : > { %v2048_v49 = vmax.f32 %v2028_v22, 0.0  ;;  %v1819_v22 = vadd.f32 %v1818_v26, %v1759_v47 }
 0x21c   : > { %v2068_v29 = vpack.c.bf16 %v2048_v49, %v2048_v49 }
 0x21d   : > { %v1961_v51 = vpop.f32.mrf.mxu0 }
 0x21e   : > { %2088 = vst [vmem:[#allocation2 + $0x18] sm:$0xf] %v2068_v29  ;;  %v2005_v62 = vadd.f32 %v1961_v51, %v1850_v30  ;;  %v1855_v30 = vadd.f32 %v1819_v22, %v6719_v46 }
 0x220   : > { %v2029_v15 = vadd.f32 %v6760_v55, %v2005_v62  ;;  %v1764_v63 = vpop.f32.mrf.mxu2  ;;  %v1823_v12 = vpop.f32.mrf.mxu3 }
 0x222   : > { %v2049_v61 = vmax.f32 %v2029_v15, 0.0 }
 0x224   : > { %v2069_v2 = vpack.c.bf16 %v2049_v61, %v2049_v61 }
 0x225   : > { %v1963_v19 = vpop.f32.mrf.mxu0 }
 0x226   : > { %2089 = vst [vmem:[#allocation2 + $0x24] sm:$0xf] %v2069_v2  ;;  %v2006_v53 = vadd.f32 %v1963_v19, %v1851_v39  ;;  %v1856_v2 = vadd.f32 %v1822_v44, %v6723_v58 }
 0x228   : > { %v2030_v9 = vadd.f32 %v6760_v55, %v2006_v53  ;;  %v1767_v5 = vpop.f32.mrf.mxu2  ;;  %v1826_v33 = vpop.f32.mrf.mxu3  ;;  %v1824_v53 = vadd.f32 %v1823_v12, %v1764_v63 }
 0x22a   : > { %v2050_v50 = vmax.f32 %v2030_v9, 0.0 }
 0x22c   : > { %v2070_v27 = vpack.c.bf16 %v2050_v50, %v2050_v50  ;;  %v1857_v50 = vadd.f32 %v1824_v53, %v6726_v4 }
 0x22d   : > { %v1966_v60 = vpop.f32.mrf.mxu0 }
 0x22e   : > { %2090 = vst [vmem:[#allocation2 + $0x28] sm:$0xf] %v2070_v27  ;;  %v2007_v57 = vadd.f32 %v1966_v60, %v1852_v6  ;;  %v1827_v60 = vadd.f32 %v1826_v33, %v1767_v5 }
 0x230   : > { %v2031_v10 = vadd.f32 %v6760_v55, %v2007_v57  ;;  %v1769_v56 = vpop.f32.mrf.mxu2  ;;  %v1828_v46 = vpop.f32.mrf.mxu3 }
 0x232   : > { %v2051_v59 = vmax.f32 %v2031_v10, 0.0 }
 0x234   : > { %v2071_v43 = vpack.c.bf16 %v2051_v59, %v2051_v59  ;;  %v1858_v59 = vadd.f32 %v1827_v60, %v6730_v21 }
 0x235   : > { %v1968_v8 = vpop.f32.mrf.mxu0 }
 0x236   : > { %2091 = vst [vmem:[#allocation2 + $0x34] sm:$0xf] %v2071_v43  ;;  %v2008_v3 = vadd.f32 %v1968_v8, %v1853_v24  ;;  %v1829_v24 = vadd.f32 %v1828_v46, %v1769_v56 }
 0x238   : > { %v2032_v45 = vadd.f32 %v6760_v55, %v2008_v3  ;;  %v1772_v41 = vpop.f32.mrf.mxu2  ;;  %v1831_v10 = vpop.f32.mrf.mxu3 }
 0x23a   : > { %v2052_v31 = vmax.f32 %v2032_v45, 0.0  ;;  %v1859_v45 = vadd.f32 %v1829_v24, %v6733_v40 }
 0x23c   : > { %v2072_v54 = vpack.c.bf16 %v2052_v31, %v2052_v31 }
 0x23d   : > { %v1971_v18 = vpop.f32.mrf.mxu0 }
 0x23e   : > { %2092 = vst [vmem:[#allocation2 + $0x38] sm:$0xf] %v2072_v54  ;;  %v2009_v7 = vadd.f32 %v1971_v18, %v1854_v20  ;;  %v1832_v20 = vadd.f32 %v1831_v10, %v1772_v41 }
 0x240   : > { %v2033_v49 = vadd.f32 %v6760_v55, %v2009_v7  ;;  %v1774_v4 = vpop.f32.mrf.mxu2  ;;  %v1833_v31 = vpop.f32.mrf.mxu3  ;;  %v1860_v7 = vadd.f32 %v1832_v20, %v6737_v1 }
 0x242   : > { %v2053_v29 = vmax.f32 %v2033_v49, 0.0 }
 0x244   : > { %v2073_v11 = vpack.c.bf16 %v2053_v29, %v2053_v29 }
 0x245   : > { %v1973_v51 = vpop.f32.mrf.mxu0 }
 0x246   : > { %2093 = vst [vmem:[#allocation2 + $0x44] sm:$0xf] %v2073_v11  ;;  %v2010_v62 = vadd.f32 %v1973_v51, %v1855_v30  ;;  %v1834_v30 = vadd.f32 %v1833_v31, %v1774_v4 }
 0x248   : > { %v2034_v15 = vadd.f32 %v6760_v55, %v2010_v62  ;;  %v1777_v49 = vpop.f32.mrf.mxu2  ;;  %v1836_v11 = vpop.f32.mrf.mxu3  ;;  %v1861_v62 = vadd.f32 %v1834_v30, %v6740_v36 }
 0x24a   : > { %v2054_v28 = vmax.f32 %v2034_v15, 0.0  ;;  %v1837_v15 = vadd.f32 %v1836_v11, %v1777_v49 }
 0x24c   : > { %v2074_v61 = vpack.c.bf16 %v2054_v28, %v2054_v28 }
 0x24d   : > { %v1976_v39 = vpop.f32.mrf.mxu0 }
 0x24e   : > { %2094 = vst [vmem:[#allocation2 + $0x48] sm:$0xf] %v2074_v61  ;;  %v2011_v19 = vadd.f32 %v1976_v39, %v1856_v2 }
 0x250   : > { %v2035_v47 = vadd.f32 %v6760_v55, %v2011_v19  ;;  %v1779_v28 = vpop.f32.mrf.mxu2  ;;  %v1838_v1 = vpop.f32.mrf.mxu3  ;;  %v1862_v19 = vadd.f32 %v1837_v15, %v6744_v25 }
 0x252   : > { %v2055_v9 = vmax.f32 %v2035_v47, 0.0  ;;  %v1839_v47 = vadd.f32 %v1838_v1, %v1779_v28 }
 0x254   : > { %v2075_v26 = vpack.c.bf16 %v2055_v9, %v2055_v9 }
 0x255   : > { %v1978_v27 = vpop.f32.mrf.mxu0 }
 0x256   : > { %2095 = vst [vmem:[#allocation2 + $0x54] sm:$0xf] %v2075_v26  ;;  %v2012_v6 = vadd.f32 %v1978_v27, %v1857_v50  ;;  %v1863_v27 = vadd.f32 %v1839_v47, %v6747_v48 }
 0x258   : > { %v2036_v57 = vadd.f32 %v6760_v55, %v2012_v6  ;;  %v1782_v9 = vpop.f32.mrf.mxu2  ;;  %v1841_v26 = vpop.f32.mrf.mxu3 }
 0x25a   : > { %v2056_v58 = vmax.f32 %v2036_v57, 0.0  ;;  %v1842_v57 = vadd.f32 %v1841_v26, %v1782_v9 }
 0x25c   : > { %v2076_v42 = vpack.c.bf16 %v2056_v58, %v2056_v58 }
 0x25d   : > { %v1981_v32 = vpop.f32.mrf.mxu0 }
 0x25e   : > { %2096 = vst [vmem:[#allocation2 + $0x58] sm:$0xf] %v2076_v42  ;;  %v2013_v43 = vadd.f32 %v1981_v32, %v1858_v59  ;;  %v1864_v42 = vadd.f32 %v1842_v57, %v6751_v17 }
 0x260   : > { %v2037_v8 = vadd.f32 %v6760_v55, %v2013_v43  ;;  %v1784_v25 = vpop.f32.mrf.mxu2  ;;  %v1843_v59 = vpop.f32.mrf.mxu3 }
 0x261   : > { %v1844_v24 = vadd.f32 %v1843_v59, %v1784_v25 }
 0x262   : > { %v2057_v3 = vmax.f32 %v2037_v8, 0.0 }
 0x263   : > { %v1865_v4 = vadd.f32 %v1844_v24, %v6754_v13 }
 0x264   : > { %v2077_v16 = vpack.c.bf16 %v2057_v3, %v2057_v3 }
 0x265   : > { %v1983_v63 = vpop.f32.mrf.mxu0 }
 0x266   : > { %2097 = vst [vmem:[#allocation2 + $0x64] sm:$0xf] %v2077_v16  ;;  %v2014_v54 = vadd.f32 %v1983_v63, %v1859_v45 }
 0x268   : > { %v2038_v12 = vadd.f32 %v6760_v55, %v2014_v54 }
 0x26a   : > { %v2058_v18 = vmax.f32 %v2038_v12, 0.0 }
 0x26c   : > { %v2078_v21 = vpack.c.bf16 %v2058_v18, %v2058_v18 }
 0x26d   : > { %v1986_v22 = vpop.f32.mrf.mxu0 }
 0x26e   : > { %2098 = vst [vmem:[#allocation2 + $0x68] sm:$0xf] %v2078_v21  ;;  %v2015_v29 = vadd.f32 %v1986_v22, %v1860_v7 }
 0x270   : > { %v2039_v51 = vadd.f32 %v6760_v55, %v2015_v29 }
 0x272   : > { %v2059_v40 = vmax.f32 %v2039_v51, 0.0 }
 0x274   : > { %v2079_v5 = vpack.c.bf16 %v2059_v40, %v2059_v40 }
 0x275   : > { %v1988_v33 = vpop.f32.mrf.mxu0 }
 0x276   : > { %2099 = vst [vmem:[#allocation2 + $0x74] sm:$0xf] %v2079_v5  ;;  %v2016_v44 = vadd.f32 %v1988_v33, %v1861_v62 }
 0x278   : > { %v2040_v61 = vadd.f32 %v6760_v55, %v2016_v44 }
 0x27a   : > { %v2060_v2 = vmax.f32 %v2040_v61, 0.0 }
 0x27c   : > { %v2080_v39 = vpack.c.bf16 %v2060_v2, %v2060_v2 }
 0x27d   : > { %v1991_v53 = vpop.f32.mrf.mxu0 }
 0x27e   : > { %2100 = vst [vmem:[#allocation2 + $0x78] sm:$0xf] %v2080_v39  ;;  %v2017_v56 = vadd.f32 %v1991_v53, %v1862_v19 }
 0x280   : > { %v2041_v46 = vadd.f32 %v6760_v55, %v2017_v56 }
 0x282   : > { %v2061_v36 = vmax.f32 %v2041_v46, 0.0 }
 0x284   : > { %v2081_v50 = vpack.c.bf16 %v2061_v36, %v2061_v36 }
 0x285   : > { %v1993_v6 = vpop.f32.mrf.mxu0 }
 0x286   : > { %2101 = vst [vmem:[#allocation2 + $0x84] sm:$0xf] %v2081_v50  ;;  %v2018_v60 = vadd.f32 %v1993_v6, %v1863_v27 }
 0x288   : > { %v2042_v41 = vadd.f32 %v6760_v55, %v2018_v60 }
 0x28a   : > { %v2062_v58 = vmax.f32 %v2042_v41, 0.0 }
 0x28c   : > { %v2082_v10 = vpack.c.bf16 %v2062_v58, %v2062_v58 }
 0x28d   : > { %v1996_v32 = vpop.f32.mrf.mxu0 }
 0x28e   : > { %2102 = vst [vmem:[#allocation2 + $0x88] sm:$0xf] %v2082_v10  ;;  %v2019_v43 = vadd.f32 %v1996_v32, %v1864_v42 }
 0x290   : > { %v2043_v8 = vadd.f32 %v6760_v55, %v2019_v43 }
 0x292   : > { %v2063_v48 = vmax.f32 %v2043_v8, 0.0 }
 0x294   : > { %v2083_v3 = vpack.c.bf16 %v2063_v48, %v2063_v48 }
 0x295   : > { %v1998_v16 = vpop.f32.mrf.mxu0 }
 0x296   : > { %2103 = vst [vmem:[#allocation2 + $0x94] sm:$0xf] %v2083_v3  ;;  %v2020_v45 = vadd.f32 %v1998_v16, %v1865_v4 }
 0x298   : > { %v2044_v31 = vadd.f32 %v6760_v55, %v2020_v45 }
 0x29a   : > { %v2064_v63 = vmax.f32 %v2044_v31, 0.0  ;;  %2174 = sbr.rel (%p5207_p2) target bundleno = 676 (0x2a4), region = 48 }
 0x29c   : > { %v2084_v54 = vpack.c.bf16 %v2064_v63, %v2064_v63 }
 0x29e   : > { %2104 = vst [vmem:[#allocation2 + $0x98] sm:$0xf] %v2084_v54 }
 0x29f   : > { %v2178_v17 = vld [vmem:[#allocation2 + $0xc] sm:$0x1]  ;;  %v6141_v20 = vmov 0  }
 0x2a0   : > { %2175 = vst [vmem:[#allocation2] sm:$0xf] %v6141_v20  ;;  %v2179_v12 = vsel %vm6300_vm5, 0, %v2178_v17 }
 0x2a1   : > { %2176 = vst [vmem:[#allocation2 + $0x4] sm:$0xf] %v6141_v20 }
 0x2a2   : > { %2177 = vst [vmem:[#allocation2 + $0x8] sm:$0xf] %v6141_v20 }
 0x2a3   : > { %2180 = vst [vmem:[#allocation2 + $0xc] sm:$0x1] %v2179_v12 }
 0x2a4 PF: > { %p5208_p4 = scmp.ne.s32.totalorder %s6120_s21, 1 }
 0x2a6   : > { %2184 = sbr.rel (%p5208_p4) target bundleno = 688 (0x2b0), region = 52 }
 0x2ab   : > { %v2189_v13 = vld [vmem:[#allocation2 + $0x9c] sm:$0x1]  ;;  %v6142_v55 = vmov 0  }
 0x2ac   : > { %2186 = vst [vmem:[#allocation2 + $0x90] sm:$0xf] %v6142_v55  ;;  %v2190_v18 = vsel %vm6300_vm5, 0, %v2189_v13 }
 0x2ad   : > { %2187 = vst [vmem:[#allocation2 + $0x94] sm:$0xf] %v6142_v55 }
 0x2ae   : > { %2188 = vst [vmem:[#allocation2 + $0x98] sm:$0xf] %v6142_v55 }
 0x2af   : > { %2191 = vst [vmem:[#allocation2 + $0x9c] sm:$0x1] %v2190_v18 }
 0x2b0 PF: > { %v5788_v21 = vld [vmem:[%s8099_s3 + $0xb8] sm:$0xff]  ;;  %v5787_v49 = vld [vmem:[%s8099_s3 + $0xb0] sm:$0xff]  ;;  %v5786_v51 = vld [vmem:[%s8099_s3 + $0xa8] sm:$0xff]  ;;  %vm2290_vm12 = vsmask.f32 4368  ;;  %s5845_s11 = sshll.u32 %s6120_s21, 4 }
 0x2b1   : > { %v5796_v7 = vld [vmem:[%s8099_s3 + $0xf8] sm:$0xff]  ;;  %3060 = vmatpush.bf16.msra.mxu1 %v5788_v21  ;;  %v5795_v29 = vld [vmem:[%s8099_s3 + $0xf0] sm:$0xff]  ;;  %v5794_v40 = vld [vmem:[%s8099_s3 + $0xe8] sm:$0xff]  ;;  %s5652_s12 = sshll.u32 %s6124_s22, 5  ;;  %s4754_s17 = sshll.u32 %s6810_s26, 4  ;;  %s4755_s17 = int_to_ptr.vmem [resolvable:$true] %s4754_s17 }
 0x2b2   : > { %v5772_v22 = vld [vmem:[%s8099_s3 + $0x38] sm:$0xff]  ;;  %3109 = vmatpush.bf16.msra.mxu2 %v5796_v7  ;;  %v5771_v11 = vld [vmem:[%s8099_s3 + $0x30] sm:$0xff]  ;;  %v5770_v5 = vld [vmem:[%s8099_s3 + $0x28] sm:$0xff]  ;;  %s4751_s13 = sadd.s32 %s5845_s11, %s5652_s12  ;;  %s4739_s6 = scalar_lea.sflag [#allocation5], %s246_s30 }
 0x2b3   : > { %v5820_v23 = vld [vmem:[%s8099_s3 + $0x1b8] sm:$0xff]  ;;  %3254 = vmatpush.bf16.msra.mxu3 %v5772_v22  ;;  %v5819_v30 = vld [vmem:[%s8099_s3 + $0x1b0] sm:$0xff]  ;;  %v5818_v62 = vld [vmem:[%s8099_s3 + $0x1a8] sm:$0xff]  ;;  %s5653_s14 = sshll.u32 %s4751_s13, 2  ;;  %s6058_s13 = scalar_lea.hbm %s8101_s5, 256 }
 0x2b4   : > { %4170 = vmatpush.bf16.msrb.mxu0 %v5820_v23  ;;  %v5785_v33 = vld [vmem:[%s8099_s3 + $0xa0] sm:$0xff]  ;;  %v6866_v1 = vld [vmem:[#allocation2 + $0x8] sm:$0xf]  ;;  %v2216_v2 = vld [vmem:[#allocation2 + $0xc] sm:$0x1]  ;;  %s4753_s15 = scalar_lea.hbm %s8101_s5, %s5653_s14 }
 0x2b5   : > { %3061 = vmatpush.bf16.msra.mxu1 %v5787_v49  ;;  %v5793_v44 = vld [vmem:[%s8099_s3 + $0xe0] sm:$0xff]  ;;  %v5784_v53 = vld [vmem:[%s8099_s3 + $0x98] sm:$0xff]  ;;  %v2307_v47 = vshrl.u32 %v6866_v1, 16  ;;  %v2310_v46 = vshll.u32 %v6866_v1, 16  ;;  %v2590_v9 = vshll.u32 %v2216_v2, 16  ;;  %v5783_v17 = vld [vmem:[%s8099_s3 + $0x90] sm:$0xff] }
 0x2b6   : > { %3110 = vmatpush.bf16.msra.mxu2 %v5795_v29  ;;  %v5769_v15 = vld [vmem:[%s8099_s3 + $0x20] sm:$0xff]  ;;  %v5792_v56 = vld [vmem:[%s8099_s3 + $0xd8] sm:$0xff]  ;;  %v2225_v36 = vld [vmem:[#allocation2 + $0x10] sm:$0x8]  ;;  %s4756_s27 = sshll.u32 %s4753_s15, 4  ;;  %s4757_s27 = int_to_ptr.hbm [resolvable:$true] %s4756_s27 }
 0x2b7   : > { %3255 = vmatpush.bf16.msra.mxu3 %v5771_v11  ;;  %v5817_v28 = vld [vmem:[%s8099_s3 + $0x1a0] sm:$0xff]  ;;  %v5768_v26 = vld [vmem:[%s8099_s3 + $0x18] sm:$0xff]  ;;  %v6879_v6 = vld [vmem:[#allocation2 + $0x14] sm:$0xf]  ;;  %v2584_v57 = vrot.slane %v2310_v46, 5  ;;  %v2586_v41 = vrot.slane %v2307_v47, 4 }
 0x2b8   : > { %4171 = vmatpush.bf16.msrb.mxu0 %v5819_v30  ;;  %v2193_v61 = vld [vmem:[#allocation2 + $0x4] sm:$0xf]  ;;  %v6881_v60 = vld [vmem:[#allocation2 + $0x18] sm:$0xf]  ;;  %v2592_v58 = vrot.slane %v2590_v9, 5  ;;  %v2693_v25 = vshrl.u32 %v2225_v36, 16  ;;  %vm6902_vm13 = vmor %vm2139_vm4, %vm2290_vm12 }
 0x2b9   : > { %3062 = vmatpush.bf16.msra.mxu1 %v5786_v51  ;;  %v2298_v39 = vshrl.u32 %v2193_v61, 16  ;;  %v2301_v19 = vshll.u32 %v2193_v61, 16  ;;  %v2192_v10 = vld [vmem:[#allocation2] sm:$0x8]  ;;  %v5816_v42 = vld [vmem:[%s8099_s3 + $0x198] sm:$0xff]  ;;  %v8137_v32 = vshrl.u32 %v6879_v6, 16  ;;  %v2587_v48 = vor.u32 %v2586_v41, %v2584_v57 }
 0x2ba   : > { %3111 = vmatpush.bf16.msra.mxu2 %v5794_v40  ;;  %v8136_v43 = vshll.u32 %v6879_v6, 16  ;;  %v8133_v24 = vshrl.u32 %v6881_v60, 16  ;;  %v2258_v8 = vld [vmem:[#allocation2 + $0x20] sm:$0x8]  ;;  %v5249_v3 = vrot.slane %v2693_v25, 11  ;;  %v8135_v4 = vshll.u32 %v6881_v60, 16 }
 0x2bb   : > { %3256 = vmatpush.bf16.msra.mxu3 %v5770_v5  ;;  %v2580_v50 = vrot.slane %v2298_v39, 4  ;;  %v2581_v27 = vrot.slane %v2301_v19, 5  ;;  %v2293_v16 = vshrl.u32 %v2192_v10, 16  ;;  %v2700_v31 = vrot.slane %v8137_v32, 7  ;;  %v5791_v20 = vld [vmem:[%s8099_s3 + $0xd0] sm:$0xff]  ;;  %v5782_v1 = vld [vmem:[%s8099_s3 + $0x88] sm:$0xff] }
 0x2bc   : > { %4172 = vmatpush.bf16.msrb.mxu0 %v5818_v62  ;;  %v2709_v63 = vrot.slane %v8133_v24, 7  ;;  %v2300_v54 = vrot.slane %v2298_v39, 7  ;;  %v2588_v12 = vrot.slane %v2587_v48, 4  ;;  %v2309_v18 = vrot.slane %v2307_v47, 7  ;;  %v5767_v7 = vld [vmem:[%s8099_s3 + $0x10] sm:$0xff]  ;;  %v5790_v2 = vld [vmem:[%s8099_s3 + $0xc8] sm:$0xff] }
 0x2bd   : > { %3063 = vmatpush.bf16.msra.mxu1 %v5785_v33  ;;  %v2582_v59 = vor.u32 %v2581_v27, %v2580_v50  ;;  %v5209_v55 = vrot.slane %v2293_v16, 11  ;;  %v3787_v21 = vshrl.u32 %v2258_v8, 16  ;;  %v5815_v22 = vld [vmem:[%s8099_s3 + $0x190] sm:$0xff]  ;;  %v2703_v49 = vor.u32 %v8136_v43, %v2700_v31  ;;  %v6922_v62 = vld [vmem:[#allocation2 + $0x24] sm:$0xf]  ;;  %v5766_v47 = vld [vmem:[%s8099_s3 + $0x8] sm:$0xff] }
 0x2be   : > { %3112 = vmatpush.bf16.msra.mxu2 %v5793_v44  ;;  %v2705_v29 = vrot.slane %v2700_v31, 4  ;;  %v2712_v11 = vor.u32 %v8135_v4, %v2709_v63  ;;  %v2593_v30 = vsel %vm6352_vm11, %v2588_v12, %v2592_v58  ;;  %v2303_v40 = vor.u32 %v2301_v19, %v2300_v54  ;;  %v6930_v61 = vld [vmem:[#allocation2 + $0x28] sm:$0xf]  ;;  %v6951_v27 = vld [vmem:[#allocation2 + $0x18] sm:$0xf]  ;;  %v5789_v41 = vld [vmem:[%s8099_s3 + $0xc0] sm:$0xff] }
 0x2bf   : > { %3257 = vmatpush.bf16.msra.mxu3 %v5769_v15  ;;  %v2583_v45 = vrot.slane %v2582_v59, 4  ;;  %v2305_v5 = vrot.slane %v2300_v54, 4  ;;  %v6924_v33 = vunpack.c.l.b16 %v2593_v30  ;;  %v2704_v44 = vsel %vm6902_vm13, %v5249_v3, %v2703_v49  ;;  %v2217_v48 = vld [vmem:[#allocation2 + $0x1c] sm:$0x1]  ;;  %v5765_v12 = vld [vmem:[%s8099_s3] sm:$0xff]  ;;  %s6052_s9 = sshra.s32 %s4757_s27, 4  ;;  %s6053_s9 = int_to_ptr.hbm [resolvable:$true] %s6052_s9 }
 0x2c0   : > { %4173 = vmatpush.bf16.msrb.mxu0 %v5817_v28  ;;  %v2713_v15 = vsel %vm6902_vm13, %v2705_v29, %v2712_v11  ;;  %v2312_v28 = vor.u32 %v2310_v46, %v2309_v18  ;;  %v2900_v39 = vunpack.c.l.b16 %v2704_v44  ;;  %v5814_v46 = vld [vmem:[%s8099_s3 + $0x188] sm:$0xff]  ;;  %v8114_v50 = vshrl.u32 %v6922_v62, 16  ;;  %v5812_v49 = vld [vmem:[%s8099_s3 + $0x178] sm:$0xff]  ;;  %v2273_v14 = vld [vmem:[#allocation2 + $0x70] sm:$0x8]  ;;  %s6054_s10 = scalar_lea.hbm %s6053_s9, 64  ;;  %p6059_p9 = scmp.lt.s32.totalorder %s6053_s9, %s8101_s5 }
 0x2c1   : > { %3064 = vmatpush.bf16.msra.mxu1 %v5784_v53  ;;  %v2585_v23 = vsel %vm6352_vm11, %v2583_v45, %v2584_v57  ;;  %v2901_v19 = vunpack.c.l.b16 %v2713_v15  ;;  %v2304_v53 = vsel %vm6902_vm13, %v5209_v55, %v2303_v40  ;;  %v5781_v57 = vld [vmem:[%s8099_s3 + $0x80] sm:$0xff]  ;;  %v8121_v10 = vshll.u32 %v6922_v62, 16  ;;  %p6055_p5 = scmp.ne.s32.totalorder %s6053_s9, %s6054_s10  ;;  %p6060_p10 = scmp.lt.s32.totalorder %s6058_s13, %s6054_s10 }
 0x2c2   : > { %3113 = vmatpush.bf16.msra.mxu2 %v5792_v56  ;;  %v6920_v51 = vunpack.c.l.b16 %v2585_v23  ;;  %v6940_v56 = vld [vmem:[#allocation2 + $0x14] sm:$0xf]  ;;  %v2313_v9 = vsel %vm6902_vm13, %v2305_v5, %v2312_v28  ;;  %v2468_v36 = vunpack.c.l.b16 %v2304_v53  ;;  %v3794_v59 = vrot.slane %v8114_v50, 7  ;;  %v5813_v55 = vld [vmem:[%s8099_s3 + $0x180] sm:$0xff]  ;;  %v5804_v23 = vld [vmem:[%s8099_s3 + $0x138] sm:$0xff] }
 0x2c3   : > { %3258 = vmatpush.bf16.msra.mxu3 %v5768_v26  ;;  %v5481_v26 = vrot.slane %v3787_v21, 11  ;;  %v2469_v25 = vunpack.c.l.b16 %v2313_v9  ;;  %v8113_v8 = vshll.u32 %v6930_v61, 16  ;;  %v2320_v3 = vshrl.u32 %v6940_v56, 16  ;;  %v2195_v53 = vld [vmem:[#allocation2 + $0x10] sm:$0x8]  ;;  %p6056_p6 = pnand %p6055_p5, %p6227_p3  ;;  %p6061_p11 = por %p6060_p10, %p6059_p9 }
 0x2c4   : > { %4174 = vmatpush.bf16.msrb.mxu0 %v5816_v42  ;;  %v2884_v58 = vpack.c.b16 %v6924_v33, %v6920_v51  ;;  %v8112_v42 = vshrl.u32 %v6930_v61, 16  ;;  %v2323_v16 = vshll.u32 %v6940_v56, 16  ;;  %v2916_v45 = vpack.c.b16 %v2901_v19, %v2900_v39  ;;  %v6996_v33 = vld [vmem:[#allocation2 + $0x28] sm:$0xf] }
 0x2c5   : > { %3065 = vmatpush.bf16.msra.mxu1 %v5783_v17  ;;  %v2484_v31 = vpack.c.b16 %v2469_v25, %v2468_v36  ;;  %v2329_v54 = vshrl.u32 %v6951_v27, 16  ;;  %v2228_v17 = vld [vmem:[#allocation2 + $0x20] sm:$0x8]  ;;  %v3797_v18 = vor.u32 %v8121_v10, %v3794_v59  ;;  %v3799_v21 = vrot.slane %v3794_v59, 4  ;;  %v5803_v59 = vld [vmem:[%s8099_s3 + $0x130] sm:$0xff]  ;;  %p6057_p7 = pneg %p6056_p6 }
 0x2c6   : > { %3114 = vmatpush.bf16.msra.mxu2 %v5791_v20  ;;  %v3803_v63 = vrot.slane %v8112_v42, 7  ;;  %v6971_v20 = vld [vmem:[#allocation2 + $0x24] sm:$0xf]  ;;  %v2595_v11 = vrot.slane %v2323_v16, 5  ;;  %v2604_v51 = vshll.u32 %v2217_v48, 16  ;;  %v2715_v44 = vshrl.u32 %v2228_v17, 16 }
 0x2c7   : > { %3259 = vmatpush.bf16.msra.mxu3 %v5767_v7  ;;  %v2332_v7 = vshll.u32 %v6951_v27, 16  ;;  %v2600_v30 = vrot.slane %v2329_v54, 4  ;;  %v3798_v40 = vsel %vm6902_vm13, %v5481_v26, %v3797_v18  ;;  %v8127_v15 = vshrl.u32 %v6971_v20, 16  ;;  %v5811_v48 = vld [vmem:[%s8099_s3 + $0x170] sm:$0xff]  ;;  %v5778_v27 = vld [vmem:[%s8099_s3 + $0x68] sm:$0xff]  ;;  %p6062_p12 = pnand %p6061_p11, %p6057_p7 }
 0x2c8   : > { %4175 = vmatpush.bf16.msrb.mxu0 %v5815_v22  ;;  %v2594_v22 = vrot.slane %v2320_v3, 4  ;;  %v3806_v29 = vor.u32 %v8113_v8, %v3803_v63  ;;  %v2606_v19 = vrot.slane %v2604_v51, 5  ;;  %v5250_v9 = vrot.slane %v2715_v44, 11  ;;  %v5802_v44 = vld [vmem:[%s8099_s3 + $0x128] sm:$0xff]  ;;  %v2201_v42 = vld [vmem:[#allocation2 + $0x30] sm:$0x8] }
 0x2c9   : > { %3066 = vmatpush.bf16.msra.mxu1 %v5782_v1  ;;  %v2598_v5 = vrot.slane %v2332_v7, 5  ;;  %v3962_v1 = vunpack.c.l.b16 %v3798_v40  ;;  %v2722_v36 = vrot.slane %v8127_v15, 7  ;;  %v8123_v25 = vshll.u32 %v6996_v33, 16 }
 0x2ca   : > { %3115 = vmatpush.bf16.msra.mxu2 %v5790_v2  ;;  %v3807_v28 = vsel %vm6902_vm13, %v3799_v21, %v3806_v29  ;;  %v5780_v2 = vld [vmem:[%s8099_s3 + $0x78] sm:$0xff]  ;;  %v2596_v39 = vor.u32 %v2595_v11, %v2594_v22  ;;  %v2331_v11 = vrot.slane %v2329_v54, 7  ;;  %v5810_v54 = vld [vmem:[%s8099_s3 + $0x168] sm:$0xff] }
 0x2cb   : > { %3260 = vmatpush.bf16.msra.mxu3 %v5766_v47  ;;  %v3963_v47 = vunpack.c.l.b16 %v3807_v28 }
 0x2cc   : > { %4176 = vmatpush.bf16.msrb.mxu0 %v5814_v46  ;;  %v2601_v46 = vor.u32 %v2600_v30, %v2598_v5  ;;  %v2597_v26 = vrot.slane %v2596_v39, 4  ;;  %v2262_v30 = vld [vmem:[#allocation2 + $0x34] sm:$0xf]  ;;  %v2263_v39 = vld [vmem:[#allocation2 + $0x38] sm:$0xf] }
 0x2cd   : > { %3067 = vmatpush.bf16.msra.mxu1 %v5781_v57  ;;  %v8124_v57 = vshll.u32 %v6971_v20, 16  ;;  %v3978_v63 = vpack.c.b16 %v3963_v47, %v3962_v1  ;;  %v3814_v47 = vshrl.u32 %v2262_v30, 16 }
 0x2ce   : > { %3116 = vmatpush.bf16.msra.mxu2 %v5789_v41  ;;  %v8122_v41 = vshrl.u32 %v6996_v33, 16  ;;  %v2602_v17 = vrot.slane %v2601_v46, 4  ;;  %v2599_v18 = vsel %vm6352_vm11, %v2597_v26, %v2598_v5  ;;  %v7050_v46 = vld [vmem:[#allocation2 + $0x24] sm:$0xf] }
 0x2cf   : > { %3261 = vmatpush.bf16.msra.mxu3 %v5765_v12  ;;  %v2727_v12 = vrot.slane %v2722_v36, 4  ;;  %v2725_v21 = vor.u32 %v8124_v57, %v2722_v36  ;;  %v7242_v57 = vld [vmem:[#allocation2 + $0x58] sm:$0xf] }
 0x2d0   : > { %4177 = vmatpush.bf16.msrb.mxu0 %v5813_v55  ;;  %3068 = vmatmul.bf16.vlgmr.msra.gmra.mxu1 %v2884_v58  ;;  %v2315_v55 = vshrl.u32 %v2195_v53, 16  ;;  %v2731_v22 = vrot.slane %v8122_v41, 7  ;;  %v5779_v58 = vld [vmem:[%s8099_s3 + $0x70] sm:$0xff] }
 0x2d1   : > { %3117 = vmatmul.bf16.vlgmr.msra.gmra.mxu2 %v2916_v45  ;;  %3303 = vmatpush.bf16.msrb.mxu1 %v5780_v2  ;;  %v2607_v45 = vsel %vm6352_vm11, %v2602_v17, %v2606_v19  ;;  %v2726_v40 = vsel %vm6902_vm13, %v5250_v9, %v2725_v21  ;;  %v2334_v2 = vor.u32 %v2332_v7, %v2331_v11  ;;  %v3823_v17 = vshrl.u32 %v2263_v39, 16  ;;  %v7059_v21 = vld [vmem:[#allocation2 + $0x28] sm:$0xf] }
 0x2d2   : > { %3672 = vmatpush.bf16.msrb.mxu2 %v5804_v23  ;;  %3262 = vmatmul.bf16.vlgmr.msra.gmra.mxu3 %v2484_v31  ;;  %v2322_v23 = vrot.slane %v2320_v3, 7  ;;  %v7026_v31 = vunpack.c.l.b16 %v2599_v18  ;;  %v5210_v29 = vrot.slane %v2315_v55, 11  ;;  %v7028_v51 = vunpack.c.l.b16 %v2607_v45 }
 0x2d3   : > { %3721 = vmatpush.bf16.msrb.mxu3 %v5812_v49  ;;  %v2261_v49 = vld [vmem:[#allocation2 + $0x30] sm:$0x8]  ;;  %4178 = vmatmul.bf16.vlgmr.msrb.gmra.mxu0 %v3978_v63  ;;  %v2734_v3 = vor.u32 %v8123_v25, %v2731_v22  ;;  %v2902_v28 = vunpack.c.l.b16 %v2726_v40  ;;  %v3817_v63 = vshll.u32 %v2262_v30, 16  ;;  %v3826_v55 = vshll.u32 %v2263_v39, 16 }
 0x2d4   : > { %v2325_v5 = vor.u32 %v2323_v16, %v2322_v23  ;;  %v2327_v1 = vrot.slane %v2322_v23, 4  ;;  %v3809_v19 = vshrl.u32 %v2261_v49, 16  ;;  %v2885_v56 = vpack.c.b16 %v7028_v51, %v7026_v31  ;;  %v2231_v39 = vld [vmem:[#allocation2 + $0x30] sm:$0x8] }
 0x2d5   : > { %v2735_v16 = vsel %vm6902_vm13, %v2727_v12, %v2734_v3  ;;  %3304 = vmatpush.bf16.msrb.mxu1 %v5779_v58  ;;  %v7057_v18 = vrot.slane %v3814_v47, 4  ;;  %v2342_v22 = vshrl.u32 %v7050_v46, 16  ;;  %v3825_v45 = vrot.slane %v3823_v17, 7  ;;  %v2218_v3 = vld [vmem:[#allocation2 + $0x2c] sm:$0x1] }
 0x2d6   : > { %3673 = vmatpush.bf16.msrb.mxu2 %v5803_v59  ;;  %v2326_v53 = vsel %vm6902_vm13, %v5210_v29, %v2325_v5  ;;  %v2903_v7 = vunpack.c.l.b16 %v2735_v16  ;;  %v2335_v9 = vsel %vm6902_vm13, %v2327_v1, %v2334_v2  ;;  %v5482_v26 = vrot.slane %v3809_v19, 11  ;;  %v7077_v19 = vld [vmem:[#allocation2 + $0x34] sm:$0xf] }
 0x2d7   : > { %3722 = vmatpush.bf16.msrb.mxu3 %v5811_v48  ;;  %v2470_v36 = vunpack.c.l.b16 %v2326_v53  ;;  %v2471_v59 = vunpack.c.l.b16 %v2335_v9  ;;  %v3816_v48 = vrot.slane %v3814_v47, 7  ;;  %v7062_v31 = vrot.slane %v3817_v63, 5 }
 0x2d8   : > { %v2917_v12 = vpack.c.b16 %v2903_v7, %v2902_v28  ;;  %v7064_v29 = vrot.slane %v3826_v55, 5  ;;  %v7066_v11 = vrot.slane %v3823_v17, 4  ;;  %v2345_v30 = vshll.u32 %v7050_v46, 16  ;;  %v7150_v28 = vld [vmem:[#allocation2 + $0x48] sm:$0xf] }
 0x2d9   : > { %v2485_v23 = vpack.c.b16 %v2471_v59, %v2470_v36  ;;  %v3819_v49 = vor.u32 %v3817_v63, %v3816_v48  ;;  %v3821_v58 = vrot.slane %v3816_v48, 4  ;;  %3305 = vmatpush.bf16.msrb.mxu1 %v5778_v27  ;;  %v3828_v40 = vor.u32 %v3826_v55, %v3825_v45  ;;  %v7083_v27 = vld [vmem:[#allocation2 + $0x38] sm:$0xf]  ;;  %v2198_v63 = vld [vmem:[#allocation2 + $0x20] sm:$0x8] }
 0x2da   : > { %3674 = vmatpush.bf16.msrb.mxu2 %v5802_v44  ;;  %v2351_v5 = vshrl.u32 %v7059_v21, 16  ;;  %v2354_v44 = vshll.u32 %v7059_v21, 16  ;;  %v2608_v2 = vrot.slane %v2342_v22, 4  ;;  %v2609_v53 = vrot.slane %v2345_v30, 5 }
 0x2db   : > { %3723 = vmatpush.bf16.msrb.mxu3 %v5810_v54  ;;  %v3820_v51 = vsel %vm6902_vm13, %v5482_v26, %v3819_v49  ;;  %v3829_v16 = vsel %vm6902_vm13, %v3821_v58, %v3828_v40  ;;  %v2618_v9 = vshll.u32 %v2218_v3, 16  ;;  %v2737_v59 = vshrl.u32 %v2231_v39, 16 }
 0x2dc   : > { %v3964_v54 = vunpack.c.l.b16 %v3820_v51  ;;  %v2612_v47 = vrot.slane %v2354_v44, 5  ;;  %v2614_v46 = vrot.slane %v2351_v5, 4  ;;  %v3965_v7 = vunpack.c.l.b16 %v3829_v16 }
 0x2dd   : > { %v2610_v36 = vor.u32 %v2609_v53, %v2608_v2  ;;  %v8111_v48 = vshrl.u32 %v7077_v19, 16  ;;  %v2620_v55 = vrot.slane %v2618_v9, 5  ;;  %v8110_v49 = vshll.u32 %v7077_v19, 16  ;;  %v5801_v2 = vld [vmem:[%s8099_s3 + $0x120] sm:$0xff] }
 0x2de   : > { %v2615_v26 = vor.u32 %v2614_v46, %v2612_v47  ;;  %v3979_v17 = vpack.c.b16 %v3965_v7, %v3964_v54  ;;  %v8107_v58 = vshrl.u32 %v7083_v27, 16  ;;  %v5251_v40 = vrot.slane %v2737_v59, 11  ;;  %v2264_v9 = vld [vmem:[#allocation2 + $0x40] sm:$0x8]  ;;  %3675 = vmatpush.bf16.msrb.mxu2 %v5801_v2 }
 0x2df   : > { %v2611_v45 = vrot.slane %v2610_v36, 4  ;;  %v2744_v3 = vrot.slane %v8111_v48, 7  ;;  %v2337_v54 = vshrl.u32 %v2198_v63, 16  ;;  %v2344_v39 = vrot.slane %v2342_v22, 7  ;;  %v5777_v36 = vld [vmem:[%s8099_s3 + $0x60] sm:$0xff] }
 0x2e0   : > { %3073 = vmatmul.bf16.gmra.mxu1 %v2885_v56  ;;  %v2616_v51 = vrot.slane %v2615_v26, 4  ;;  %v5809_v56 = vld [vmem:[%s8099_s3 + $0x160] sm:$0xff]  ;;  %v8115_v8 = vshrl.u32 %v7150_v28, 16 }
 0x2e1   : > { %3122 = vmatmul.bf16.gmra.mxu2 %v2917_v12  ;;  %v2753_v12 = vrot.slane %v8107_v58, 7  ;;  %v2613_v16 = vsel %vm6352_vm11, %v2611_v45, %v2612_v47  ;;  %v2747_v46 = vor.u32 %v8110_v49, %v2744_v3  ;;  %v2749_v7 = vrot.slane %v2744_v3, 4  ;;  %3724 = vmatpush.bf16.msrb.mxu3 %v5809_v56  ;;  %v7110_v63 = vld [vmem:[#allocation2 + $0x44] sm:$0xf]  ;;  %v7114_v3 = vld [vmem:[#allocation2 + $0x48] sm:$0xf] }
 0x2e2   : > { %3267 = vmatmul.bf16.gmra.mxu3 %v2485_v23  ;;  %v8109_v23 = vshll.u32 %v7083_v27, 16  ;;  %v2621_v53 = vsel %vm6352_vm11, %v2616_v51, %v2620_v55  ;;  %v2872_v26 = vunpack.c.l.b16 %v2613_v16  ;;  %v5211_v47 = vrot.slane %v2337_v54, 11  ;;  %8208 = vst [vmem:[#allocation16_spill] sm:$0xff] %v7114_v3  ;;  %3306 = vmatpush.bf16.msrb.mxu1 %v5777_v36 }
 0x2e3   : > { %4183 = vmatmul.bf16.gmra.mxu0 %v3979_v17  ;;  %v2873_v59 = vunpack.c.l.b16 %v2621_v53  ;;  %v2748_v17 = vsel %vm6902_vm13, %v5251_v40, %v2747_v46  ;;  %v2347_v55 = vor.u32 %v2345_v30, %v2344_v39  ;;  %v2349_v45 = vrot.slane %v2344_v39, 4  ;;  %v7123_v40 = vld [vmem:[#allocation2 + $0x34] sm:$0xf] }
 0x2e4   : > { %v2756_v22 = vor.u32 %v8109_v23, %v2753_v12  ;;  %v2353_v51 = vrot.slane %v2351_v5, 7  ;;  %v2904_v16 = vunpack.c.l.b16 %v2748_v17  ;;  %v3831_v53 = vshrl.u32 %v2264_v9, 16 }
 0x2e5   : > { %v2886_v2 = vpack.c.b16 %v2873_v59, %v2872_v26  ;;  %v2348_v12 = vsel %vm6902_vm13, %v5211_v47, %v2347_v55  ;;  %v8106_v30 = vshrl.u32 %v7110_v63, 16  ;;  %v8105_v46 = vshll.u32 %v7110_v63, 16  ;;  %v2219_v47 = vld [vmem:[#allocation2 + $0x3c] sm:$0x1] }
 0x2e6   : > { %v2757_v56 = vsel %vm6902_vm13, %v2749_v7, %v2756_v22  ;;  %v2356_v54 = vor.u32 %v2354_v44, %v2353_v51  ;;  %v2472_v5 = vunpack.c.l.b16 %v2348_v12  ;;  %v5483_v39 = vrot.slane %v3831_v53, 11  ;;  %v7127_v7 = vld [vmem:[#allocation2 + $0x38] sm:$0xf] }
 0x2e7   : > { %v2905_v1 = vunpack.c.l.b16 %v2757_v56  ;;  %v8104_v36 = vshrl.u32 %v7114_v3, 16  ;;  %v3838_v21 = vrot.slane %v8106_v30, 7  ;;  %v8108_v44 = vshll.u32 %v7114_v3, 16  ;;  %v2213_v3 = vld [vmem:[#allocation2 + $0x70] sm:$0x8] }
 0x2e8   : > { %v2357_v26 = vsel %vm6902_vm13, %v2349_v45, %v2356_v54  ;;  %v2364_v17 = vshrl.u32 %v7123_v40, 16  ;;  %v2367_v55 = vshll.u32 %v7123_v40, 16  ;;  %v2373_v45 = vshrl.u32 %v7127_v7, 16 }
 0x2e9   : > { %v2918_v9 = vpack.c.b16 %v2905_v1, %v2904_v16  ;;  %v2473_v59 = vunpack.c.l.b16 %v2357_v26  ;;  %v3847_v22 = vrot.slane %v8104_v36, 7  ;;  %v3841_v1 = vor.u32 %v8105_v46, %v3838_v21  ;;  %v2234_v16 = vld [vmem:[#allocation2 + $0x40] sm:$0x8]  ;;  %v7144_v36 = vld [vmem:[#allocation2 + $0x44] sm:$0xf] }
 0x2ea   : > { %v3843_v51 = vrot.slane %v3838_v21, 4  ;;  %v2376_v56 = vshll.u32 %v7127_v7, 16  ;;  %v2622_v54 = vrot.slane %v2364_v17, 4  ;;  %v2623_v26 = vrot.slane %v2367_v55, 5 }
 0x2eb   : > { %v2486_v53 = vpack.c.b16 %v2473_v59, %v2472_v5  ;;  %v3850_v12 = vor.u32 %v8108_v44, %v3847_v22  ;;  %v3842_v40 = vsel %vm6902_vm13, %v5483_v39, %v3841_v1  ;;  %v2628_v21 = vrot.slane %v2373_v45, 4 }
 0x2ec   : > { %v2626_v46 = vrot.slane %v2376_v56, 5  ;;  %v2632_v30 = vshll.u32 %v2219_v47, 16  ;;  %v3966_v59 = vunpack.c.l.b16 %v3842_v40  ;;  %v2624_v58 = vor.u32 %v2623_v26, %v2622_v54 }
 0x2ed   : > { %v3851_v5 = vsel %vm6902_vm13, %v3843_v51, %v3850_v12  ;;  %v2759_v22 = vshrl.u32 %v2234_v16, 16  ;;  %v8120_v48 = vshrl.u32 %v7144_v36, 16  ;;  %v8117_v47 = vshll.u32 %v7144_v36, 16 }
 0x2ee   : > { %v3967_v44 = vunpack.c.l.b16 %v3851_v5  ;;  %v2629_v23 = vor.u32 %v2628_v21, %v2626_v46  ;;  %v2634_v49 = vrot.slane %v2632_v30, 5  ;;  %v2625_v39 = vrot.slane %v2624_v58, 4  ;;  %v5800_v30 = vld [vmem:[%s8099_s3 + $0x118] sm:$0xff] }
 0x2ef   : > { %v5252_v1 = vrot.slane %v2759_v22, 11  ;;  %v2766_v16 = vrot.slane %v8120_v48, 7  ;;  %v8116_v12 = vshll.u32 %v7150_v28, 16  ;;  %v5808_v58 = vld [vmem:[%s8099_s3 + $0x158] sm:$0xff]  ;;  %3676 = vmatpush.bf16.msrb.mxu2 %v5800_v30 }
 0x2f0   : > { %3078 = vmatmul.bf16.gmra.mxu1 %v2886_v2  ;;  %v3980_v50 = vpack.c.b16 %v3967_v44, %v3966_v59  ;;  %v2630_v51 = vrot.slane %v2629_v23, 4  ;;  %v2627_v2 = vsel %vm6352_vm11, %v2625_v39, %v2626_v46  ;;  %v2359_v23 = vshrl.u32 %v2201_v42, 16  ;;  %v5776_v46 = vld [vmem:[%s8099_s3 + $0x58] sm:$0xff]  ;;  %v7188_v59 = vld [vmem:[#allocation2 + $0x54] sm:$0xf]  ;;  %3725 = vmatpush.bf16.msrb.mxu3 %v5808_v58 }
 0x2f1   : > { %3127 = vmatmul.bf16.gmra.mxu2 %v2918_v9  ;;  %v2775_v9 = vrot.slane %v8115_v8, 7  ;;  %v2366_v44 = vrot.slane %v2364_v17, 7  ;;  %v7172_v26 = vunpack.c.l.b16 %v2627_v2  ;;  %v2769_v40 = vor.u32 %v8117_v47, %v2766_v16  ;;  %v7182_v42 = vld [vmem:[%s8099_s3 + $0x1f8] sm:$0xff]  ;;  %8209 = vst [vmem:[#allocation17_spill] sm:$0xff] %v7188_v59  ;;  %3307 = vmatpush.bf16.msrb.mxu1 %v5776_v46  ;;  %v7198_v2 = vld [vmem:[%s8099_s3 + $0x1f0] sm:$0xff] }
 0x2f2   : > { %3272 = vmatmul.bf16.gmra.mxu3 %v2486_v53  ;;  %v2267_v53 = vld [vmem:[#allocation2 + $0x50] sm:$0x8]  ;;  %v2635_v54 = vsel %vm6352_vm11, %v2630_v51, %v2634_v49  ;;  %v2771_v21 = vrot.slane %v2766_v16, 4  ;;  %v5212_v17 = vrot.slane %v2359_v23, 11  ;;  %v2375_v51 = vrot.slane %v2373_v45, 7  ;;  %4219 = vmatpush.bf16.msra.mxu0 %v7182_v42 }
 0x2f3   : > { %4188 = vmatmul.bf16.gmra.mxu0 %v3980_v50  ;;  %v7184_v50 = vunpack.c.l.b16 %v2635_v54  ;;  %v2778_v49 = vor.u32 %v8116_v12, %v2775_v9  ;;  %v2369_v5 = vor.u32 %v2367_v55, %v2366_v44  ;;  %v2770_v22 = vsel %vm6902_vm13, %v5252_v1, %v2769_v40  ;;  %v7192_v16 = vld [vmem:[#allocation2 + $0x58] sm:$0xf]  ;;  %v7206_v9 = vld [vmem:[#allocation2 + $0x44] sm:$0xf]  ;;  %v7210_v40 = vld [vmem:[#allocation2 + $0x48] sm:$0xf] }
 0x2f4   : > { %v2371_v39 = vrot.slane %v2366_v44, 4  ;;  %8210 = vst [vmem:[#allocation18_spill] sm:$0xff] %v7192_v16  ;;  %v3853_v30 = vshrl.u32 %v2267_v53, 16  ;;  %v2906_v1 = vunpack.c.l.b16 %v2770_v22  ;;  %v2378_v44 = vor.u32 %v2376_v56, %v2375_v51  ;;  %v7224_v22 = vld [vmem:[%s8099_s3 + $0x1e8] sm:$0xff]  ;;  %v2237_v12 = vld [vmem:[#allocation2 + $0x50] sm:$0x8] }
 0x2f5   : > { %v2887_v55 = vpack.c.b16 %v7184_v50, %v7172_v26  ;;  %v2779_v58 = vsel %vm6902_vm13, %v2771_v21, %v2778_v49  ;;  %v2370_v45 = vsel %vm6902_vm13, %v5212_v17, %v2369_v5  ;;  %v8118_v46 = vshrl.u32 %v7188_v59, 16  ;;  %v2220_v49 = vld [vmem:[#allocation2 + $0x4c] sm:$0x1] }
 0x2f6   : > { %v2907_v23 = vunpack.c.l.b16 %v2779_v58  ;;  %v2474_v53 = vunpack.c.l.b16 %v2370_v45  ;;  %v5484_v54 = vrot.slane %v3853_v30, 11  ;;  %v8126_v26 = vshll.u32 %v7188_v59, 16  ;;  %4220 = vmatpush.bf16.msra.mxu0 %v7198_v2  ;;  %v2210_v59 = vld [vmem:[#allocation2 + $0x60] sm:$0x8] }
 0x2f7   : > { %v8119_v21 = vshrl.u32 %v7192_v16, 16  ;;  %v8125_v50 = vshll.u32 %v7192_v16, 16  ;;  %v2379_v5 = vsel %vm6902_vm13, %v2371_v39, %v2378_v44  ;;  %v2386_v7 = vshrl.u32 %v7206_v9, 16 }
 0x2f8   : > { %v2919_v17 = vpack.c.b16 %v2907_v23, %v2906_v1  ;;  %v2389_v56 = vshll.u32 %v7206_v9, 16  ;;  %v2475_v51 = vunpack.c.l.b16 %v2379_v5  ;;  %v3860_v30 = vrot.slane %v8118_v46, 7  ;;  %v7231_v1 = vld [vmem:[#allocation2 + $0x54] sm:$0xf] }
 0x2f9   : > { %v3869_v58 = vrot.slane %v8119_v21, 7  ;;  %v2395_v39 = vshrl.u32 %v7210_v40, 16  ;;  %v2398_v45 = vshll.u32 %v7210_v40, 16  ;;  %v2636_v23 = vrot.slane %v2386_v7, 4 }
 0x2fa   : > { %v2637_v44 = vrot.slane %v2389_v56, 5  ;;  %v2646_v8 = vshll.u32 %v2220_v49, 16  ;;  %v2487_v47 = vpack.c.b16 %v2475_v51, %v2474_v53  ;;  %v3863_v5 = vor.u32 %v8126_v26, %v3860_v30  ;;  %4221 = vmatpush.bf16.msra.mxu0 %v7224_v22 }
 0x2fb   : > { %v3865_v46 = vrot.slane %v3860_v30, 4  ;;  %v3872_v21 = vor.u32 %v8125_v50, %v3869_v58  ;;  %v2640_v10 = vrot.slane %v2398_v45, 5  ;;  %v2642_v41 = vrot.slane %v2395_v39, 4 }
 0x2fc   : > { %v2638_v48 = vor.u32 %v2637_v44, %v2636_v23  ;;  %v2648_v25 = vrot.slane %v2646_v8, 5  ;;  %v3864_v53 = vsel %vm6902_vm13, %v5484_v54, %v3863_v5  ;;  %v2781_v51 = vshrl.u32 %v2237_v12, 16  ;;  %v2204_v5 = vld [vmem:[#allocation2 + $0x40] sm:$0x8] }
 0x2fd   : > { %v3873_v49 = vsel %vm6902_vm13, %v3865_v46, %v3872_v21  ;;  %v8132_v30 = vshrl.u32 %v7231_v1, 16  ;;  %v3968_v58 = vunpack.c.l.b16 %v3864_v53  ;;  %v2643_v50 = vor.u32 %v2642_v41, %v2640_v10  ;;  %v2270_v41 = vld [vmem:[#allocation2 + $0x60] sm:$0x8] }
 0x2fe   : > { %v3969_v23 = vunpack.c.l.b16 %v3873_v49  ;;  %v2639_v44 = vrot.slane %v2638_v48, 4  ;;  %v5253_v8 = vrot.slane %v2781_v51, 11  ;;  %v8129_v15 = vshll.u32 %v7231_v1, 16 }
 0x2ff   : > { %v2788_v26 = vrot.slane %v8132_v30, 7  ;;  %v8128_v54 = vshrl.u32 %v7242_v57, 16  ;;  %v2644_v21 = vrot.slane %v2643_v50, 4  ;;  %v8131_v48 = vshll.u32 %v7242_v57, 16 }
 0x300   : > { %3083 = vmatmul.bf16.gmra.mxu1 %v2887_v55  ;;  %v3981_v46 = vpack.c.b16 %v3969_v23, %v3968_v58  ;;  %v2641_v12 = vsel %vm6352_vm11, %v2639_v44, %v2640_v10  ;;  %v5799_v55 = vld [vmem:[%s8099_s3 + $0x110] sm:$0xff]  ;;  %v2381_v51 = vshrl.u32 %v2204_v5, 16  ;;  %v2388_v58 = vrot.slane %v2386_v7, 7  ;;  %v7274_v44 = vld [vmem:[%s8099_s3 + $0x1e0] sm:$0xff] }
 0x301   : > { %3132 = vmatmul.bf16.gmra.mxu2 %v2919_v17  ;;  %v5807_v17 = vld [vmem:[%s8099_s3 + $0x150] sm:$0xff]  ;;  %v7263_v53 = vunpack.c.l.b16 %v2641_v12  ;;  %v2793_v49 = vrot.slane %v2788_v26, 4  ;;  %v2797_v10 = vrot.slane %v8128_v54, 7  ;;  %v2649_v50 = vsel %vm6352_vm11, %v2644_v21, %v2648_v25  ;;  %v7285_v7 = vld [vmem:[#allocation2 + $0x64] sm:$0xf]  ;;  %4222 = vmatpush.bf16.msra.mxu0 %v7274_v44 }
 0x302   : > { %3277 = vmatmul.bf16.gmra.mxu3 %v2487_v47  ;;  %v2791_v47 = vor.u32 %v8129_v15, %v2788_v26  ;;  %v2397_v23 = vrot.slane %v2395_v39, 7  ;;  %3677 = vmatpush.bf16.msrb.mxu2 %v5799_v55  ;;  %v5775_v26 = vld [vmem:[%s8099_s3 + $0x50] sm:$0xff]  ;;  %v7279_v12 = vunpack.c.l.b16 %v2649_v50  ;;  %8211 = vst [vmem:[#allocation19_spill] sm:$0xff] %v7285_v7  ;;  %v3875_v39 = vshrl.u32 %v2270_v41, 16  ;;  %v7289_v15 = vld [vmem:[#allocation2 + $0x68] sm:$0xf] }
 0x303   : > { %4193 = vmatmul.bf16.gmra.mxu0 %v3981_v46  ;;  %v2800_v25 = vor.u32 %v8131_v48, %v2797_v10  ;;  %3726 = vmatpush.bf16.msrb.mxu3 %v5807_v17  ;;  %v5213_v21 = vrot.slane %v2381_v51, 11  ;;  %v2391_v55 = vor.u32 %v2389_v56, %v2388_v58  ;;  %v2393_v54 = vrot.slane %v2388_v58, 4  ;;  %8212 = vst [vmem:[#allocation20_spill] sm:$0xff] %v7289_v15 }
 0x304   : > { %v2792_v46 = vsel %vm6902_vm13, %v5253_v8, %v2791_v47  ;;  %3308 = vmatpush.bf16.msrb.mxu1 %v5775_v26  ;;  %v7295_v8 = vld [vmem:[%s8099_s3 + $0x1d8] sm:$0xff]  ;;  %v2888_v41 = vpack.c.b16 %v7279_v12, %v7263_v53  ;;  %v2400_v9 = vor.u32 %v2398_v45, %v2397_v23  ;;  %v5485_v56 = vrot.slane %v3875_v39, 11  ;;  %v7303_v47 = vld [vmem:[#allocation2 + $0x54] sm:$0xf] }
 0x305   : > { %v2908_v5 = vunpack.c.l.b16 %v2792_v46  ;;  %v2801_v17 = vsel %vm6902_vm13, %v2793_v49, %v2800_v25  ;;  %v2392_v50 = vsel %vm6902_vm13, %v5213_v21, %v2391_v55  ;;  %v8130_v51 = vshrl.u32 %v7285_v7, 16  ;;  %v7309_v26 = vld [vmem:[#allocation2 + $0x58] sm:$0xf]  ;;  %v2221_v23 = vld [vmem:[#allocation2 + $0x5c] sm:$0x1]  ;;  %4223 = vmatpush.bf16.msra.mxu0 %v7295_v8 }
 0x306   : > { %v2909_v10 = vunpack.c.l.b16 %v2801_v17  ;;  %v8139_v58 = vshll.u32 %v7285_v7, 16  ;;  %v2401_v53 = vsel %vm6902_vm13, %v2393_v54, %v2400_v9  ;;  %v2476_v49 = vunpack.c.l.b16 %v2392_v50  ;;  %v7318_v21 = vld [vmem:[#allocation2 + $0x64] sm:$0xf]  ;;  %v7324_v54 = vld [vmem:[%s8099_s3 + $0x1d0] sm:$0xff] }
 0x307   : > { %v8134_v40 = vshrl.u32 %v7289_v15, 16  ;;  %v8138_v45 = vshll.u32 %v7289_v15, 16  ;;  %v2477_v46 = vunpack.c.l.b16 %v2401_v53  ;;  %v3882_v25 = vrot.slane %v8130_v51, 7 }
 0x308   : > { %v2920_v12 = vpack.c.b16 %v2909_v10, %v2908_v5  ;;  %v2408_v39 = vshrl.u32 %v7303_v47, 16  ;;  %v8141_v5 = vshll.u32 %v7303_v47, 16  ;;  %v2417_v17 = vshrl.u32 %v7309_v26, 16  ;;  %v2240_v10 = vld [vmem:[#allocation2 + $0x60] sm:$0x8] }
 0x309   : > { %v3891_v55 = vrot.slane %v8134_v40, 7  ;;  %v8140_v9 = vshll.u32 %v7309_v26, 16  ;;  %v2488_v50 = vpack.c.b16 %v2477_v46, %v2476_v49  ;;  %v3885_v53 = vor.u32 %v8139_v58, %v3882_v25  ;;  %v7341_v49 = vld [vmem:[#allocation2 + $0x68] sm:$0xf]  ;;  %4224 = vmatpush.bf16.msra.mxu0 %v7324_v54 }
 0x30a   : > { %v3887_v51 = vrot.slane %v3882_v25, 4  ;;  %v2650_v48 = vrot.slane %v2408_v39, 4  ;;  %v2651_v24 = vrot.slane %v8141_v5, 5  ;;  %v2656_v4 = vrot.slane %v2417_v17, 4 }
 0x30b   : > { %v3894_v30 = vor.u32 %v8138_v45, %v3891_v55  ;;  %v2654_v40 = vrot.slane %v8140_v9, 5  ;;  %v3886_v43 = vsel %vm6902_vm13, %v5485_v56, %v3885_v53  ;;  %v2660_v32 = vshll.u32 %v2221_v23, 16  ;;  %v7348_v55 = vld [vmem:[%s8099_s3 + $0x1c8] sm:$0xff]  ;;  %v2207_v56 = vld [vmem:[#allocation2 + $0x50] sm:$0x8] }
 0x30c   : > { %v2803_v46 = vshrl.u32 %v2240_v10, 16  ;;  %v8156_v25 = vshrl.u32 %v7318_v21, 16  ;;  %v3970_v58 = vunpack.c.l.b16 %v3886_v43  ;;  %v2652_v9 = vor.u32 %v2651_v24, %v2650_v48  ;;  %v5806_v48 = vld [vmem:[%s8099_s3 + $0x148] sm:$0xff] }
 0x30d   : > { %v3895_v45 = vsel %vm6902_vm13, %v3887_v51, %v3894_v30  ;;  %v2657_v5 = vor.u32 %v2656_v4, %v2654_v40  ;;  %v2662_v53 = vrot.slane %v2660_v32, 5  ;;  %v8155_v15 = vshll.u32 %v7318_v21, 16  ;;  %4225 = vmatpush.bf16.msra.mxu0 %v7348_v55  ;;  %v5798_v32 = vld [vmem:[%s8099_s3 + $0x108] sm:$0xff]  ;;  %3727 = vmatpush.bf16.msrb.mxu3 %v5806_v48  ;;  %v7407_v48 = vld [vmem:[#allocation2 + $0x64] sm:$0xf] }
 0x30e   : > { %v3971_v23 = vunpack.c.l.b16 %v3895_v45  ;;  %v5254_v35 = vrot.slane %v2803_v46, 11  ;;  %v2810_v10 = vrot.slane %v8156_v25, 7  ;;  %v2653_v34 = vrot.slane %v2652_v9, 4  ;;  %3678 = vmatpush.bf16.msrb.mxu2 %v5798_v32  ;;  %v7446_v25 = vld [vmem:[#allocation2 + $0x78] sm:$0xf] }
 0x30f   : > { %v2658_v52 = vrot.slane %v2657_v5, 4  ;;  %v8150_v7 = vshrl.u32 %v7341_v49, 16  ;;  %v8154_v4 = vshll.u32 %v7341_v49, 16  ;;  %v2403_v30 = vshrl.u32 %v2207_v56, 16 }
 0x310   : > { %3088 = vmatmul.bf16.gmra.mxu1 %v2888_v41  ;;  %v3982_v43 = vpack.c.b16 %v3971_v23, %v3970_v58  ;;  %v2815_v24 = vrot.slane %v2810_v10, 4  ;;  %v2655_v41 = vsel %vm6352_vm11, %v2653_v34, %v2654_v40  ;;  %v2813_v58 = vor.u32 %v8155_v15, %v2810_v10  ;;  %v5774_v34 = vld [vmem:[%s8099_s3 + $0x48] sm:$0xff]  ;;  %v7389_v40 = vld [vmem:[%s8099_s3 + $0x238] sm:$0xff] }
 0x311   : > { %3137 = vmatmul.bf16.gmra.mxu2 %v2920_v12  ;;  %v2663_v51 = vsel %vm6352_vm11, %v2658_v52, %v2662_v53  ;;  %v2819_v45 = vrot.slane %v8150_v7, 7  ;;  %v7372_v12 = vld [vmem:[#allocation2 + $0x74] sm:$0xf]  ;;  %v7374_v5 = vunpack.c.l.b16 %v2655_v41  ;;  %v2410_v46 = vrot.slane %v2408_v39, 7  ;;  %v7381_v52 = vld [vmem:[%s8099_s3 + $0x1c0] sm:$0xff]  ;;  %3309 = vmatpush.bf16.msrb.mxu1 %v5774_v34 }
 0x312   : > { %3282 = vmatmul.bf16.gmra.mxu3 %v2488_v50  ;;  %8213 = vst [vmem:[#allocation21_spill] sm:$0xff] %v7372_v12  ;;  %v7376_v9 = vunpack.c.l.b16 %v2663_v51  ;;  %v5214_v50 = vrot.slane %v2403_v30, 11  ;;  %v2814_v56 = vsel %vm6902_vm13, %v5254_v35, %v2813_v58  ;;  %v2419_v23 = vrot.slane %v2417_v17, 7  ;;  %v7395_v53 = vld [vmem:[#allocation2 + $0x78] sm:$0xf]  ;;  %4226 = vmatpush.bf16.msra.mxu0 %v7381_v52 }
 0x313   : > { %4198 = vmatmul.bf16.gmra.mxu0 %v3982_v43  ;;  %v2822_v39 = vor.u32 %v8154_v4, %v2819_v45  ;;  %8214 = vst [vmem:[#allocation22_spill] sm:$0xff] %v7395_v53  ;;  %v3897_v10 = vshrl.u32 %v2273_v14, 16  ;;  %v2910_v30 = vunpack.c.l.b16 %v2814_v56  ;;  %v8215_v32 = vshll.u32 %v7303_v47, 16  ;;  %v7413_v47 = vld [vmem:[%s8099_s3 + $0x230] sm:$0xff] }
 0x314   : > { %v2889_v43 = vpack.c.b16 %v7376_v9, %v7374_v5  ;;  %v2415_v51 = vrot.slane %v2410_v46, 4  ;;  %v8216_v17 = vshll.u32 %v7309_v26, 16  ;;  %v8153_v14 = vshrl.u32 %v7372_v12, 16 }
 0x315   : > { %v2413_v41 = vor.u32 %v8215_v32, %v2410_v46  ;;  %v2823_v35 = vsel %vm6902_vm13, %v2815_v24, %v2822_v39  ;;  %v5486_v45 = vrot.slane %v3897_v10, 11  ;;  %v8152_v24 = vshll.u32 %v7372_v12, 16  ;;  %v7419_v46 = vld [vmem:[#allocation2 + $0x68] sm:$0xf] }
 0x316   : > { %v2422_v58 = vor.u32 %v8216_v17, %v2419_v23  ;;  %4556 = vmatpush.bf16.msrb.mxu0 %v7389_v40  ;;  %v2911_v5 = vunpack.c.l.b16 %v2823_v35  ;;  %v8151_v26 = vshrl.u32 %v7395_v53, 16  ;;  %v3904_v39 = vrot.slane %v8153_v14, 7 }
 0x317   : > { %v2414_v9 = vsel %vm6902_vm13, %v5214_v50, %v2413_v41  ;;  %v8161_v23 = vshll.u32 %v7395_v53, 16  ;;  %v2222_v41 = vld [vmem:[#allocation2 + $0x6c] sm:$0x1]  ;;  %v2430_v35 = vshrl.u32 %v7407_v48, 16  ;;  %v8167_v37 = vshrl.u32 %v7446_v25, 16 }
 0x318   : > { %v2423_v34 = vsel %vm6902_vm13, %v2415_v51, %v2422_v58  ;;  %v2478_v56 = vunpack.c.l.b16 %v2414_v9  ;;  %v2921_v10 = vpack.c.b16 %v2911_v5, %v2910_v30  ;;  %v3913_v50 = vrot.slane %v8151_v26, 7  ;;  %v2243_v9 = vld [vmem:[#allocation2 + $0x70] sm:$0x8]  ;;  %v7437_v30 = vld [vmem:[%s8099_s3 + $0x228] sm:$0xff] }
 0x319   : > { %v2479_v32 = vunpack.c.l.b16 %v2423_v34  ;;  %v3907_v17 = vor.u32 %v8152_v24, %v3904_v39  ;;  %v3909_v7 = vrot.slane %v3904_v39, 4  ;;  %v2433_v51 = vshll.u32 %v7407_v48, 16  ;;  %v7442_v39 = vld [vmem:[#allocation2 + $0x74] sm:$0xf] }
 0x31a   : > { %v2439_v58 = vshrl.u32 %v7419_v46, 16  ;;  %4557 = vmatpush.bf16.msrb.mxu0 %v7413_v47  ;;  %v3916_v34 = vor.u32 %v8161_v23, %v3913_v50  ;;  %v2442_v26 = vshll.u32 %v7419_v46, 16  ;;  %v2664_v24 = vrot.slane %v2430_v35, 4 }
 0x31b   : > { %v2489_v5 = vpack.c.b16 %v2479_v32, %v2478_v56  ;;  %v3908_v48 = vsel %vm6902_vm13, %v5486_v45, %v3907_v17  ;;  %v2665_v14 = vrot.slane %v2433_v51, 5  ;;  %v2674_v15 = vshll.u32 %v2222_v41, 16 }
 0x31c   : > { %v2670_v4 = vrot.slane %v2439_v58, 4  ;;  %v3917_v12 = vsel %vm6902_vm13, %v3909_v7, %v3916_v34  ;;  %v3972_v56 = vunpack.c.l.b16 %v3908_v48  ;;  %v2668_v32 = vrot.slane %v2442_v26, 5 }
 0x31d   : > { %v2825_v53 = vshrl.u32 %v2243_v9, 16  ;;  %v3973_v50 = vunpack.c.l.b16 %v3917_v12  ;;  %v2666_v23 = vor.u32 %v2665_v14, %v2664_v24  ;;  %v2676_v46 = vrot.slane %v2674_v15, 5  ;;  %v5797_v9 = vld [vmem:[%s8099_s3 + $0x100] sm:$0xff] }
 0x31e   : > { %v8173_v16 = vshrl.u32 %v7442_v39, 16  ;;  %4558 = vmatpush.bf16.msrb.mxu0 %v7437_v30  ;;  %v2671_v45 = vor.u32 %v2670_v4, %v2668_v32  ;;  %v8170_v41 = vshll.u32 %v7442_v39, 16  ;;  %v8169_v15 = vshll.u32 %v7446_v25, 16  ;;  %3679 = vmatpush.bf16.msrb.mxu2 %v5797_v9 }
 0x31f   : > { %v5255_v17 = vrot.slane %v2825_v53, 11  ;;  %v3983_v7 = vpack.c.b16 %v3973_v50, %v3972_v56  ;;  %v2667_v34 = vrot.slane %v2666_v23, 4  ;;  %v2841_v24 = vrot.slane %v8167_v37, 7  ;;  %v2276_v56 = vld [vmem:[#allocation2 + $0x80] sm:$0x8] }
 0x320   : > { %3093 = vmatmul.bf16.gmra.mxu1 %v2889_v43  ;;  %v2832_v12 = vrot.slane %v8173_v16, 7  ;;  %v2672_v14 = vrot.slane %v2671_v45, 4  ;;  %v2425_v4 = vshrl.u32 %v2210_v59, 16  ;;  %v2432_v53 = vrot.slane %v2430_v35, 7  ;;  %v5805_v43 = vld [vmem:[%s8099_s3 + $0x140] sm:$0xff] }
 0x321   : > { %3142 = vmatmul.bf16.gmra.mxu2 %v2921_v10  ;;  %v2669_v23 = vsel %vm6352_vm11, %v2667_v34, %v2668_v32  ;;  %v2441_v48 = vrot.slane %v2439_v58, 7  ;;  %v7472_v59 = vld [vmem:[%s8099_s3 + $0x220] sm:$0xff]  ;;  %v2844_v32 = vor.u32 %v8169_v15, %v2841_v24  ;;  %3728 = vmatpush.bf16.msrb.mxu3 %v5805_v43 }
 0x322   : > { %3287 = vmatmul.bf16.gmra.mxu3 %v2489_v5  ;;  %v2835_v10 = vor.u32 %v8170_v41, %v2832_v12  ;;  %v2837_v5 = vrot.slane %v2832_v12, 4  ;;  %v2677_v35 = vsel %vm6352_vm11, %v2672_v14, %v2676_v46  ;;  %v7476_v50 = vunpack.c.l.b16 %v2669_v23  ;;  %v7480_v34 = vld [vmem:[#allocation2 + $0x84] sm:$0xf]  ;;  %4559 = vmatpush.bf16.msrb.mxu0 %v7472_v59  ;;  %v7493_v14 = vld [vmem:[%s8099_s3 + $0x218] sm:$0xff]  ;;  %v7497_v23 = vld [vmem:[#allocation2 + $0x88] sm:$0xf] }
 0x323   : > { %4203 = vmatmul.bf16.gmra.mxu0 %v3983_v7  ;;  %v5215_v45 = vrot.slane %v2425_v4, 11  ;;  %8217 = vst [vmem:[#allocation23_spill] sm:$0xff] %v7480_v34  ;;  %v5773_v58 = vld [vmem:[%s8099_s3 + $0x40] sm:$0xff]  ;;  %v7485_v12 = vunpack.c.l.b16 %v2677_v35  ;;  %v2435_v37 = vor.u32 %v2433_v51, %v2432_v53  ;;  %v2437_v46 = vrot.slane %v2432_v53, 4  ;;  %5901 = vmatpush.bf16.msra.mxu2 %v7389_v40 }
 0x324   : > { %v2836_v7 = vsel %vm6902_vm13, %v5255_v17, %v2835_v10  ;;  %v2845_v24 = vsel %vm6902_vm13, %v2837_v5, %v2844_v32  ;;  %v2444_v9 = vor.u32 %v2442_v26, %v2441_v48  ;;  %8218 = vst [vmem:[#allocation24_spill] sm:$0xff] %v7497_v23  ;;  %v3919_v35 = vshrl.u32 %v2276_v56, 16  ;;  %3310 = vmatpush.bf16.msrb.mxu1 %v5773_v58  ;;  %v7505_v10 = vld [vmem:[#allocation2 + $0x74] sm:$0xf]  ;;  %v7507_v5 = vld [vmem:[#allocation2 + $0x78] sm:$0xf] }
 0x325   : > { %v2912_v4 = vunpack.c.l.b16 %v2836_v7  ;;  %v2890_v51 = vpack.c.b16 %v7485_v12, %v7476_v50  ;;  %v2913_v17 = vunpack.c.l.b16 %v2845_v24  ;;  %v2436_v53 = vsel %vm6902_vm13, %v5215_v45, %v2435_v37  ;;  %v2223_v58 = vld [vmem:[#allocation2 + $0x7c] sm:$0x1] }
 0x326   : > { %v8168_v43 = vshrl.u32 %v7480_v34, 16  ;;  %v2445_v26 = vsel %vm6902_vm13, %v2437_v46, %v2444_v9  ;;  %v2480_v48 = vunpack.c.l.b16 %v2436_v53  ;;  %v5487_v40 = vrot.slane %v3919_v35, 11  ;;  %4560 = vmatpush.bf16.msrb.mxu0 %v7493_v14 }
 0x327   : > { %v8171_v56 = vshll.u32 %v7480_v34, 16  ;;  %v2922_v50 = vpack.c.b16 %v2913_v17, %v2912_v4  ;;  %v2481_v32 = vunpack.c.l.b16 %v2445_v26  ;;  %v8172_v45 = vshrl.u32 %v7497_v23, 16  ;;  %v2246_v4 = vld [vmem:[#allocation2 + $0x80] sm:$0x8]  ;;  %5902 = vmatpush.bf16.msra.mxu2 %v7413_v47  ;;  %v7531_v26 = vld [vmem:[#allocation2 + $0x84] sm:$0xf] }
 0x328   : > { %5893 = vmatpush.bf16.msra.mxu1 %v7182_v42  ;;  %v3926_v37 = vrot.slane %v8168_v43, 7  ;;  %v7520_v42 = vld [vmem:[%s8099_s3 + $0x210] sm:$0xff]  ;;  %v8178_v12 = vshll.u32 %v7497_v23, 16  ;;  %v2452_v7 = vshrl.u32 %v7505_v10, 16  ;;  %v2455_v46 = vshll.u32 %v7505_v10, 16 }
 0x329   : > { %v2461_v24 = vshrl.u32 %v7507_v5, 16  ;;  %v2490_v9 = vpack.c.b16 %v2481_v32, %v2480_v48  ;;  %v3935_v53 = vrot.slane %v8172_v45, 7  ;;  %v8179_v43 = vshll.u32 %v7507_v5, 16 }
 0x32a   : > { %v3929_v35 = vor.u32 %v8171_v56, %v3926_v37  ;;  %v3931_v17 = vrot.slane %v3926_v37, 4  ;;  %v2678_v10 = vrot.slane %v2452_v7, 4  ;;  %v2679_v15 = vrot.slane %v2455_v46, 5  ;;  %v7539_v37 = vld [vmem:[#allocation2 + $0x88] sm:$0xf]  ;;  %4561 = vmatpush.bf16.msrb.mxu0 %v7520_v42 }
 0x32b   : > { %v2684_v41 = vrot.slane %v2461_v24, 4  ;;  %v3938_v48 = vor.u32 %v8178_v12, %v3935_v53  ;;  %v2688_v32 = vshll.u32 %v2223_v58, 16  ;;  %v2847_v56 = vshrl.u32 %v2246_v4, 16  ;;  %5903 = vmatpush.bf16.msra.mxu2 %v7437_v30 }
 0x32c   : > { %5894 = vmatpush.bf16.msra.mxu1 %v7198_v2  ;;  %v3930_v47 = vsel %vm6902_vm13, %v5487_v40, %v3929_v35  ;;  %v2680_v16 = vor.u32 %v2679_v15, %v2678_v10  ;;  %v2682_v2 = vrot.slane %v8179_v43, 5  ;;  %v2852_v34 = vshrl.u32 %v7531_v26, 16  ;;  %v7548_v40 = vld [vmem:[%s8099_s3 + $0x208] sm:$0xff] }
 0x32d   : > { %v3974_v45 = vunpack.c.l.b16 %v3930_v47  ;;  %v3939_v58 = vsel %vm6902_vm13, %v3931_v17, %v3938_v48  ;;  %v2690_v4 = vrot.slane %v2688_v32, 5  ;;  %v5256_v35 = vrot.slane %v2847_v56, 11  ;;  %v7561_v32 = vld [vmem:[#allocation2 + $0x94] sm:$0xf] }
 0x32e   : > { %v2855_v15 = vshll.u32 %v7531_v26, 16  ;;  %v3975_v53 = vunpack.c.l.b16 %v3939_v58  ;;  %v2681_v10 = vrot.slane %v2680_v16, 4  ;;  %v2685_v47 = vor.u32 %v2684_v41, %v2682_v2  ;;  %4562 = vmatpush.bf16.msrb.mxu0 %v7548_v40  ;;  %v7567_v16 = vld [vmem:[%s8099_s3 + $0x200] sm:$0xff] }
 0x32f   : > { %v2854_v12 = vrot.slane %v2852_v34, 7  ;;  %v8182_v43 = vshrl.u32 %v7539_v37, 16  ;;  %v2864_v30 = vshll.u32 %v7539_v37, 16  ;;  %v2447_v23 = vshrl.u32 %v2213_v3, 16  ;;  %5904 = vmatpush.bf16.msra.mxu2 %v7472_v59 }
 0x330   : > { %5895 = vmatpush.bf16.msra.mxu1 %v7224_v22  ;;  %v2454_v17 = vrot.slane %v2452_v7, 7  ;;  %v3984_v56 = vpack.c.b16 %v3975_v53, %v3974_v45  ;;  %v2686_v48 = vrot.slane %v2685_v47, 4  ;;  %v7574_v45 = vld [vmem:[%s8099_s3 + $0x278] sm:$0xff]  ;;  %v2683_v7 = vsel %vm6352_vm11, %v2681_v10, %v2682_v2 }
 0x331   : > { %3098 = vmatmul.bf16.gmra.mxu1 %v2890_v51  ;;  %3147 = vmatmul.bf16.gmra.mxu2 %v2922_v50  ;;  %v2857_v22 = vor.u32 %v2855_v15, %v2854_v12  ;;  %v2859_v41 = vrot.slane %v2854_v12, 4  ;;  %v2863_v3 = vrot.slane %v8182_v43, 7  ;;  %v5216_v51 = vrot.slane %v2447_v23, 11  ;;  %v2279_v50 = vld [vmem:[#allocation2 + $0x90] sm:$0x8] }
 0x332   : > { %3292 = vmatmul.bf16.gmra.mxu3 %v2490_v9  ;;  %v2691_v12 = vsel %vm6352_vm11, %v2686_v48, %v2690_v4  ;;  %v2457_v9 = vor.u32 %v2455_v46, %v2454_v17  ;;  %v2459_v53 = vrot.slane %v2454_v17, 4  ;;  %v2463_v47 = vrot.slane %v2461_v24, 7  ;;  %v7586_v43 = vld [vmem:[#allocation2 + $0x98] sm:$0xf]  ;;  %4563 = vmatpush.bf16.msrb.mxu0 %v7567_v16 }
 0x333   : > { %4208 = vmatmul.bf16.gmra.mxu0 %v3984_v56  ;;  %v2858_v23 = vsel %vm6902_vm13, %v5256_v35, %v2857_v22  ;;  %v2866_v58 = vor.u32 %v2864_v30, %v2863_v3  ;;  %5909 = vmatpush.bf16.msra.mxu3 %v7574_v45  ;;  %v3941_v59 = vshrl.u32 %v2279_v50, 16  ;;  %v8186_v2 = vshrl.u32 %v7561_v32, 16  ;;  %v7601_v56 = vld [vmem:[%s8099_s3 + $0x270] sm:$0xff] }
 0x334   : > { %5896 = vmatpush.bf16.msra.mxu1 %v7274_v44  ;;  %v2458_v44 = vsel %vm6902_vm13, %v5216_v51, %v2457_v9  ;;  %v8184_v46 = vshll.u32 %v7561_v32, 16  ;;  %v2882_v4 = vunpack.c.l.b16 %v2683_v7  ;;  %v2883_v35 = vunpack.c.l.b16 %v2691_v12  ;;  %5905 = vmatpush.bf16.msra.mxu2 %v7493_v14 }
 0x335   : > { %v2867_v10 = vsel %vm6902_vm13, %v2859_v41, %v2866_v58  ;;  %v8219_v24 = vshll.u32 %v7507_v5, 16  ;;  %v2914_v48 = vunpack.c.l.b16 %v2858_v23  ;;  %v5488_v22 = vrot.slane %v3941_v59, 11 }
 0x336   : > { %v3948_v3 = vrot.slane %v8186_v2, 7  ;;  %v8183_v51 = vshrl.u32 %v7586_v43, 16  ;;  %v2915_v41 = vunpack.c.l.b16 %v2867_v10  ;;  %v2482_v50 = vunpack.c.l.b16 %v2458_v44 }
 0x337   : > { %v2466_v17 = vor.u32 %v8219_v24, %v2463_v47  ;;  %v8185_v7 = vshll.u32 %v7586_v43, 16  ;;  %5910 = vmatpush.bf16.msra.mxu3 %v7601_v56  ;;  %v8220_v14 = vshrl.u32 %v6879_v6, 16  ;;  %v8221_v23 = vshll.u32 %v6879_v6, 16 }
 0x338   : > { %5897 = vmatpush.bf16.msra.mxu1 %v7295_v8  ;;  %v3951_v8 = vor.u32 %v8184_v46, %v3948_v3  ;;  %v3953_v47 = vrot.slane %v3948_v3, 4  ;;  %v3957_v59 = vrot.slane %v8183_v51, 7  ;;  %v8223_v10 = vshrl.u32 %v6881_v60, 16  ;;  %5906 = vmatpush.bf16.msra.mxu2 %v7520_v42  ;;  %v2249_v3 = vld [vmem:[#allocation2 + $0x1c] sm:$0x1] }
 0x339   : > { %v2467_v5 = vsel %vm6902_vm13, %v2459_v53, %v2466_v17  ;;  %v3352_v9 = vrot.slane %v8220_v14, 4  ;;  %v3353_v58 = vrot.slane %v8221_v23, 5  ;;  %v8222_v53 = vshll.u32 %v6881_v60, 16  ;;  %v7627_v17 = vld [vmem:[%s8099_s3 + $0x268] sm:$0xff] }
 0x33a   : > { %v2483_v12 = vunpack.c.l.b16 %v2467_v5  ;;  %v3358_v24 = vrot.slane %v8223_v10, 4  ;;  %v3952_v6 = vsel %vm6902_vm13, %v5488_v22, %v3951_v8  ;;  %v2891_v5 = vpack.c.b16 %v2883_v35, %v2882_v4  ;;  %v7643_v4 = vld [vmem:[%s8099_s3 + $0x260] sm:$0xff] }
 0x33b   : > { %v3356_v44 = vrot.slane %v8222_v53, 5  ;;  %v2923_v14 = vpack.c.b16 %v2915_v41, %v2914_v48  ;;  %v3960_v23 = vor.u32 %v8185_v7, %v3957_v59  ;;  %5911 = vmatpush.bf16.msra.mxu3 %v7627_v17  ;;  %v3976_v53 = vunpack.c.l.b16 %v3952_v6  ;;  %v5741_v6 = vld [vmem:[#allocation2 + $0x4] sm:$0xff] }
 0x33c   : > { %5898 = vmatpush.bf16.msra.mxu1 %v7324_v54  ;;  %v2491_v60 = vpack.c.b16 %v2483_v12, %v2482_v50  ;;  %v3354_v51 = vor.u32 %v3353_v58, %v3352_v9  ;;  %v3362_v46 = vshll.u32 %v2249_v3, 16  ;;  %5907 = vmatpush.bf16.msra.mxu2 %v7548_v40  ;;  %v8226_v9 = vshll.u32 %v6996_v33, 16  ;;  %v5749_v3 = vld [vmem:[#allocation2 + $0x14] sm:$0xff] }
 0x33d   : > { %v3961_v10 = vsel %vm6902_vm13, %v3953_v47, %v3960_v23  ;;  %v3359_v42 = vor.u32 %v3358_v24, %v3356_v44  ;;  %v8227_v47 = vshrl.u32 %v6996_v33, 16  ;;  %v8228_v24 = vshll.u32 %v6922_v62, 16  ;;  %v7683_v33 = vld [vmem:[%s8099_s3 + $0x248] sm:$0xff] }
 0x33e   : > { %v3977_v54 = vunpack.c.l.b16 %v3961_v10  ;;  %v3355_v48 = vrot.slane %v3354_v51, 4  ;;  %v3364_v22 = vrot.slane %v3362_v46, 5  ;;  %v8224_v46 = vshrl.u32 %v6971_v20, 16 }
 0x33f   : > { %v3360_v13 = vrot.slane %v3359_v42, 4  ;;  %5912 = vmatpush.bf16.msra.mxu3 %v7643_v4  ;;  %v3370_v58 = vrot.slane %v8226_v9, 5  ;;  %v3372_v59 = vrot.slane %v8227_v47, 4  ;;  %v8230_v23 = vshll.u32 %v6930_v61, 16 }
 0x340   : > { %5899 = vmatpush.bf16.msra.mxu1 %v7348_v55  ;;  %v3985_v35 = vpack.c.b16 %v3977_v54, %v3976_v53  ;;  %5908 = vmatpush.bf16.msra.mxu2 %v7567_v16  ;;  %v7651_v55 = vld [vmem:[%s8099_s3 + $0x258] sm:$0xff]  ;;  %v3357_v40 = vsel %vm6352_vm11, %v3355_v48, %v3356_v44  ;;  %v3366_v41 = vrot.slane %v8224_v46, 4  ;;  %v8225_v16 = vshll.u32 %v6971_v20, 16  ;;  %v2250_v44 = vld [vmem:[#allocation2 + $0x2c] sm:$0x1] }
 0x341   : > { %3103 = vmatmul.bf16.gmra.mxu1 %v2891_v5  ;;  %3152 = vmatmul.bf16.gmra.mxu2 %v2923_v14  ;;  %v3365_v51 = vsel %vm6352_vm11, %v3360_v13, %v3364_v22  ;;  %v3512_v12 = vunpack.c.l.b16 %v3357_v40  ;;  %v4285_v20 = vrot.slane %v8228_v24, 5  ;;  %v8229_v5 = vshrl.u32 %v6922_v62, 16  ;;  %v2282_v22 = vld [vmem:[#allocation2 + $0x2c] sm:$0x1]  ;;  %v5757_v40 = vld [vmem:[#allocation2 + $0x24] sm:$0xff] }
 0x342   : > { %3297 = vmatmul.bf16.gmra.mxu3 %v2491_v60  ;;  %v3367_v50 = vrot.slane %v8225_v16, 5  ;;  %v3513_v8 = vunpack.c.l.b16 %v3365_v51  ;;  %v4288_v60 = vrot.slane %v8230_v23, 5  ;;  %v8231_v53 = vshrl.u32 %v6930_v61, 16  ;;  %v7691_v16 = vld [vmem:[%s8099_s3 + $0x240] sm:$0xff] }
 0x343   : > { %4213 = vmatmul.bf16.gmra.mxu0 %v3985_v35  ;;  %5913 = vmatpush.bf16.msra.mxu3 %v7651_v55  ;;  %v4284_v14 = vrot.slane %v8229_v5, 4  ;;  %v3373_v48 = vor.u32 %v3372_v59, %v3370_v58  ;;  %v3376_v13 = vshll.u32 %v2250_v44, 16  ;;  %v4294_v46 = vshll.u32 %v2282_v22, 16 }
 0x344   : > { %5900 = vmatpush.bf16.msra.mxu1 %v7381_v52  ;;  %v7665_v52 = vld [vmem:[%s8099_s3 + $0x250] sm:$0xff]  ;;  %v4290_v10 = vrot.slane %v8231_v53, 4  ;;  %v3528_v54 = vpack.c.b16 %v3513_v8, %v3512_v12  ;;  %v3368_v35 = vor.u32 %v3367_v50, %v3366_v41  ;;  %v8235_v22 = vshrl.u32 %v7083_v27, 16 }
 0x345   : > { %v4286_v61 = vor.u32 %v4285_v20, %v4284_v14  ;;  %v3374_v50 = vrot.slane %v3373_v48, 4  ;;  %v3378_v12 = vrot.slane %v3376_v13, 5  ;;  %v4296_v24 = vrot.slane %v4294_v46, 5 }
 0x346   : > { %v4291_v51 = vor.u32 %v4290_v10, %v4288_v60  ;;  %v3369_v41 = vrot.slane %v3368_v35, 4  ;;  %v8234_v48 = vshll.u32 %v7083_v27, 16 }
 0x347   : > { %5914 = vmatpush.bf16.msra.mxu3 %v7665_v52  ;;  %v4287_v59 = vrot.slane %v4286_v61, 4 }
 0x348   : > { %v4292_v44 = vrot.slane %v4291_v51, 4  ;;  %v3384_v13 = vrot.slane %v8234_v48, 5  ;;  %v8236_v48 = vshrl.u32 %v7144_v36, 16 }
 0x349   : > { %v4289_v53 = vsel %vm6352_vm11, %v4287_v59, %v4288_v60 }
 0x34a   : > { %v4297_v10 = vsel %vm6352_vm11, %v4292_v44, %v4296_v24  ;;  %v4396_v51 = vunpack.c.l.b16 %v4289_v53 }
 0x34b   : > { %5915 = vmatpush.bf16.msra.mxu3 %v7683_v33  ;;  %v4397_v46 = vunpack.c.l.b16 %v4297_v10 }
 0x34d   : > { %v3069_v42 = vpop.f32.mrf.mxu1  ;;  %v4412_v27 = vpack.c.b16 %v4397_v46, %v4396_v51  ;;  %v2252_v46 = vld [vmem:[#allocation2 + $0x4c] sm:$0x1] }
 0x34f   : > { %5916 = vmatpush.bf16.msra.mxu3 %v7691_v16 }
 0x350   : > { %v7686_v62 = vpop.f32.mrf.mxu0 }
 0x351   : > { %3311 = vmatmul.bf16.vlgmr.msrb.gmra.mxu1 %v5741_v6  ;;  %3680 = vmatmul.bf16.vlgmr.msrb.gmra.mxu2 %v5749_v3  ;;  %v3371_v6 = vsel %vm6352_vm11, %v3369_v41, %v3370_v58  ;;  %v3379_v3 = vsel %vm6352_vm11, %v3374_v50, %v3378_v12  ;;  %v5742_v50 = vld [vmem:[#allocation2 + $0x14] sm:$0xff] }
 0x352   : > { %3729 = vmatmul.bf16.vlgmr.msrb.gmra.mxu3 %v3528_v54  ;;  %v3514_v23 = vunpack.c.l.b16 %v3371_v6  ;;  %v8233_v54 = vshll.u32 %v7077_v19, 16 }
 0x353   : > { %4227 = vmatmul.bf16.vlgmr.msra.gmra.mxu0 %v5757_v40  ;;  %v2251_v40 = vld [vmem:[#allocation2 + $0x3c] sm:$0x1] }
 0x354   : > { %v3118_v8 = vpop.f32.mrf.mxu2  ;;  %4605 = vmatpush.bf16.msra.mxu0 %v7574_v45  ;;  %v3515_v45 = vunpack.c.l.b16 %v3379_v3  ;;  %v3381_v35 = vrot.slane %v8233_v54, 5  ;;  %v3390_v59 = vshll.u32 %v2251_v40, 16  ;;  %v8238_v40 = vshll.u32 %v7150_v28, 16 }
 0x355   : > { %v3119_v9 = vadd.f32 %v3118_v8, %v3069_v42  ;;  %v3263_v47 = vpop.f32.mrf.mxu3  ;;  %v3071_v20 = vpop.f32.mrf.mxu1  ;;  %v8232_v42 = vshrl.u32 %v7077_v19, 16  ;;  %v5750_v8 = vld [vmem:[#allocation2 + $0x24] sm:$0xff] }
 0x356   : > { %v3392_v6 = vrot.slane %v3390_v59, 5 }
 0x357   : > { %v7699_v5 = vadd.f32 %v3263_v47, %v3119_v9  ;;  %v3380_v58 = vrot.slane %v8232_v42, 4  ;;  %v3529_v9 = vpack.c.b16 %v3515_v45, %v3514_v23 }
 0x358   : > { %v7701_v14 = vpop.f32.mrf.mxu0  ;;  %4606 = vmatpush.bf16.msra.mxu0 %v7601_v56  ;;  %v3386_v56 = vrot.slane %v8235_v22, 4  ;;  %v8237_v22 = vshll.u32 %v7144_v36, 16  ;;  %v3404_v36 = vshll.u32 %v2252_v46, 16 }
 0x359   : > { %v3382_v19 = vor.u32 %v3381_v35, %v3380_v58 }
 0x35a   : > { %v3387_v47 = vor.u32 %v3386_v56, %v3384_v13  ;;  %v3395_v56 = vrot.slane %v8237_v22, 5  ;;  %v8242_v22 = vshll.u32 %v7242_v57, 16 }
 0x35c   : > { %v3120_v61 = vpop.f32.mrf.mxu2  ;;  %4607 = vmatpush.bf16.msra.mxu0 %v7627_v17  ;;  %v3383_v17 = vrot.slane %v3382_v19, 4 }
 0x35d   : > { %v3121_v60 = vadd.f32 %v3120_v61, %v3071_v20  ;;  %v3265_v41 = vpop.f32.mrf.mxu3  ;;  %v3074_v12 = vpop.f32.mrf.mxu1  ;;  %v3388_v20 = vrot.slane %v3387_v47, 4  ;;  %v8239_v61 = vshrl.u32 %v7150_v28, 16 }
 0x35e   : > { %v3385_v10 = vsel %vm6352_vm11, %v3383_v17, %v3384_v13  ;;  %v3398_v13 = vrot.slane %v8238_v40, 5  ;;  %v3406_v17 = vrot.slane %v3404_v36, 5  ;;  %v8243_v40 = vshrl.u32 %v7242_v57, 16 }
 0x35f   : > { %v7717_v44 = vadd.f32 %v3265_v41, %v3121_v60  ;;  %v3393_v42 = vsel %vm6352_vm11, %v3388_v20, %v3392_v6  ;;  %v3516_v54 = vunpack.c.l.b16 %v3385_v10  ;;  %v3400_v51 = vrot.slane %v8239_v61, 4  ;;  %v2253_v61 = vld [vmem:[#allocation2 + $0x5c] sm:$0x1] }
 0x360   : > { %v7719_v24 = vpop.f32.mrf.mxu0  ;;  %4608 = vmatpush.bf16.msra.mxu0 %v7643_v4  ;;  %v3517_v35 = vunpack.c.l.b16 %v3393_v42 }
 0x361   : > { %3316 = vmatmul.bf16.gmra.mxu1 %v5742_v50  ;;  %3685 = vmatmul.bf16.gmra.mxu2 %v5750_v8  ;;  %v5743_v50 = vld [vmem:[#allocation2 + $0x24] sm:$0xff]  ;;  %v5751_v8 = vld [vmem:[#allocation2 + $0x34] sm:$0xff]  ;;  %v3401_v47 = vor.u32 %v3400_v51, %v3398_v13 }
 0x362   : > { %3734 = vmatmul.bf16.gmra.mxu3 %v3529_v9  ;;  %v3530_v9 = vpack.c.b16 %v3517_v35, %v3516_v54  ;;  %v8240_v35 = vshrl.u32 %v7231_v1, 16 }
 0x363   : > { %4564 = vmatmul.bf16.vlgmr.msrb.gmra.mxu0 %v4412_v27 }
 0x364   : > { %v3123_v3 = vpop.f32.mrf.mxu2  ;;  %4609 = vmatpush.bf16.msra.mxu0 %v7651_v55  ;;  %v3394_v55 = vrot.slane %v8236_v48, 4  ;;  %v3408_v48 = vrot.slane %v8240_v35, 4  ;;  %v8244_v35 = vshrl.u32 %v7318_v21, 16 }
 0x365   : > { %v3124_v23 = vadd.f32 %v3123_v3, %v3074_v12  ;;  %v3268_v45 = vpop.f32.mrf.mxu3  ;;  %v3076_v53 = vpop.f32.mrf.mxu1 }
 0x366   : > { %v3396_v19 = vor.u32 %v3395_v56, %v3394_v55  ;;  %v3412_v56 = vrot.slane %v8242_v22, 5  ;;  %v8246_v22 = vshll.u32 %v7341_v49, 16 }
 0x367   : > { %v7727_v4 = vadd.f32 %v3268_v45, %v3124_v23 }
 0x368   : > { %v7729_v58 = vpop.f32.mrf.mxu0  ;;  %4610 = vmatpush.bf16.msra.mxu0 %v7665_v52  ;;  %v3397_v28 = vrot.slane %v3396_v19, 4  ;;  %v3418_v19 = vshll.u32 %v2253_v61, 16  ;;  %v2254_v61 = vld [vmem:[#allocation2 + $0x6c] sm:$0x1] }
 0x36a   : > { %v3399_v45 = vsel %vm6352_vm11, %v3397_v28, %v3398_v13  ;;  %v3414_v13 = vrot.slane %v8243_v40, 4  ;;  %v3420_v28 = vrot.slane %v3418_v19, 5  ;;  %v3426_v40 = vrot.slane %v8246_v22, 5 }
 0x36b   : > { %v3518_v42 = vunpack.c.l.b16 %v3399_v45  ;;  %v3432_v19 = vshll.u32 %v2254_v61, 16  ;;  %v8249_v22 = vshll.u32 %v7442_v39, 16 }
 0x36c   : > { %v3125_v60 = vpop.f32.mrf.mxu2  ;;  %4611 = vmatpush.bf16.msra.mxu0 %v7683_v33  ;;  %v3402_v33 = vrot.slane %v3401_v47, 4 }
 0x36d   : > { %v3126_v41 = vadd.f32 %v3125_v60, %v3076_v53  ;;  %v3270_v52 = vpop.f32.mrf.mxu3  ;;  %v3079_v12 = vpop.f32.mrf.mxu1 }
 0x36e   : > { %v3407_v53 = vsel %vm6352_vm11, %v3402_v33, %v3406_v17 }
 0x36f   : > { %v7741_v59 = vadd.f32 %v3270_v52, %v3126_v41  ;;  %v3519_v54 = vunpack.c.l.b16 %v3407_v53  ;;  %v5744_v41 = vld [vmem:[#allocation2 + $0x34] sm:$0xff] }
 0x370   : > { %v7743_v27 = vpop.f32.mrf.mxu0  ;;  %4612 = vmatpush.bf16.msra.mxu0 %v7691_v16 }
 0x371   : > { %3321 = vmatmul.bf16.gmra.mxu1 %v5743_v50  ;;  %3690 = vmatmul.bf16.gmra.mxu2 %v5751_v8  ;;  %v5752_v50 = vld [vmem:[#allocation2 + $0x44] sm:$0xff] }
 0x372   : > { %3739 = vmatmul.bf16.gmra.mxu3 %v3530_v9  ;;  %v3415_v9 = vor.u32 %v3414_v13, %v3412_v56 }
 0x373   : > { %4613 = vmatmul.bf16.vlgmr.msra.gmra.mxu0 %v6405_v0  ;;  %v8241_v0 = vshll.u32 %v7231_v1, 16 }
 0x374   : > { %v3128_v20 = vpop.f32.mrf.mxu2  ;;  %v3416_v36 = vrot.slane %v3415_v9, 4 }
 0x375   : > { %v3129_v6 = vadd.f32 %v3128_v20, %v3079_v12  ;;  %v3273_v3 = vpop.f32.mrf.mxu3  ;;  %v3081_v23 = vpop.f32.mrf.mxu1  ;;  %v3409_v55 = vrot.slane %v8241_v0, 5  ;;  %v3531_v12 = vpack.c.b16 %v3519_v54, %v3518_v42  ;;  %v8245_v0 = vshll.u32 %v7318_v21, 16 }
 0x377   : > { %v7751_v10 = vadd.f32 %v3273_v3, %v3129_v6  ;;  %v3410_v8 = vor.u32 %v3409_v55, %v3408_v48  ;;  %v3422_v48 = vrot.slane %v8244_v35, 4  ;;  %v3423_v55 = vrot.slane %v8245_v0, 5 }
 0x378   : > { %v7753_v16 = vpop.f32.mrf.mxu0  ;;  %v8248_v0 = vshrl.u32 %v7442_v39, 16 }
 0x379   : > { %v3411_v57 = vrot.slane %v3410_v8, 4  ;;  %v3424_v8 = vor.u32 %v3423_v55, %v3422_v48 }
 0x37a   : > { %v3436_v55 = vrot.slane %v8248_v0, 4 }
 0x37b   : > { %v3413_v3 = vsel %vm6352_vm11, %v3411_v57, %v3412_v56  ;;  %v8247_v56 = vshrl.u32 %v7341_v49, 16  ;;  %v3425_v49 = vrot.slane %v3424_v8, 4  ;;  %v5754_v8 = vld [vmem:[#allocation2 + $0x64] sm:$0xff] }
 0x37c   : > { %v3130_v51 = vpop.f32.mrf.mxu2  ;;  %v3520_v42 = vunpack.c.l.b16 %v3413_v3 }
 0x37d   : > { %v3131_v46 = vadd.f32 %v3130_v51, %v3081_v23  ;;  %v3275_v60 = vpop.f32.mrf.mxu3  ;;  %v3084_v52 = vpop.f32.mrf.mxu1  ;;  %v3421_v23 = vsel %vm6352_vm11, %v3416_v36, %v3420_v28  ;;  %v3428_v13 = vrot.slane %v8247_v56, 4  ;;  %v3434_v28 = vrot.slane %v3432_v19, 5 }
 0x37e   : > { %v3521_v54 = vunpack.c.l.b16 %v3421_v23  ;;  %v3427_v3 = vsel %vm6352_vm11, %v3425_v49, %v3426_v40  ;;  %v3437_v56 = vrot.slane %v8249_v22, 5 }
 0x37f   : > { %v7763_v47 = vadd.f32 %v3275_v60, %v3131_v46  ;;  %v3429_v9 = vor.u32 %v3428_v13, %v3426_v40  ;;  %v3522_v35 = vunpack.c.l.b16 %v3427_v3  ;;  %v8250_v13 = vshll.u32 %v7446_v25, 16 }
 0x380   : > { %v7765_v1 = vpop.f32.mrf.mxu0  ;;  %v8251_v40 = vshrl.u32 %v7446_v25, 16  ;;  %v3438_v19 = vor.u32 %v3437_v56, %v3436_v55 }
 0x381   : > { %3326 = vmatmul.bf16.gmra.mxu1 %v5744_v41  ;;  %3695 = vmatmul.bf16.gmra.mxu2 %v5752_v50  ;;  %v5745_v41 = vld [vmem:[#allocation2 + $0x44] sm:$0xff]  ;;  %v5753_v50 = vld [vmem:[#allocation2 + $0x54] sm:$0xff]  ;;  %v3430_v36 = vrot.slane %v3429_v9, 4  ;;  %v3440_v61 = vrot.slane %v8250_v13, 5  ;;  %v3450_v13 = vrot.slane %v2852_v34, 4 }
 0x382   : > { %3744 = vmatmul.bf16.gmra.mxu3 %v3531_v12  ;;  %v3532_v12 = vpack.c.b16 %v3521_v54, %v3520_v42  ;;  %v3439_v25 = vrot.slane %v3438_v19, 4  ;;  %v5747_v19 = vld [vmem:[#allocation2 + $0x64] sm:$0xff] }
 0x383   : > { %v3435_v23 = vsel %vm6352_vm11, %v3430_v36, %v3434_v28 }
 0x384   : > { %v3133_v33 = vpop.f32.mrf.mxu2  ;;  %v3523_v48 = vunpack.c.l.b16 %v3435_v23 }
 0x385   : > { %v3134_v17 = vadd.f32 %v3133_v33, %v3084_v52  ;;  %v3278_v20 = vpop.f32.mrf.mxu3  ;;  %v3086_v6 = vpop.f32.mrf.mxu1 }
 0x386   : > { %v3533_v9 = vpack.c.b16 %v3523_v48, %v3522_v35  ;;  %v3441_v35 = vsel %vm6352_vm11, %v3439_v25, %v3440_v61 }
 0x387   : > { %v7771_v45 = vadd.f32 %v3278_v20, %v3134_v17  ;;  %v3524_v22 = vunpack.c.l.b16 %v3441_v35 }
 0x388   : > { %v7773_v53 = vpop.f32.mrf.mxu0 }
 0x38c   : > { %v3135_v51 = vpop.f32.mrf.mxu2 }
 0x38d   : > { %v3136_v46 = vadd.f32 %v3135_v51, %v3086_v6  ;;  %v3280_v60 = vpop.f32.mrf.mxu3  ;;  %v3089_v52 = vpop.f32.mrf.mxu1  ;;  %v3442_v51 = vrot.slane %v8251_v40, 4  ;;  %v3451_v40 = vrot.slane %v2855_v15, 5 }
 0x38f   : > { %v7783_v57 = vadd.f32 %v3280_v60, %v3136_v46  ;;  %v2255_v46 = vld [vmem:[#allocation2 + $0x7c] sm:$0x1]  ;;  %v3443_v49 = vor.u32 %v3442_v51, %v3440_v61  ;;  %v3454_v51 = vrot.slane %v2864_v30, 5  ;;  %v8252_v61 = vshrl.u32 %v7539_v37, 16 }
 0x390   : > { %v7785_v21 = vpop.f32.mrf.mxu0  ;;  %v3446_v36 = vshll.u32 %v2255_v46, 16  ;;  %v3452_v25 = vor.u32 %v3451_v40, %v3450_v13 }
 0x391   : > { %3331 = vmatmul.bf16.gmra.mxu1 %v5745_v41  ;;  %3700 = vmatmul.bf16.gmra.mxu2 %v5753_v50  ;;  %v5746_v50 = vld [vmem:[#allocation2 + $0x54] sm:$0xff]  ;;  %v3456_v46 = vrot.slane %v8252_v61, 4 }
 0x392   : > { %3749 = vmatmul.bf16.gmra.mxu3 %v3532_v12  ;;  %v3453_v35 = vrot.slane %v3452_v25, 4 }
 0x394   : > { %v3138_v33 = vpop.f32.mrf.mxu2 }
 0x395   : > { %v3139_v17 = vadd.f32 %v3138_v33, %v3089_v52  ;;  %v3283_v20 = vpop.f32.mrf.mxu3  ;;  %v3091_v6 = vpop.f32.mrf.mxu1  ;;  %v3444_v33 = vrot.slane %v3443_v49, 4 }
 0x397   : > { %v7791_v42 = vadd.f32 %v3283_v20, %v3139_v17  ;;  %v3448_v17 = vrot.slane %v3446_v36, 5  ;;  %v5755_v36 = vld [vmem:[#allocation2 + $0x74] sm:$0xff] }
 0x398   : > { %v7793_v54 = vpop.f32.mrf.mxu0 }
 0x399   : > { %v3449_v48 = vsel %vm6352_vm11, %v3444_v33, %v3448_v17  ;;  %v3457_v33 = vor.u32 %v3456_v46, %v3454_v51 }
 0x39a   : > { %v3525_v56 = vunpack.c.l.b16 %v3449_v48 }
 0x39b   : > { %v3458_v48 = vrot.slane %v3457_v33, 4 }
 0x39c   : > { %v3140_v60 = vpop.f32.mrf.mxu2  ;;  %v3534_v37 = vpack.c.b16 %v3525_v56, %v3524_v22 }
 0x39d   : > { %v3141_v41 = vadd.f32 %v3140_v60, %v3091_v6  ;;  %v3285_v52 = vpop.f32.mrf.mxu3  ;;  %v3094_v12 = vpop.f32.mrf.mxu1  ;;  %v2283_v60 = vld [vmem:[#allocation2 + $0x3c] sm:$0x1] }
 0x39f   : > { %v7803_v28 = vadd.f32 %v3285_v52, %v3141_v41  ;;  %v8253_v41 = vor.u32 %v7062_v31, %v7057_v18 }
 0x3a0   : > { %v7805_v39 = vpop.f32.mrf.mxu0 }
 0x3a1   : > { %3336 = vmatmul.bf16.gmra.mxu1 %v5746_v50  ;;  %3705 = vmatmul.bf16.gmra.mxu2 %v5754_v8  ;;  %v4301_v52 = vrot.slane %v8253_v41, 4  ;;  %v8254_v50 = vor.u32 %v7066_v11, %v7064_v29  ;;  %v4308_v8 = vshll.u32 %v2283_v60, 16 }
 0x3a2   : > { %3754 = vmatmul.bf16.gmra.mxu3 %v3533_v9  ;;  %v2256_v9 = vld [vmem:[#allocation2 + $0x8c] sm:$0x1] }
 0x3a3   : > { %v4310_v49 = vrot.slane %v4308_v8, 5  ;;  %v3460_v18 = vshll.u32 %v2256_v9, 16  ;;  %v4303_v31 = vsel %vm6352_vm11, %v4301_v52, %v7064_v29  ;;  %v3455_v29 = vsel %vm6352_vm11, %v3453_v35, %v3454_v51  ;;  %v5748_v9 = vld [vmem:[#allocation2 + $0x74] sm:$0xff] }
 0x3a4   : > { %v3143_v20 = vpop.f32.mrf.mxu2  ;;  %v3526_v52 = vunpack.c.l.b16 %v3455_v29  ;;  %v8261_v35 = vld [vmem:[#allocation16_spill] sm:$0xff] }
 0x3a5   : > { %v3144_v6 = vadd.f32 %v3143_v20, %v3094_v12  ;;  %v3288_v3 = vpop.f32.mrf.mxu3  ;;  %v3096_v23 = vpop.f32.mrf.mxu1  ;;  %v4306_v12 = vrot.slane %v8254_v50, 4  ;;  %v4398_v20 = vunpack.c.l.b16 %v4303_v31  ;;  %v3462_v22 = vrot.slane %v3460_v18, 5 }
 0x3a6   : > { %v8259_v31 = vshrl.u32 %v7110_v63, 16 }
 0x3a7   : > { %v7811_v0 = vadd.f32 %v3288_v3, %v3144_v6  ;;  %v4311_v11 = vsel %vm6352_vm11, %v4306_v12, %v4310_v49  ;;  %v3463_v60 = vsel %vm6352_vm11, %v3458_v48, %v3462_v22  ;;  %v8262_v48 = vshll.u32 %v8261_v35, 16 }
 0x3a8   : > { %v7813_v55 = vpop.f32.mrf.mxu0  ;;  %v4399_v6 = vunpack.c.l.b16 %v4311_v11  ;;  %v3527_v50 = vunpack.c.l.b16 %v3463_v60  ;;  %v4312_v11 = vrot.slane %v8259_v31, 4 }
 0x3a9   : > { %v4316_v22 = vrot.slane %v8262_v48, 5 }
 0x3ac   : > { %v3145_v34 = vpop.f32.mrf.mxu2 }
 0x3ad   : > { %v3146_v26 = vadd.f32 %v3145_v34, %v3096_v23  ;;  %v3290_v15 = vpop.f32.mrf.mxu3  ;;  %v4413_v23 = vpack.c.b16 %v4399_v6, %v4398_v20  ;;  %v8260_v20 = vshll.u32 %v7110_v63, 16 }
 0x3ae   : > { %v3099_v30 = vpop.f32.mrf.mxu1 }
 0x3af   : > { %v7829_v17 = vadd.f32 %v3290_v15, %v3146_v26  ;;  %v5756_v15 = vld [vmem:[#allocation2 + $0x84] sm:$0xff]  ;;  %v4313_v6 = vrot.slane %v8260_v20, 5 }
 0x3b0   : > { %v7836_v3 = vpop.f32.mrf.mxu0 }
 0x3b1   : > { %8255 = vst [vmem:[#allocation25_spill] sm:$0xff] %v7836_v3  ;;  %3341 = vmatmul.bf16.gmra.mxu1 %v5747_v19  ;;  %3710 = vmatmul.bf16.gmra.mxu2 %v5755_v36  ;;  %v3535_v19 = vpack.c.b16 %v3527_v50, %v3526_v52  ;;  %v5758_v52 = vld [vmem:[#allocation2 + $0x34] sm:$0xff] }
 0x3b2   : > { %3759 = vmatmul.bf16.gmra.mxu3 %v3534_v37 }
 0x3b4   : > { %v3148_v56 = vpop.f32.mrf.mxu2 }
 0x3b5   : > { %v3149_v13 = vadd.f32 %v3148_v56, %v3099_v30  ;;  %v3293_v40 = vpop.f32.mrf.mxu3  ;;  %v8263_v56 = vshrl.u32 %v8261_v35, 16 }
 0x3b6   : > { %v3101_v61 = vpop.f32.mrf.mxu1 }
 0x3b7   : > { %v7838_v46 = vadd.f32 %v3293_v40, %v3149_v13  ;;  %v4318_v13 = vrot.slane %v8263_v56, 4 }
 0x3b8   : > { %v7844_v41 = vpop.f32.mrf.mxu0 }
 0x3b9   : > { %8256 = vst [vmem:[#allocation26_spill] sm:$0xff] %v7844_v41 }
 0x3bc   : > { %v3150_v12 = vpop.f32.mrf.mxu2 }
 0x3bd   : > { %v3151_v8 = vadd.f32 %v3150_v12, %v3101_v61  ;;  %v3295_v34 = vpop.f32.mrf.mxu3  ;;  %v2284_v61 = vld [vmem:[#allocation2 + $0x4c] sm:$0x1] }
 0x3be   : > { %v3104_v26 = vpop.f32.mrf.mxu1 }
 0x3bf   : > { %v7846_v49 = vadd.f32 %v3295_v34, %v3151_v8  ;;  %v4314_v8 = vor.u32 %v4313_v6, %v4312_v11  ;;  %v4319_v34 = vor.u32 %v4318_v13, %v4316_v22 }
 0x3c0   : > { %v7848_v30 = vpop.f32.mrf.mxu0 }
 0x3c1   : > { %8257 = vst [vmem:[#allocation27_spill] sm:$0xff] %v7848_v30  ;;  %3346 = vmatmul.bf16.gmra.mxu1 %v5748_v9  ;;  %3715 = vmatmul.bf16.gmra.mxu2 %v5756_v15  ;;  %v4322_v9 = vshll.u32 %v2284_v61, 16  ;;  %v4315_v15 = vrot.slane %v4314_v8, 4  ;;  %v8268_v61 = vld [vmem:[#allocation18_spill] sm:$0xff] }
 0x3c2   : > { %3764 = vmatmul.bf16.gmra.mxu3 %v3535_v19  ;;  %v4320_v19 = vrot.slane %v4319_v34, 4  ;;  %v2285_v34 = vld [vmem:[#allocation2 + $0x5c] sm:$0x1] }
 0x3c3   : > { %v4317_v31 = vsel %vm6352_vm11, %v4315_v15, %v4316_v22 }
 0x3c4   : > { %v3153_v51 = vpop.f32.mrf.mxu2  ;;  %v4400_v6 = vunpack.c.l.b16 %v4317_v31 }
 0x3c5   : > { %v3154_v36 = vadd.f32 %v3153_v51, %v3104_v26  ;;  %v3298_v37 = vpop.f32.mrf.mxu3  ;;  %v8264_v26 = vld [vmem:[#allocation9_spill] sm:$0xff]  ;;  %v4324_v51 = vrot.slane %v4322_v9, 5 }
 0x3c6   : > { %v3106_v25 = vpop.f32.mrf.mxu1 }
 0x3c7   : > { %v7850_v33 = vadd.f32 %v3298_v37, %v3154_v36  ;;  %v4325_v11 = vsel %vm6352_vm11, %v4320_v19, %v4324_v51 }
 0x3c8   : > { %v7852_v18 = vpop.f32.mrf.mxu0  ;;  %v4401_v35 = vunpack.c.l.b16 %v4325_v11 }
 0x3c9   : > { %8258 = vst [vmem:[#allocation28_spill] sm:$0xff] %v7852_v18 }
 0x3ca   : > { %v4414_v19 = vpack.c.b16 %v4401_v35, %v4400_v6 }
 0x3cc   : > { %v3155_v40 = vpop.f32.mrf.mxu2 }
 0x3cd   : > { %v3156_v29 = vadd.f32 %v3155_v40, %v3106_v25  ;;  %v3300_v60 = vpop.f32.mrf.mxu3 }
 0x3ce   : > { %v7862_v50 = vpop.f32.mrf.mxu1 }
 0x3cf   : > { %v7864_v12 = vadd.f32 %v3300_v60, %v3156_v29  ;;  %v8269_v29 = vshll.u32 %v8268_v61, 16 }
 0x3d0   : > { %v7866_v63 = vpop.f32.mrf.mxu0 }
 0x3d1   : > { %4232 = vmatmul.bf16.vlgmr.msra.gmra.mxu1 %v5758_v52  ;;  %4569 = vmatmul.bf16.vlgmr.msra.gmra.mxu2 %v4413_v23  ;;  %v8265_v23 = vld [vmem:[#allocation17_spill] sm:$0xff]  ;;  %v4330_v60 = vrot.slane %v8269_v29, 5  ;;  %v8270_v52 = vshrl.u32 %v8268_v61, 16 }
 0x3d2   : > { %4618 = vmatmul.bf16.vlgmr.msra.gmra.mxu3 %v8264_v26  ;;  %v8266_v48 = vshrl.u32 %v8265_v23, 16  ;;  %v8267_v13 = vshll.u32 %v8265_v23, 16  ;;  %v5759_v26 = vld [vmem:[#allocation2 + $0x44] sm:$0xff] }
 0x3d3   : > { %v4332_v8 = vrot.slane %v8270_v52, 4  ;;  %v8271_v23 = vld [vmem:[#allocation10_spill] sm:$0xff] }
 0x3d4   : > { %v3681_v36 = vpop.f32.mrf.mxu2  ;;  %v4326_v56 = vrot.slane %v8266_v48, 4  ;;  %v4327_v40 = vrot.slane %v8267_v13, 5  ;;  %v4336_v48 = vshll.u32 %v2285_v34, 16  ;;  %v8272_v34 = vld [vmem:[#allocation19_spill] sm:$0xff] }
 0x3d5   : > { %v3730_v37 = vpop.f32.mrf.mxu3  ;;  %v4333_v11 = vor.u32 %v4332_v8, %v4330_v60 }
 0x3d6   : > { %v7869_v25 = vpop.f32.mrf.mxu1  ;;  %v4328_v31 = vor.u32 %v4327_v40, %v4326_v56  ;;  %v4338_v61 = vrot.slane %v4336_v48, 5  ;;  %v2286_v48 = vld [vmem:[#allocation2 + $0x6c] sm:$0x1] }
 0x3d7   : > { %v4334_v29 = vrot.slane %v4333_v11, 4 }
 0x3d8   : > { %v7875_v20 = vpop.f32.mrf.mxu0  ;;  %v4329_v13 = vrot.slane %v4328_v31, 4  ;;  %v8275_v31 = vld [vmem:[#allocation20_spill] sm:$0xff] }
 0x3d9   : > { %v4339_v6 = vsel %vm6352_vm11, %v4334_v29, %v4338_v61  ;;  %v8276_v11 = vshll.u32 %v8275_v31, 16 }
 0x3da   : > { %v4403_v8 = vunpack.c.l.b16 %v4339_v6 }
 0x3dc   : > { %v3683_v22 = vpop.f32.mrf.mxu2 }
 0x3dd   : > { %v3732_v9 = vpop.f32.mrf.mxu3 }
 0x3de   : > { %v3317_v15 = vpop.f32.mrf.mxu1 }
 0x3df   : > { %v3318_v51 = vadd.f32 %v3317_v15, %v7727_v4  ;;  %v4331_v4 = vsel %vm6352_vm11, %v4329_v13, %v4330_v60 }
 0x3e0   : > { %v4565_v7 = vpop.f32.mrf.mxu0  ;;  %v4402_v40 = vunpack.c.l.b16 %v4331_v4 }
 0x3e1   : > { %4237 = vmatmul.bf16.gmra.mxu1 %v5759_v26  ;;  %4574 = vmatmul.bf16.gmra.mxu2 %v4414_v19  ;;  %v8273_v26 = vshrl.u32 %v8272_v34, 16  ;;  %v8274_v19 = vshll.u32 %v8272_v34, 16  ;;  %v4350_v34 = vshll.u32 %v2286_v48, 16 }
 0x3e2   : > { %4623 = vmatmul.bf16.gmra.mxu3 %v8271_v23 }
 0x3e3   : > { %v4340_v15 = vrot.slane %v8273_v26, 4 }
 0x3e4   : > { %v3686_v52 = vpop.f32.mrf.mxu2 }
 0x3e5   : > { %v3735_v2 = vpop.f32.mrf.mxu3 }
 0x3e6   : > { %v3736_v18 = vadd.f32 %v3735_v2, %v3686_v52  ;;  %v3319_v30 = vpop.f32.mrf.mxu1  ;;  %v4341_v2 = vrot.slane %v8274_v19, 5  ;;  %v4415_v52 = vpack.c.b16 %v4403_v8, %v4402_v40  ;;  %v3313_v19 = vadd.f32 %v7862_v50, %v7699_v5 }
 0x3e7   : > { %v3320_v41 = vadd.f32 %v3319_v30, %v7741_v59  ;;  %v4344_v59 = vrot.slane %v8276_v11, 5  ;;  %v8277_v30 = vshrl.u32 %v8275_v31, 16  ;;  %v4352_v8 = vrot.slane %v4350_v34, 5 }
 0x3e8   : > { %v7892_v35 = vadd.f32 %v3736_v18, %v3318_v51  ;;  %v4567_v56 = vpop.f32.mrf.mxu0  ;;  %v5760_v18 = vld [vmem:[#allocation2 + $0x54] sm:$0xff]  ;;  %v3731_v51 = vadd.f32 %v3730_v37, %v3681_v36  ;;  %v4342_v6 = vor.u32 %v4341_v2, %v4340_v15  ;;  %v3733_v36 = vadd.f32 %v3732_v9, %v3683_v22 }
 0x3e9   : > { %v4346_v60 = vrot.slane %v8277_v30, 4  ;;  %v4229_v30 = vadd.f32 %v7866_v63, %v7686_v62  ;;  %v8278_v37 = vld [vmem:[#allocation11_spill] sm:$0xff]  ;;  %v3315_v15 = vadd.f32 %v7869_v25, %v7717_v44  ;;  %v4231_v50 = vadd.f32 %v7875_v20, %v7701_v14 }
 0x3ea   : > { %v3770_v3 = vadd.f32 %v3731_v51, %v3313_v19  ;;  %v4343_v40 = vrot.slane %v4342_v6, 4 }
 0x3eb   : > { %v4347_v26 = vor.u32 %v4346_v60, %v4344_v59  ;;  %v3771_v60 = vadd.f32 %v3733_v36, %v3315_v15 }
 0x3ec   : > { %v3688_v23 = vpop.f32.mrf.mxu2  ;;  %v4268_v48 = vadd.f32 %v4229_v30, %v3770_v3  ;;  %v4345_v9 = vsel %vm6352_vm11, %v4343_v40, %v4344_v59  ;;  %v2287_v30 = vld [vmem:[#allocation2 + $0x7c] sm:$0x1] }
 0x3ed   : > { %v3737_v13 = vpop.f32.mrf.mxu3  ;;  %v4269_v3 = vadd.f32 %v4231_v50, %v3771_v60  ;;  %v4404_v20 = vunpack.c.l.b16 %v4345_v9  ;;  %v4364_v50 = vshll.u32 %v2287_v30, 16  ;;  %v8285_v9 = vld [vmem:[#allocation12_spill] sm:$0xff] }
 0x3ee   : > { %v3738_v29 = vadd.f32 %v3737_v13, %v3688_v23  ;;  %v3322_v61 = vpop.f32.mrf.mxu1 }
 0x3ef   : > { %v3323_v4 = vadd.f32 %v3322_v61, %v7751_v10  ;;  %v4348_v10 = vrot.slane %v4347_v26, 4 }
 0x3f0   : > { %v7905_v11 = vadd.f32 %v3738_v29, %v3320_v41  ;;  %v4614_v31 = vpop.f32.mrf.mxu0 }
 0x3f1   : > { %4242 = vmatmul.bf16.gmra.mxu1 %v5760_v18  ;;  %4579 = vmatmul.bf16.gmra.mxu2 %v4415_v52  ;;  %v4615_v2 = vadd.f32 %v4614_v31, %v4565_v7  ;;  %v4353_v23 = vsel %vm6352_vm11, %v4348_v10, %v4352_v8  ;;  %v7922_v7 = vld [vmem:[%s8100_s4] ss:$0 sm:$0xff]  ;;  %v8282_v52 = vld [vmem:[#allocation22_spill] sm:$0xff] }
 0x3f2   : > { %4628 = vmatmul.bf16.gmra.mxu3 %v8278_v37  ;;  %v4405_v18 = vunpack.c.l.b16 %v4353_v23  ;;  %v8283_v6 = vshll.u32 %v8282_v52, 16  ;;  %v8284_v34 = vshrl.u32 %v8282_v52, 16  ;;  %v5761_v37 = vld [vmem:[#allocation2 + $0x64] sm:$0xff] }
 0x3f3   : > { %v4654_v13 = vadd.f32 %v4615_v2, %v4268_v48 }
 0x3f4   : > { %v3691_v5 = vpop.f32.mrf.mxu2  ;;  %v4358_v26 = vrot.slane %v8283_v6, 5  ;;  %v4360_v19 = vrot.slane %v8284_v34, 4  ;;  %v4416_v15 = vpack.c.b16 %v4405_v18, %v4404_v20 }
 0x3f5   : > { %v3740_v41 = vpop.f32.mrf.mxu3 }
 0x3f6   : > { %v3741_v62 = vadd.f32 %v3740_v41, %v3691_v5  ;;  %v3324_v63 = vpop.f32.mrf.mxu1  ;;  %v4361_v41 = vor.u32 %v4360_v19, %v4358_v26 }
 0x3f7   : > { %v3325_v22 = vadd.f32 %v3324_v63, %v7763_v47  ;;  %v8279_v47 = vld [vmem:[#allocation21_spill] sm:$0xff] }
 0x3f8   : > { %v7924_v44 = vadd.f32 %v3741_v62, %v3323_v4  ;;  %v4616_v14 = vpop.f32.mrf.mxu0  ;;  %v8280_v51 = vshrl.u32 %v8279_v47, 16  ;;  %v8281_v59 = vshll.u32 %v8279_v47, 16  ;;  %v4674_v4 = vadd.f32 %v7922_v7, %v4654_v13 }
 0x3f9   : > { %v4617_v25 = vadd.f32 %v4616_v14, %v4567_v56  ;;  %v4362_v13 = vrot.slane %v4361_v41, 4  ;;  %v4366_v14 = vrot.slane %v4364_v50, 5 }
 0x3fa   : > { %v4354_v29 = vrot.slane %v8280_v51, 4  ;;  %v4355_v61 = vrot.slane %v8281_v59, 5  ;;  %v4690_v60 = vmax.f32 %v4674_v4, 0.0  ;;  %v8289_v4 = vld [vmem:[#allocation24_spill] sm:$0xff] }
 0x3fb   : > { %v4655_v31 = vadd.f32 %v4617_v25, %v4269_v3 }
 0x3fc   : > { %v3693_v36 = vpop.f32.mrf.mxu2  ;;  %v4356_v5 = vor.u32 %v4355_v61, %v4354_v29  ;;  %v8286_v61 = vld [vmem:[#allocation23_spill] sm:$0xff] }
 0x3fd   : > { %v3742_v56 = vpop.f32.mrf.mxu3  ;;  %v4675_v40 = vadd.f32 %v7922_v7, %v4655_v31  ;;  %v8287_v52 = vshrl.u32 %v8286_v61, 16  ;;  %v8288_v34 = vshll.u32 %v8286_v61, 16  ;;  %v8290_v31 = vshll.u32 %v8289_v4, 16 }
 0x3fe   : > { %v3743_v10 = vadd.f32 %v3742_v56, %v3693_v36  ;;  %v3327_v8 = vpop.f32.mrf.mxu1  ;;  %v4357_v23 = vrot.slane %v4356_v5, 4  ;;  %v8294_v61 = vshll.u32 %v7561_v32, 16 }
 0x3ff   : > { %v3328_v2 = vadd.f32 %v3327_v8, %v7771_v45  ;;  %v4691_v48 = vmax.f32 %v4675_v40, 0.0  ;;  %v4368_v6 = vrot.slane %v8287_v52, 4  ;;  %v4369_v19 = vrot.slane %v8288_v34, 5  ;;  %v5762_v40 = vld [vmem:[#allocation2 + $0x74] sm:$0xff] }
 0x400   : > { %v7937_v62 = vadd.f32 %v3743_v10, %v3325_v22  ;;  %v4359_v47 = vsel %vm6352_vm11, %v4357_v23, %v4358_v26  ;;  %v4367_v22 = vsel %vm6352_vm11, %v4362_v13, %v4366_v14  ;;  %v4372_v30 = vrot.slane %v8290_v31, 5  ;;  %v2288_v26 = vld [vmem:[#allocation2 + $0x8c] sm:$0x1] }
 0x401   : > { %4247 = vmatmul.bf16.gmra.mxu1 %v5761_v37  ;;  %v5849_v63 = vpack.c.bf16 %v4691_v48, %v4690_v60  ;;  %4584 = vmatmul.bf16.gmra.mxu2 %v4416_v15  ;;  %v4406_v29 = vunpack.c.l.b16 %v4359_v47  ;;  %v4407_v59 = vunpack.c.l.b16 %v4367_v22  ;;  %v4370_v5 = vor.u32 %v4369_v19, %v4368_v6  ;;  %v8292_v48 = vld [vmem:[#allocation13_spill] sm:$0xff] }
 0x402   : > { %4633 = vmatmul.bf16.gmra.mxu3 %v8285_v9  ;;  %v4378_v50 = vshll.u32 %v2288_v26, 16  ;;  %v4383_v52 = vrot.slane %v8294_v61, 5  ;;  %v8295_v6 = vshll.u32 %v7586_v43, 16 }
 0x403   : > { %5850 = vst [vmem:[%s6810_s26] sm:$0xff] %v5849_v63   ;;  %v4417_v15 = vpack.c.b16 %v4407_v59, %v4406_v29  ;;  %v4371_v63 = vrot.slane %v4370_v5, 4  ;;  %v8293_v29 = vshrl.u32 %v7561_v32, 16 }
 0x404   : > { %v3696_v3 = vpop.f32.mrf.mxu2  ;;  %v4380_v23 = vrot.slane %v4378_v50, 5  ;;  %v4386_v34 = vrot.slane %v8295_v6, 5 }
 0x405   : > { %v3745_v25 = vpop.f32.mrf.mxu3  ;;  %v4382_v59 = vrot.slane %v8293_v29, 4 }
 0x406   : > { %v3746_v20 = vadd.f32 %v3745_v25, %v3696_v3  ;;  %v3329_v45 = vpop.f32.mrf.mxu1 }
 0x407   : > { %v3330_v18 = vadd.f32 %v3329_v45, %v7783_v57  ;;  %v8291_v57 = vshrl.u32 %v8289_v4, 16  ;;  %v2289_v4 = vld [vmem:[#allocation2 + $0x9c] sm:$0x1] }
 0x408   : > { %v7946_v51 = vadd.f32 %v3746_v20, %v3328_v2 }
 0x409   : > { %v4374_v36 = vrot.slane %v8291_v57, 4  ;;  %v5763_v57 = vld [vmem:[#allocation2 + $0x84] sm:$0xff] }
 0x40b   : > { %v4375_v41 = vor.u32 %v4374_v36, %v4372_v30 }
 0x40c   : > { %v3698_v56 = vpop.f32.mrf.mxu2 }
 0x40d   : > { %v3747_v37 = vpop.f32.mrf.mxu3  ;;  %v4376_v9 = vrot.slane %v4375_v41, 4 }
 0x40e   : > { %v3748_v10 = vadd.f32 %v3747_v37, %v3698_v56  ;;  %v3332_v8 = vpop.f32.mrf.mxu1 }
 0x40f   : > { %v3333_v2 = vadd.f32 %v3332_v8, %v7791_v42  ;;  %v4373_v42 = vsel %vm6352_vm11, %v4371_v63, %v4372_v30  ;;  %v4381_v45 = vsel %vm6352_vm11, %v4376_v9, %v4380_v23  ;;  %v4392_v8 = vshll.u32 %v2289_v4, 16 }
 0x410   : > { %v7957_v60 = vadd.f32 %v3748_v10, %v3330_v18  ;;  %v4408_v47 = vunpack.c.l.b16 %v4373_v42  ;;  %v4409_v22 = vunpack.c.l.b16 %v4381_v45  ;;  %v5764_v42 = vld [vmem:[#allocation2 + $0x94] sm:$0xff] }
 0x411   : > { %4252 = vmatmul.bf16.gmra.mxu1 %v5762_v40  ;;  %4589 = vmatmul.bf16.gmra.mxu2 %v4417_v15  ;;  %v4384_v40 = vor.u32 %v4383_v52, %v4382_v59  ;;  %v8297_v15 = vld [vmem:[#allocation14_spill] sm:$0xff]  ;;  %v4394_v5 = vrot.slane %v4392_v8, 5 }
 0x412   : > { %4638 = vmatmul.bf16.gmra.mxu3 %v8292_v48  ;;  %v4418_v56 = vpack.c.b16 %v4409_v22, %v4408_v47 }
 0x414   : > { %v3701_v13 = vpop.f32.mrf.mxu2 }
 0x415   : > { %v3750_v14 = vpop.f32.mrf.mxu3 }
 0x416   : > { %v3751_v3 = vadd.f32 %v3750_v14, %v3701_v13  ;;  %v3334_v25 = vpop.f32.mrf.mxu1 }
 0x417   : > { %v3335_v20 = vadd.f32 %v3334_v25, %v7803_v28  ;;  %v8296_v28 = vshrl.u32 %v7586_v43, 16  ;;  %v4385_v43 = vrot.slane %v4384_v40, 4 }
 0x418   : > { %v7965_v18 = vadd.f32 %v3751_v3, %v3333_v2 }
 0x419   : > { %v4388_v19 = vrot.slane %v8296_v28, 4 }
 0x41b   : > { %v4389_v10 = vor.u32 %v4388_v19, %v4386_v34 }
 0x41c   : > { %v3703_v31 = vpop.f32.mrf.mxu2 }
 0x41d   : > { %v3752_v30 = vpop.f32.mrf.mxu3  ;;  %v4390_v2 = vrot.slane %v4389_v10, 4 }
 0x41e   : > { %v3753_v36 = vadd.f32 %v3752_v30, %v3703_v31  ;;  %v3337_v26 = vpop.f32.mrf.mxu1 }
 0x41f   : > { %v3338_v37 = vadd.f32 %v3337_v26, %v7811_v0  ;;  %v4387_v0 = vsel %vm6352_vm11, %v4385_v43, %v4386_v34  ;;  %v4395_v23 = vsel %vm6352_vm11, %v4390_v2, %v4394_v5 }
 0x420   : > { %v7976_v32 = vadd.f32 %v3753_v36, %v3335_v20  ;;  %v4410_v14 = vunpack.c.l.b16 %v4387_v0  ;;  %v4411_v3 = vunpack.c.l.b16 %v4395_v23 }
 0x421   : > { %4257 = vmatmul.bf16.gmra.mxu1 %v5763_v57  ;;  %4594 = vmatmul.bf16.gmra.mxu2 %v4418_v56 }
 0x422   : > { %4643 = vmatmul.bf16.gmra.mxu3 %v8297_v15  ;;  %v4419_v22 = vpack.c.b16 %v4411_v3, %v4410_v14 }
 0x424   : > { %v3706_v41 = vpop.f32.mrf.mxu2 }
 0x425   : > { %v3755_v50 = vpop.f32.mrf.mxu3 }
 0x426   : > { %v3756_v48 = vadd.f32 %v3755_v50, %v3706_v41  ;;  %v3339_v63 = vpop.f32.mrf.mxu1 }
 0x427   : > { %v3340_v9 = vadd.f32 %v3339_v63, %v7829_v17  ;;  %v8298_v17 = vld [vmem:[#allocation15_spill] sm:$0xff] }
 0x428   : > { %v7984_v13 = vadd.f32 %v3756_v48, %v3338_v37 }
 0x42c   : > { %v3708_v25 = vpop.f32.mrf.mxu2 }
 0x42d   : > { %v3757_v20 = vpop.f32.mrf.mxu3 }
 0x42e   : > { %v3758_v45 = vadd.f32 %v3757_v20, %v3708_v25  ;;  %v3342_v47 = vpop.f32.mrf.mxu1 }
 0x42f   : > { %v3343_v29 = vadd.f32 %v3342_v47, %v7838_v46 }
 0x430   : > { %v7987_v59 = vadd.f32 %v3758_v45, %v3340_v9 }
 0x431   : > { %4262 = vmatmul.bf16.gmra.mxu1 %v5764_v42  ;;  %4599 = vmatmul.bf16.gmra.mxu2 %v4419_v22 }
 0x432   : > { %4648 = vmatmul.bf16.gmra.mxu3 %v8298_v17 }
 0x434   : > { %v3711_v38 = vpop.f32.mrf.mxu2 }
 0x435   : > { %v3760_v61 = vpop.f32.mrf.mxu3 }
 0x436   : > { %v3761_v52 = vadd.f32 %v3760_v61, %v3711_v38  ;;  %v3344_v6 = vpop.f32.mrf.mxu1 }
 0x437   : > { %v3345_v34 = vadd.f32 %v3344_v6, %v7846_v49 }
 0x438   : > { %v7991_v28 = vadd.f32 %v3761_v52, %v3343_v29 }
 0x43c   : > { %v3713_v19 = vpop.f32.mrf.mxu2 }
 0x43d   : > { %v3762_v4 = vpop.f32.mrf.mxu3 }
 0x43e   : > { %v3763_v31 = vadd.f32 %v3762_v4, %v3713_v19  ;;  %v3347_v30 = vpop.f32.mrf.mxu1 }
 0x43f   : > { %v3348_v46 = vadd.f32 %v3347_v30, %v7850_v33 }
 0x440   : > { %v7994_v57 = vadd.f32 %v3763_v31, %v3345_v34 }
 0x444   : > { %v3716_v36 = vpop.f32.mrf.mxu2 }
 0x445   : > { %v3765_v26 = vpop.f32.mrf.mxu3 }
 0x446   : > { %v3766_v56 = vadd.f32 %v3765_v26, %v3716_v36  ;;  %v3349_v37 = vpop.f32.mrf.mxu1 }
 0x447   : > { %v3350_v40 = vadd.f32 %v3349_v37, %v7864_v12 }
 0x448   : > { %v7997_v10 = vadd.f32 %v3766_v56, %v3348_v46 }
 0x44c   : > { %v3718_v8 = vpop.f32.mrf.mxu2 }
 0x44d   : > { %v3767_v49 = vpop.f32.mrf.mxu3 }
 0x44e   : > { %v3768_v15 = vadd.f32 %v3767_v49, %v3718_v8  ;;  %v4233_v43 = vpop.f32.mrf.mxu1 }
 0x44f   : > { %v4234_v33 = vadd.f32 %v4233_v43, %v7719_v24 }
 0x450   : > { %v7999_v2 = vadd.f32 %v3768_v15, %v3350_v40 }
 0x451   : > { %v4270_v63 = vadd.f32 %v4234_v33, %v7892_v35 }
 0x454   : > { %v4570_v5 = vpop.f32.mrf.mxu2 }
 0x455   : > { %v4619_v41 = vpop.f32.mrf.mxu3 }
 0x456   : > { %v4235_v50 = vpop.f32.mrf.mxu1  ;;  %v4620_v48 = vadd.f32 %v4619_v41, %v4570_v5 }
 0x457   : > { %v4236_v9 = vadd.f32 %v4235_v50, %v7729_v58 }
 0x458   : > { %v4656_v0 = vadd.f32 %v4620_v48, %v4270_v63 }
 0x459   : > { %v4271_v14 = vadd.f32 %v4236_v9, %v7905_v11 }
 0x45a   : > { %v4676_v20 = vadd.f32 %v7922_v7, %v4656_v0 }
 0x45c   : > { %v4572_v12 = vpop.f32.mrf.mxu2  ;;  %v4692_v24 = vmax.f32 %v4676_v20, 0.0 }
 0x45d   : > { %v4621_v23 = vpop.f32.mrf.mxu3 }
 0x45e   : > { %v4622_v3 = vadd.f32 %v4621_v23, %v4572_v12  ;;  %v4238_v25 = vpop.f32.mrf.mxu1 }
 0x45f   : > { %v4239_v58 = vadd.f32 %v4238_v25, %v7743_v27 }
 0x460   : > { %v4657_v42 = vadd.f32 %v4622_v3, %v4271_v14 }
 0x461   : > { %v4272_v61 = vadd.f32 %v4239_v58, %v7924_v44 }
 0x462   : > { %v4677_v45 = vadd.f32 %v7922_v7, %v4657_v42 }
 0x464   : > { %v4693_v47 = vmax.f32 %v4677_v45, 0.0  ;;  %v4575_v22 = vpop.f32.mrf.mxu2 }
 0x465   : > { %v4624_v29 = vpop.f32.mrf.mxu3 }
 0x466   : > { %v5854_v35 = vpack.c.bf16 %v4693_v47, %v4692_v24  ;;  %v4240_v17 = vpop.f32.mrf.mxu1  ;;  %v4625_v38 = vadd.f32 %v4624_v29, %v4575_v22 }
 0x467   : > { %v4241_v11 = vadd.f32 %v4240_v17, %v7753_v16 }
 0x468   : > { %5886 = vst [vmem:[%s6810_s26 + $0x8] sm:$0xff] %v5854_v35   ;;  %v4658_v52 = vadd.f32 %v4625_v38, %v4272_v61 }
 0x469   : > { %v4273_v19 = vadd.f32 %v4241_v11, %v7937_v62 }
 0x46a   : > { %v4678_v30 = vadd.f32 %v7922_v7, %v4658_v52 }
 0x46c   : > { %v4577_v6 = vpop.f32.mrf.mxu2  ;;  %v4694_v36 = vmax.f32 %v4678_v30, 0.0 }
 0x46d   : > { %v4626_v34 = vpop.f32.mrf.mxu3 }
 0x46e   : > { %v4627_v4 = vadd.f32 %v4626_v34, %v4577_v6  ;;  %v4243_v31 = vpop.f32.mrf.mxu1 }
 0x46f   : > { %v4244_v16 = vadd.f32 %v4243_v31, %v7765_v1 }
 0x470   : > { %v4659_v46 = vadd.f32 %v4627_v4, %v4273_v19 }
 0x471   : > { %v4274_v49 = vadd.f32 %v4244_v16, %v7946_v51  ;;  %v8299_v16 = vld [vmem:[#allocation25_spill] sm:$0xff] }
 0x472   : > { %v4679_v27 = vadd.f32 %v7922_v7, %v4659_v46 }
 0x474   : > { %v4695_v26 = vmax.f32 %v4679_v27, 0.0  ;;  %v4580_v56 = vpop.f32.mrf.mxu2 }
 0x475   : > { %v4629_v37 = vpop.f32.mrf.mxu3 }
 0x476   : > { %v5859_v44 = vpack.c.bf16 %v4695_v26, %v4694_v36  ;;  %v4245_v40 = vpop.f32.mrf.mxu1  ;;  %v4630_v8 = vadd.f32 %v4629_v37, %v4580_v56 }
 0x477   : > { %v4246_v62 = vadd.f32 %v4245_v40, %v7773_v53 }
 0x478   : > { %5887 = vst [vmem:[%s6810_s26 + $0x10] sm:$0xff] %v5859_v44   ;;  %v4660_v15 = vadd.f32 %v4630_v8, %v4274_v49 }
 0x479   : > { %v4275_v41 = vadd.f32 %v4246_v62, %v7957_v60 }
 0x47a   : > { %v4680_v48 = vadd.f32 %v7922_v7, %v4660_v15 }
 0x47c   : > { %v4582_v43 = vpop.f32.mrf.mxu2  ;;  %v4696_v9 = vmax.f32 %v4680_v48, 0.0 }
 0x47d   : > { %v4631_v5 = vpop.f32.mrf.mxu3 }
 0x47e   : > { %v4632_v33 = vadd.f32 %v4631_v5, %v4582_v43  ;;  %v4248_v50 = vpop.f32.mrf.mxu1 }
 0x47f   : > { %v4249_v53 = vadd.f32 %v4248_v50, %v7785_v21 }
 0x480   : > { %v4661_v63 = vadd.f32 %v4632_v33, %v4275_v41 }
 0x481   : > { %v4276_v25 = vadd.f32 %v4249_v53, %v7965_v18 }
 0x482   : > { %v4681_v1 = vadd.f32 %v7922_v7, %v4661_v63 }
 0x484   : > { %v4697_v0 = vmax.f32 %v4681_v1, 0.0  ;;  %v4585_v12 = vpop.f32.mrf.mxu2 }
 0x485   : > { %v4634_v23 = vpop.f32.mrf.mxu3 }
 0x486   : > { %v5864_v51 = vpack.c.bf16 %v4697_v0, %v4696_v9  ;;  %v4250_v14 = vpop.f32.mrf.mxu1  ;;  %v4635_v3 = vadd.f32 %v4634_v23, %v4585_v12 }
 0x487   : > { %v4251_v60 = vadd.f32 %v4250_v14, %v7793_v54 }
 0x488   : > { %5888 = vst [vmem:[%s6810_s26 + $0x18] sm:$0xff] %v5864_v51   ;;  %v4662_v20 = vadd.f32 %v4635_v3, %v4276_v25  ;;  %v8301_v51 = vld [vmem:[#allocation27_spill] sm:$0xff]  ;;  %v8302_v25 = vld [vmem:[#allocation28_spill] sm:$0xff] }
 0x489   : > { %v4277_v24 = vadd.f32 %v4251_v60, %v7976_v32 }
 0x48a   : > { %v4682_v29 = vadd.f32 %v7922_v7, %v4662_v20 }
 0x48c   : > { %v4587_v42 = vpop.f32.mrf.mxu2  ;;  %v4698_v58 = vmax.f32 %v4682_v29, 0.0 }
 0x48d   : > { %v4636_v45 = vpop.f32.mrf.mxu3 }
 0x48e   : > { %v4637_v47 = vadd.f32 %v4636_v45, %v4587_v42  ;;  %v4253_v22 = vpop.f32.mrf.mxu1 }
 0x48f   : > { %v4254_v54 = vadd.f32 %v4253_v22, %v7805_v39 }
 0x490   : > { %v4663_v35 = vadd.f32 %v4637_v47, %v4277_v24 }
 0x491   : > { %v4278_v6 = vadd.f32 %v4254_v54, %v7984_v13 }
 0x492   : > { %v4683_v21 = vadd.f32 %v7922_v7, %v4663_v35 }
 0x494   : > { %v4699_v17 = vmax.f32 %v4683_v21, 0.0  ;;  %v4590_v38 = vpop.f32.mrf.mxu2 }
 0x495   : > { %v4639_v61 = vpop.f32.mrf.mxu3 }
 0x496   : > { %v5869_v18 = vpack.c.bf16 %v4699_v17, %v4698_v58  ;;  %v4255_v11 = vpop.f32.mrf.mxu1  ;;  %v4640_v52 = vadd.f32 %v4639_v61, %v4590_v38 }
 0x497   : > { %v4256_v32 = vadd.f32 %v4255_v11, %v7813_v55 }
 0x498   : > { %5889 = vst [vmem:[%s6810_s26 + $0x20] sm:$0xff] %v5869_v18   ;;  %v4664_v34 = vadd.f32 %v4640_v52, %v4278_v6 }
 0x499   : > { %v4279_v31 = vadd.f32 %v4256_v32, %v7987_v59  ;;  %v8300_v59 = vld [vmem:[#allocation26_spill] sm:$0xff] }
 0x49a   : > { %v4684_v27 = vadd.f32 %v7922_v7, %v4664_v34 }
 0x49c   : > { %v4592_v19 = vpop.f32.mrf.mxu2  ;;  %v4700_v26 = vmax.f32 %v4684_v27, 0.0 }
 0x49d   : > { %v4641_v4 = vpop.f32.mrf.mxu3 }
 0x49e   : > { %v4642_v30 = vadd.f32 %v4641_v4, %v4592_v19  ;;  %v4258_v46 = vpop.f32.mrf.mxu1 }
 0x49f   : > { %v4259_v55 = vadd.f32 %v4258_v46, %v8299_v16 }
 0x4a0   : > { %v4665_v36 = vadd.f32 %v4642_v30, %v4279_v31 }
 0x4a1   : > { %v4280_v49 = vadd.f32 %v4259_v55, %v7991_v28 }
 0x4a2   : > { %v4685_v39 = vadd.f32 %v7922_v7, %v4665_v36 }
 0x4a4   : > { %v4701_v56 = vmax.f32 %v4685_v39, 0.0  ;;  %v4595_v37 = vpop.f32.mrf.mxu2 }
 0x4a5   : > { %v4644_v44 = vpop.f32.mrf.mxu3 }
 0x4a6   : > { %v5874_v13 = vpack.c.bf16 %v4701_v56, %v4700_v26  ;;  %v4260_v40 = vpop.f32.mrf.mxu1  ;;  %v4645_v8 = vadd.f32 %v4644_v44, %v4595_v37 }
 0x4a7   : > { %v4261_v62 = vadd.f32 %v4260_v40, %v8300_v59 }
 0x4a8   : > { %5890 = vst [vmem:[%s6810_s26 + $0x28] sm:$0xff] %v5874_v13   ;;  %v4666_v15 = vadd.f32 %v4645_v8, %v4280_v49 }
 0x4a9   : > { %v4281_v41 = vadd.f32 %v4261_v62, %v7994_v57 }
 0x4aa   : > { %v4686_v48 = vadd.f32 %v7922_v7, %v4666_v15 }
 0x4ac   : > { %v4597_v43 = vpop.f32.mrf.mxu2  ;;  %v4702_v9 = vmax.f32 %v4686_v48, 0.0 }
 0x4ad   : > { %v4646_v5 = vpop.f32.mrf.mxu3 }
 0x4ae   : > { %v4647_v33 = vadd.f32 %v4646_v5, %v4597_v43  ;;  %v4263_v50 = vpop.f32.mrf.mxu1 }
 0x4af   : > { %v4264_v53 = vadd.f32 %v4263_v50, %v8301_v51 }
 0x4b0   : > { %v4667_v63 = vadd.f32 %v4647_v33, %v4281_v41 }
 0x4b1   : > { %v4282_v3 = vadd.f32 %v4264_v53, %v7997_v10 }
 0x4b2   : > { %v4687_v1 = vadd.f32 %v7922_v7, %v4667_v63 }
 0x4b4   : > { %v4703_v0 = vmax.f32 %v4687_v1, 0.0  ;;  %v4600_v28 = vpop.f32.mrf.mxu2 }
 0x4b5   : > { %v4649_v12 = vpop.f32.mrf.mxu3 }
 0x4b6   : > { %v5879_v23 = vpack.c.bf16 %v4703_v0, %v4702_v9  ;;  %v4265_v14 = vpop.f32.mrf.mxu1  ;;  %v4650_v57 = vadd.f32 %v4649_v12, %v4600_v28 }
 0x4b7   : > { %v4266_v60 = vadd.f32 %v4265_v14, %v8302_v25 }
 0x4b8   : > { %5891 = vst [vmem:[%s6810_s26 + $0x30] sm:$0xff] %v5879_v23   ;;  %v4668_v20 = vadd.f32 %v4650_v57, %v4282_v3 }
 0x4b9   : > { %v4283_v24 = vadd.f32 %v4266_v60, %v7999_v2 }
 0x4ba   : > { %v4688_v22 = vadd.f32 %v7922_v7, %v4668_v20 }
 0x4bc   : > { %v4602_v42 = vpop.f32.mrf.mxu2  ;;  %v4704_v35 = vmax.f32 %v4688_v22, 0.0 }
 0x4bd   : > { %v4651_v45 = vpop.f32.mrf.mxu3 }
 0x4be   : > { %v4652_v47 = vadd.f32 %v4651_v45, %v4602_v42 }
 0x4c0   : > { %v4669_v29 = vadd.f32 %v4652_v47, %v4283_v24 }
 0x4c2   : > { %v4689_v10 = vadd.f32 %v7922_v7, %v4669_v29 }
 0x4c4   : > { %v4705_v21 = vmax.f32 %v4689_v10, 0.0 }
 0x4c6   : > { %v5884_v58 = vpack.c.bf16 %v4705_v21, %v4704_v35 }
 0x4c8   : > { %5892 = vst [vmem:[%s6810_s26 + $0x38] sm:$0xff] %v5884_v58  }
 0x4c9   : > { %6065 = shalt.err (!%p6062_p12)
}
 0x4ca   : > { %s6143_s30 = smov 64   ;;  %s6144_s26 = smov 4  }
 0x4cb   : > { %5922 = dma.vmem_to_hbm [thread:$0]  (%p6227_p3), %s4755_s17, 1024, %s4757_s27, %s4739_s6, %s6143_s30, %s6143_s30, %s6144_s26  }
 0x4cc PF: > { %p5934_p13 = scmp.ge.s32.totalorder %s6136_s25, 2  ;;  %s4771_s22 = sand.u32 1, %s6108_s18  }
 0x4cd   : > { %s4772_s15 = scalar_lea.sflag [#allocation5], %s4771_s22 }
 0x4ce   : > { %p5929_p0 = pnand %p5934_p13, %p6236_p8 }
 0x4d0   : > { %p5930_p1 = pneg %p5929_p0 }
 0x4d2   : > { %6103 = dma.done.wait (%p5930_p1), %s4772_s15, 1024  }
 0x4d3   : > { %6105 = vsyncadd (%p5930_p1), %s4772_s15, 4294966272  ;;  %s19_s25 = sadd.s32 1, %s6136_s25   ;;  %s8303_s18 = smov %s6112_s19 }
 0x4d4   : > { %p16_p2 = scmp.ge.s32.totalorder %s19_s25, 6   ;;  %s8304_s19 = smov %s6116_s20 }
 0x4d5   : > { %s8305_s20 = smov %s6257_s16  ;;  %s8306_s21 = smov %s6128_s23 }
 0x4d6   : > { %s8307_s22 = smov %s6132_s24  ;;  %s8308_s23 = smov %s8311_s28 }
 0x4d7   : > { %s8309_s24 = smov %s8315_s29  ;;  %18 = sbr.rel (!%p16_p2) target bundleno = 6 (0x6), region = 92 }
 0x4dc   :  { %4778 = vsyncpa [#allocation4], 1 }
 0x4dd   :  { %4780 = vsyncpa [#allocation4 + $0x1], 1 }
 0x4de   :  { %4781 = vsyncpa [#allocation5], 1 }
 0x4df   :  { %4783 = vsyncpa [#allocation5 + $0x1], 1 }

</bundles_post_ra>
